<compile_context>
chip_gen: v6e
topology: v6e:2x2x1
jax: 0.10.0
libtpu: 0.0.40
codegen_flags: <defaults>
</compile_context>

<pallas_src>
import functools

import jax
import jax.numpy as jnp
from jax.experimental import pallas as pl
from jax.experimental.pallas import tpu as pltpu


# ----------------------------------------------------------------------------
# helpers
# ----------------------------------------------------------------------------
def _round_up(x, m):
    return (x + m - 1) // m * m


def _pad_reorder_gate_cols(w, hid, hid_p):
    """Reorder PyTorch gate groups [i, f, g, o] -> [i, f, o, g] along the last
    (4*hid) axis and zero-pad each group to hid_p columns, so the three sigmoid
    gates form one contiguous lane slab and every gate slice stays lane-aligned."""
    lead = w.shape[:-1]
    w = w.reshape(lead + (4, hid))
    w = jnp.take(w, jnp.array([0, 1, 3, 2]), axis=-2)        # [i, f, o, g]
    if hid_p != hid:
        w = jnp.pad(w, [(0, 0)] * len(lead) + [(0, 0), (0, hid_p - hid)])
    return w.reshape(lead + (4 * hid_p,))


def _plan_recurrence(seq_len, batch_p, hid_p, elt_bytes, emit_outputs, t_chunk_max=32):
    """Generation-aware choice of batch block, time chunk, unroll and VMEM limit."""
    try:
        phys_vmem = int(pltpu.get_tpu_info().vmem_capacity_bytes)
    except Exception:
        phys_vmem = 64 * 1024 * 1024          # conservative (v7x per-core VMEM)
    if phys_vmem >= 100 * 1024 * 1024:        # v5e/v6e: deeper time chunks are free
        t_chunk_max *= 2
    budget = int(phys_vmem * 0.6)             # headroom for compiler scratch / spill

    # Batch-shard across the two TensorCores (v7x megacore) only when the shard
    # stays packing-aligned for bf16 blocks (second-minor multiple of 16).
    if batch_p >= 32 and batch_p % 32 == 0:
        b_blk = batch_p // 2
    else:
        b_blk = batch_p

    four_h = 4 * hid_p
    fixed = 2 * hid_p * four_h * elt_bytes    # W_hh (worst case: double-buffered fallback)
    fixed += 2 * four_h * 4                   # bias
    fixed += 2 * 2 * b_blk * hid_p * 4        # h, c carries
    per_t = 2 * b_blk * four_h * elt_bytes    # gates_x double buffer
    if emit_outputs:
        per_t += 2 * b_blk * hid_p * elt_bytes

    # Evenly-sized chunks near t_chunk_max (seq_len is padded up to a multiple).
    n_chunks = -(-seq_len // t_chunk_max)
    t_chunk = -(-seq_len // n_chunks)
    while t_chunk > 1 and fixed + t_chunk * per_t > budget:
        t_chunk = -(-t_chunk // 2)

    need = fixed + t_chunk * per_t
    vmem_limit = int(min(phys_vmem, max(need * 5 // 4, 32 * 1024 * 1024)))

    # vreg-pressure-aware unroll of the in-chunk time loop.
    live = b_blk * four_h * 4                 # dominant per-step f32 working set
    if live <= 64 * 1024:
        unroll = True
    elif live <= 256 * 1024:
        unroll = min(8, t_chunk)
    else:
        unroll = min(4, t_chunk)
    return b_blk, t_chunk, unroll, vmem_limit


# ----------------------------------------------------------------------------
# Pallas kernel: sequential LSTM recurrence only (input projection is hoisted).
# One grid step processes t_chunk timesteps of one batch shard; h/c live in the
# constant-time-index output refs (VMEM-resident across the time axis).
# ----------------------------------------------------------------------------
def _lstm_recurrence_kernel(gx_ref, whh_ref, bias_ref, *out_refs, hid_p, t_chunk,
                            seq_len, emit_outputs, unroll):
    if emit_outputs:
        out_ref, h_ref, c_ref = out_refs
    else:
        h_ref, c_ref = out_refs

    chunk = pl.program_id(1)

    @pl.when(chunk == 0)
    def _():
        h_ref[...] = jnp.zeros_like(h_ref)
        c_ref[...] = jnp.zeros_like(c_ref)

    H = hid_p
    four_h = 4 * hid_p
    b_blk = gx_ref.shape[1]

    # Hoisted out of the timestep loop: recurrent weight (constant block index)
    # and the f32 bias broadcast (JAX does not CSE broadcast_in_dim).
    w_hh = whh_ref[...]                                              # (hid_p, 4*hid_p)
    bias = jnp.broadcast_to(bias_ref[...].astype(jnp.float32), (b_blk, four_h))

    needs_mask = (seq_len % t_chunk) != 0                            # static

    def step(t, carry):
        h_prev, c_prev = carry                                       # f32 (b_blk, hid_p)
        # gates = (x@W_ih^T)  + bias + h_prev @ W_hh^T     gate order [i, f, o, g]
        gates = (gx_ref[t].astype(jnp.float32) + bias
                 + jnp.dot(h_prev.astype(w_hh.dtype), w_hh,
                           preferred_element_type=jnp.float32))
        # sigmoid(x) == 0.5*tanh(0.5*x) + 0.5 computed on one contiguous 3H slab.
        sig = 0.5 * jnp.tanh(0.5 * gates[:, 0:3 * H]) + 0.5
        i_g = sig[:, 0 * H:1 * H]
        f_g = sig[:, 1 * H:2 * H]
        o_g = sig[:, 2 * H:3 * H]
        g_g = jnp.tanh(gates[:, 3 * H:4 * H])
        c_new = f_g * c_prev + i_g * g_g
        h_new = o_g * jnp.tanh(c_new)
        if needs_mask:
            valid = (chunk * t_chunk + t) < seq_len                  # padded tail steps
            h_new = jnp.where(valid, h_new, h_prev)
            c_new = jnp.where(valid, c_new, c_prev)
        if emit_outputs:
            out_ref[t] = h_new.astype(out_ref.dtype)                 # feeds next layer
        return (h_new, c_new)

    h_n, c_n = jax.lax.fori_loop(0, t_chunk, step, (h_ref[...], c_ref[...]),
                                 unroll=unroll)
    # Final-state writes happen once per chunk (not once per timestep).
    h_ref[...] = h_n
    c_ref[...] = c_n


def _recurrence_call(gates_x, w_hh_p, bias_p, *, hid_p, t_chunk, seq_len, b_blk,
                     emit_outputs, out_dtype, unroll, vmem_limit, single_buffer_whh):
    seq_pad, batch_p, four_h = gates_x.shape
    n_chunks = seq_pad // t_chunk
    b_shards = batch_p // b_blk

    whh_kw = {"pipeline_mode": pl.Buffered(1)} if single_buffer_whh else {}

    in_specs = [
        pl.BlockSpec((t_chunk, b_blk, four_h), lambda b, c: (c, b, 0)),
        pl.BlockSpec((hid_p, four_h), lambda b, c: (0, 0), **whh_kw),
        pl.BlockSpec((1, four_h), lambda b, c: (0, 0)),
    ]
    out_specs = []
    out_shape = []
    if emit_outputs:
        out_specs.append(pl.BlockSpec((t_chunk, b_blk, hid_p), lambda b, c: (c, b, 0)))
        out_shape.append(jax.ShapeDtypeStruct((seq_pad, batch_p, hid_p), out_dtype))
    out_specs += [
        pl.BlockSpec((b_blk, hid_p), lambda b, c: (b, 0)),   # h: VMEM-resident carry
        pl.BlockSpec((b_blk, hid_p), lambda b, c: (b, 0)),   # c: VMEM-resident carry
    ]
    out_shape += [
        jax.ShapeDtypeStruct((batch_p, hid_p), jnp.float32),
        jax.ShapeDtypeStruct((batch_p, hid_p), jnp.float32),
    ]

    kernel = functools.partial(
        _lstm_recurrence_kernel, hid_p=hid_p, t_chunk=t_chunk, seq_len=seq_len,
        emit_outputs=emit_outputs, unroll=unroll)

    grid_spec = pltpu.PrefetchScalarGridSpec(
        num_scalar_prefetch=0,
        grid=(b_shards, n_chunks),
        in_specs=in_specs,
        out_specs=out_specs,
        scratch_shapes=[],
    )

    return pl.pallas_call(
        kernel,
        grid_spec=grid_spec,
        out_shape=tuple(out_shape),
        compiler_params=pltpu.CompilerParams(
            dimension_semantics=("parallel", "arbitrary"),   # batch || ; time sequential
            vmem_limit_bytes=vmem_limit,
        ),
    )(gates_x, w_hh_p, bias_p)


def lstm_recurrence_pallas(gates_x, w_hh_p, bias_p, **kw):
    """Sequential part of one LSTM layer.  Tries to single-buffer the constant
    W_hh block (VMEM saver); falls back to default double buffering if the
    pipeline_mode hint is unsupported by this jax/Mosaic version."""
    try:
        return _recurrence_call(gates_x, w_hh_p, bias_p, single_buffer_whh=True, **kw)
    except Exception:
        return _recurrence_call(gates_x, w_hh_p, bias_p, single_buffer_whh=False, **kw)


# ----------------------------------------------------------------------------
# Encoder forward: embedding gather + hoisted input projections in XLA,
# recurrence per layer in Pallas.
# ----------------------------------------------------------------------------
def encoder_forward(params, input_batch, compute_dtype=jnp.bfloat16, t_chunk_max=32):
    """input_batch: (seq_len, batch) int32 token ids -> (hidden, cell),
    each (n_layers, batch, hid_dim) float32, matching the PyTorch module."""
    # Embedding lookup (gather).
    # TODO(synk): dropout implemented with eval semantics (identity); training-mode
    # random masking of the embedding / inter-layer dropout is not reproduced.
    x = jnp.take(params["embedding"], input_batch, axis=0)     # (seq, batch, emb)
    seq_len, batch, _ = x.shape

    batch_p = _round_up(max(batch, 8), 8)
    if batch_p != batch:
        x = jnp.pad(x, ((0, 0), (0, batch_p - batch), (0, 0)))

    n_layers = len(params["lstm"])
    elt_bytes = jnp.dtype(compute_dtype).itemsize
    h_list, c_list = [], []
    for li, layer in enumerate(params["lstm"]):
        hid = layer["w_hh_t"].shape[0]
        hid_p = _round_up(hid, 128)
        emit_outputs = li < n_layers - 1     # last layer: only h_N / c_N are returned

        b_blk, t_chunk, unroll, vmem_limit = _plan_recurrence(
            seq_len, batch_p, hid_p, elt_bytes, emit_outputs, t_chunk_max)

        # Pad/reorder weights per gate group ([i,f,o,g]; padded lanes stay exactly 0).
        w_ih_t_p = _pad_reorder_gate_cols(layer["w_ih_t"], hid, hid_p)  # (in, 4*hid_p)
        w_hh_t_p = _pad_reorder_gate_cols(layer["w_hh_t"], hid, hid_p)  # (hid, 4*hid_p)
        w_hh_t_p = jnp.pad(w_hh_t_p, ((0, hid_p - hid), (0, 0)))
        bias_p = _pad_reorder_gate_cols(layer["bias"], hid, hid_p)      # (1, 4*hid_p)
        # Layers > 0 receive the previous layer's hid_p-padded output: pad input rows.
        if x.shape[-1] != w_ih_t_p.shape[0]:
            w_ih_t_p = jnp.pad(w_ih_t_p, ((0, x.shape[-1] - w_ih_t_p.shape[0]), (0, 0)))

        # Hoisted, time-parallel input projection: one big MXU matmul for all steps.
        # Streamed into the kernel in compute dtype; the f32 bias is added in-kernel.
        gates_x = jnp.einsum(
            "sbe,eg->sbg", x.astype(compute_dtype), w_ih_t_p.astype(compute_dtype),
            preferred_element_type=jnp.float32).astype(compute_dtype)

        seq_pad = _round_up(seq_len, t_chunk)
        if seq_pad != seq_len:   # padded tail timesteps are masked inside the kernel
            gates_x = jnp.pad(gates_x, ((0, seq_pad - seq_len), (0, 0), (0, 0)))

        res = lstm_recurrence_pallas(
            gates_x, w_hh_t_p.astype(compute_dtype), bias_p.astype(jnp.float32),
            hid_p=hid_p, t_chunk=t_chunk, seq_len=seq_len, b_blk=b_blk,
            emit_outputs=emit_outputs, out_dtype=compute_dtype, unroll=unroll,
            vmem_limit=vmem_limit)

        if emit_outputs:
            outputs_p, h_n_p, c_n_p = res
            # TODO(synk): fuse the next layer's input projection with this layer's
            # recurrence chunks to avoid the full HBM round-trip of `outputs_p`.
            x = outputs_p[:seq_len]          # (seq, batch_p, hid_p), padded lanes are 0
        else:
            h_n_p, c_n_p = res
        h_list.append(h_n_p[:batch, :hid])
        c_list.append(c_n_p[:batch, :hid])
        # inter-layer dropout of nn.LSTM is identity in eval mode.

    hidden = jnp.stack(h_list, axis=0)   # (n_layers, batch, hid)
    cell = jnp.stack(c_list, axis=0)     # (n_layers, batch, hid)
    return hidden, cell


# ----------------------------------------------------------------------------
# Pure-JAX f32 reference (for correctness check).
# ----------------------------------------------------------------------------
def encoder_forward_ref(params, input_batch):
    x = jnp.take(params["embedding"], input_batch, axis=0)
    h_list, c_list = [], []
    for layer in params["lstm"]:
        hid = layer["w_hh_t"].shape[0]
        batch = x.shape[1]

        def step(carry, x_t, layer=layer, hid=hid):
            h, c = carry
            gates = x_t @ layer["w_ih_t"] + h @ layer["w_hh_t"] + layer["bias"]
            i = jax.nn.sigmoid(gates[:, 0 * hid:1 * hid])
            f = jax.nn.sigmoid(gates[:, 1 * hid:2 * hid])
            g = jnp.tanh(gates[:, 2 * hid:3 * hid])
            o = jax.nn.sigmoid(gates[:, 3 * hid:4 * hid])
            c_new = f * c + i * g
            h_new = o * jnp.tanh(c_new)
            return (h_new, c_new), h_new

        init = (jnp.zeros((batch, hid), jnp.float32), jnp.zeros((batch, hid), jnp.float32))
        (h_n, c_n), outs = jax.lax.scan(step, init, x)
        x = outs
        h_list.append(h_n)
        c_list.append(c_n)
    return jnp.stack(h_list, axis=0), jnp.stack(c_list, axis=0)


# ----------------------------------------------------------------------------
# Deterministic parameter init (shapes follow the PyTorch module __init__).
# ----------------------------------------------------------------------------
def init_params(key, vocab_len, emb_dim, hid_dim, n_layers):
    keys = jax.random.split(key, 1 + 4 * n_layers)
    params = {"embedding": jax.random.normal(keys[0], (vocab_len, emb_dim), jnp.float32)}
    bound = 1.0 / jnp.sqrt(hid_dim)
    layers = []
    for l in range(n_layers):
        in_dim = emb_dim if l == 0 else hid_dim
        k0, k1, k2, k3 = keys[1 + 4 * l: 1 + 4 * (l + 1)]
        w_ih = jax.random.uniform(k0, (4 * hid_dim, in_dim), jnp.float32, -bound, bound)
        w_hh = jax.random.uniform(k1, (4 * hid_dim, hid_dim), jnp.float32, -bound, bound)
        b_ih = jax.random.uniform(k2, (4 * hid_dim,), jnp.float32, -bound, bound)
        b_hh = jax.random.uniform(k3, (4 * hid_dim,), jnp.float32, -bound, bound)
        layers.append({
            "w_ih_t": w_ih.T,                               # (in_dim, 4*hid) [i,f,g,o]
            "w_hh_t": w_hh.T,                               # (hid, 4*hid)   [i,f,g,o]
            "bias": (b_ih + b_hh).reshape(1, 4 * hid_dim),  # (1, 4*hid)
        })
    params["lstm"] = layers
    return params


if __name__ == "__main__":
    # Small, deterministic example consistent with the module.
    vocab_len, emb_dim, hid_dim, n_layers = 50, 16, 32, 2
    seq_len, batch = 8, 2

    key = jax.random.PRNGKey(0)
    k_param, k_tok = jax.random.split(key)
    params = init_params(k_param, vocab_len, emb_dim, hid_dim, n_layers)
    input_batch = jax.random.randint(k_tok, (seq_len, batch), 0, vocab_len, dtype=jnp.int32)

    hidden_ref, cell_ref = encoder_forward_ref(params, input_batch)

    # f32 path: tight check against the pure-JAX reference.
    h32, c32 = jax.block_until_ready(
        encoder_forward(params, input_batch, compute_dtype=jnp.float32))
    assert h32.shape == (n_layers, batch, hid_dim)
    assert c32.shape == (n_layers, batch, hid_dim)
    assert jnp.allclose(h32, hidden_ref, atol=2e-3, rtol=2e-3)
    assert jnp.allclose(c32, cell_ref, atol=2e-3, rtol=2e-3)

    # bf16 fast path (bf16 gates_x / outputs / W_hh, f32 accumulation & gate math).
    hbf, cbf = jax.block_until_ready(
        encoder_forward(params, input_batch, compute_dtype=jnp.bfloat16))
    assert jnp.allclose(hbf, hidden_ref, atol=5e-2, rtol=5e-2)
    assert jnp.allclose(cbf, cell_ref, atol=5e-2, rtol=5e-2)

    print("KERNEL_OK")
</pallas_src>

<mosaic_0001>
module attributes {stable_mosaic.version = 11 : i64} {
  func.func @_lstm_recurrence_kernel(%arg0: i32, %arg1: i32, %arg2: memref<8x8x512xf32, #tpu.memory_space<vmem>>, %arg3: memref<128x512xf32, #tpu.memory_space<vmem>>, %arg4: memref<1x512xf32, #tpu.memory_space<vmem>>, %arg5: memref<8x8x128xf32, #tpu.memory_space<vmem>>, %arg6: memref<8x128xf32, #tpu.memory_space<vmem>>, %arg7: memref<8x128xf32, #tpu.memory_space<vmem>>) attributes {dimension_semantics = [#tpu.dimension_semantics<parallel>, #tpu.dimension_semantics<arbitrary>], iteration_bounds = array<i64: 1, 1>, scalar_prefetch = 0 : i64, scratch_operands = 0 : i64, tpu.core_type = #tpu.core_type<tc>, window_params = [{transform_indices = @transform_0, window_bounds = array<i64: 8, 8, 512>}, {pipeline_mode = #tpu.pipeline_mode<synchronous>, transform_indices = @transform_1, window_bounds = array<i64: 128, 512>}, {pipeline_mode = #tpu.pipeline_mode<synchronous>, transform_indices = @transform_2, window_bounds = array<i64: 1, 512>}, {transform_indices = @transform_3, window_bounds = array<i64: 8, 8, 128>}, {transform_indices = @transform_4, window_bounds = array<i64: 8, 128>}, {transform_indices = @transform_5, window_bounds = array<i64: 8, 128>}]} {
    %c0_i32 = arith.constant 0 : i32
    %0 = arith.cmpi eq, %arg1, %c0_i32 : i32
    %1 = arith.extui %0 : i1 to i32
    %c0_i32_0 = arith.constant 0 : i32
    %2 = arith.cmpi ne, %1, %c0_i32_0 : i32
    scf.if %2 {
      %cst_76 = arith.constant 0.000000e+00 : f32
      %235 = vector.broadcast %cst_76 : f32 to vector<8x128xf32>
      %c0_77 = arith.constant 0 : index
      %c0_78 = arith.constant 0 : index
      %236 = vector.load %arg6[%c0_77, %c0_78] : memref<8x128xf32, #tpu.memory_space<vmem>>, vector<8x128xf32>
      tpu.vector_store %arg6[%c0_77, %c0_78], %235 {strides = array<i32>} : memref<8x128xf32, #tpu.memory_space<vmem>>, vector<8x128xf32>,
      %cst_79 = arith.constant 0.000000e+00 : f32
      %237 = vector.broadcast %cst_79 : f32 to vector<8x128xf32>
      %c0_80 = arith.constant 0 : index
      %c0_81 = arith.constant 0 : index
      %238 = vector.load %arg7[%c0_80, %c0_81] : memref<8x128xf32, #tpu.memory_space<vmem>>, vector<8x128xf32>
      tpu.vector_store %arg7[%c0_80, %c0_81], %237 {strides = array<i32>} : memref<8x128xf32, #tpu.memory_space<vmem>>, vector<8x128xf32>,
    } else {
    }
    %c0 = arith.constant 0 : index
    %c0_1 = arith.constant 0 : index
    %3 = vector.load %arg3[%c0, %c0_1] : memref<128x512xf32, #tpu.memory_space<vmem>>, vector<128x512xf32>
    %c0_2 = arith.constant 0 : index
    %c0_3 = arith.constant 0 : index
    %4 = vector.load %arg4[%c0_2, %c0_3] : memref<1x512xf32, #tpu.memory_space<vmem>>, vector<1x512xf32>
    %5 = vector.shape_cast %4 : vector<1x512xf32> to vector<1x512xf32>
    %6 = vector.broadcast %5 : vector<1x512xf32> to vector<8x512xf32>
    %c0_4 = arith.constant 0 : index
    %c0_5 = arith.constant 0 : index
    %7 = vector.load %arg6[%c0_4, %c0_5] : memref<8x128xf32, #tpu.memory_space<vmem>>, vector<8x128xf32>
    %c0_6 = arith.constant 0 : index
    %c0_7 = arith.constant 0 : index
    %8 = vector.load %arg7[%c0_6, %c0_7] : memref<8x128xf32, #tpu.memory_space<vmem>>, vector<8x128xf32>
    %c0_i32_8 = arith.constant 0 : i32
    %9 = arith.index_cast %c0_i32_8 : i32 to index
    %c0_9 = arith.constant 0 : index
    %c0_10 = arith.constant 0 : index
    %10 = vector.load %arg2[%9, %c0_9, %c0_10] : memref<8x8x512xf32, #tpu.memory_space<vmem>>, vector<1x8x512xf32>
    %11 = vector.shape_cast %10 : vector<1x8x512xf32> to vector<8x512xf32>
    %12 = arith.addf %11, %6 : vector<8x512xf32>
    %cst = arith.constant dense<0.000000e+00> : vector<8x512xf32>
    %13 = tpu.matmul %7, %3, %cst {dimension_numbers = #tpu.dot_dimension_numbers<[1], [0], [0], [1], [0, 0, 1, 1], [], []>} : vector<8x128xf32>, vector<128x512xf32>, vector<8x512xf32> -> vector<8x512xf32>
    %14 = arith.addf %12, %13 : vector<8x512xf32>
    %15 = vector.extract_strided_slice %14 {offsets = [0, 0], sizes = [8, 384], strides = [1, 1]} : vector<8x512xf32> to vector<8x384xf32>
    %cst_11 = arith.constant 5.000000e-01 : f32
    %16 = vector.broadcast %cst_11 : f32 to vector<8x384xf32>
    %17 = arith.mulf %16, %15 : vector<8x384xf32>
    %18 = math.tanh %17 : vector<8x384xf32>
    %cst_12 = arith.constant 5.000000e-01 : f32
    %19 = vector.broadcast %cst_12 : f32 to vector<8x384xf32>
    %20 = arith.mulf %19, %18 : vector<8x384xf32>
    %cst_13 = arith.constant 5.000000e-01 : f32
    %21 = vector.broadcast %cst_13 : f32 to vector<8x384xf32>
    %22 = arith.addf %20, %21 : vector<8x384xf32>
    %23 = vector.extract_strided_slice %22 {offsets = [0, 0], sizes = [8, 128], strides = [1, 1]} : vector<8x384xf32> to vector<8x128xf32>
    %24 = vector.extract_strided_slice %22 {offsets = [0, 128], sizes = [8, 128], strides = [1, 1]} : vector<8x384xf32> to vector<8x128xf32>
    %25 = vector.extract_strided_slice %22 {offsets = [0, 256], sizes = [8, 128], strides = [1, 1]} : vector<8x384xf32> to vector<8x128xf32>
    %26 = vector.extract_strided_slice %14 {offsets = [0, 384], sizes = [8, 128], strides = [1, 1]} : vector<8x512xf32> to vector<8x128xf32>
    %27 = math.tanh %26 : vector<8x128xf32>
    %28 = arith.mulf %24, %8 : vector<8x128xf32>
    %29 = arith.mulf %23, %27 : vector<8x128xf32>
    %30 = arith.addf %28, %29 : vector<8x128xf32>
    %31 = math.tanh %30 : vector<8x128xf32>
    %32 = arith.mulf %25, %31 : vector<8x128xf32>
    %33 = arith.index_cast %c0_i32_8 : i32 to index
    %c0_14 = arith.constant 0 : index
    %c0_15 = arith.constant 0 : index
    %34 = vector.load %arg5[%33, %c0_14, %c0_15] : memref<8x8x128xf32, #tpu.memory_space<vmem>>, vector<1x8x128xf32>
    %35 = vector.shape_cast %34 : vector<1x8x128xf32> to vector<8x128xf32>
    %36 = vector.shape_cast %32 : vector<8x128xf32> to vector<1x8x128xf32>
    tpu.vector_store %arg5[%33, %c0_14, %c0_15], %36 {strides = array<i32>} : memref<8x8x128xf32, #tpu.memory_space<vmem>>, vector<1x8x128xf32>,
    %c1_i32 = arith.constant 1 : i32
    %37 = arith.index_cast %c1_i32 : i32 to index
    %c0_16 = arith.constant 0 : index
    %c0_17 = arith.constant 0 : index
    %38 = vector.load %arg2[%37, %c0_16, %c0_17] : memref<8x8x512xf32, #tpu.memory_space<vmem>>, vector<1x8x512xf32>
    %39 = vector.shape_cast %38 : vector<1x8x512xf32> to vector<8x512xf32>
    %40 = arith.addf %39, %6 : vector<8x512xf32>
    %cst_18 = arith.constant dense<0.000000e+00> : vector<8x512xf32>
    %41 = tpu.matmul %32, %3, %cst_18 {dimension_numbers = #tpu.dot_dimension_numbers<[1], [0], [0], [1], [0, 0, 1, 1], [], []>} : vector<8x128xf32>, vector<128x512xf32>, vector<8x512xf32> -> vector<8x512xf32>
    %42 = arith.addf %40, %41 : vector<8x512xf32>
    %43 = vector.extract_strided_slice %42 {offsets = [0, 0], sizes = [8, 384], strides = [1, 1]} : vector<8x512xf32> to vector<8x384xf32>
    %cst_19 = arith.constant 5.000000e-01 : f32
    %44 = vector.broadcast %cst_19 : f32 to vector<8x384xf32>
    %45 = arith.mulf %44, %43 : vector<8x384xf32>
    %46 = math.tanh %45 : vector<8x384xf32>
    %cst_20 = arith.constant 5.000000e-01 : f32
    %47 = vector.broadcast %cst_20 : f32 to vector<8x384xf32>
    %48 = arith.mulf %47, %46 : vector<8x384xf32>
    %cst_21 = arith.constant 5.000000e-01 : f32
    %49 = vector.broadcast %cst_21 : f32 to vector<8x384xf32>
    %50 = arith.addf %48, %49 : vector<8x384xf32>
    %51 = vector.extract_strided_slice %50 {offsets = [0, 0], sizes = [8, 128], strides = [1, 1]} : vector<8x384xf32> to vector<8x128xf32>
    %52 = vector.extract_strided_slice %50 {offsets = [0, 128], sizes = [8, 128], strides = [1, 1]} : vector<8x384xf32> to vector<8x128xf32>
    %53 = vector.extract_strided_slice %50 {offsets = [0, 256], sizes = [8, 128], strides = [1, 1]} : vector<8x384xf32> to vector<8x128xf32>
    %54 = vector.extract_strided_slice %42 {offsets = [0, 384], sizes = [8, 128], strides = [1, 1]} : vector<8x512xf32> to vector<8x128xf32>
    %55 = math.tanh %54 : vector<8x128xf32>
    %56 = arith.mulf %52, %30 : vector<8x128xf32>
    %57 = arith.mulf %51, %55 : vector<8x128xf32>
    %58 = arith.addf %56, %57 : vector<8x128xf32>
    %59 = math.tanh %58 : vector<8x128xf32>
    %60 = arith.mulf %53, %59 : vector<8x128xf32>
    %61 = arith.index_cast %c1_i32 : i32 to index
    %c0_22 = arith.constant 0 : index
    %c0_23 = arith.constant 0 : index
    %62 = vector.load %arg5[%61, %c0_22, %c0_23] : memref<8x8x128xf32, #tpu.memory_space<vmem>>, vector<1x8x128xf32>
    %63 = vector.shape_cast %62 : vector<1x8x128xf32> to vector<8x128xf32>
    %64 = vector.shape_cast %60 : vector<8x128xf32> to vector<1x8x128xf32>
    tpu.vector_store %arg5[%61, %c0_22, %c0_23], %64 {strides = array<i32>} : memref<8x8x128xf32, #tpu.memory_space<vmem>>, vector<1x8x128xf32>,
    %c2_i32 = arith.constant 2 : i32
    %65 = arith.index_cast %c2_i32 : i32 to index
    %c0_24 = arith.constant 0 : index
    %c0_25 = arith.constant 0 : index
    %66 = vector.load %arg2[%65, %c0_24, %c0_25] : memref<8x8x512xf32, #tpu.memory_space<vmem>>, vector<1x8x512xf32>
    %67 = vector.shape_cast %66 : vector<1x8x512xf32> to vector<8x512xf32>
    %68 = arith.addf %67, %6 : vector<8x512xf32>
    %cst_26 = arith.constant dense<0.000000e+00> : vector<8x512xf32>
    %69 = tpu.matmul %60, %3, %cst_26 {dimension_numbers = #tpu.dot_dimension_numbers<[1], [0], [0], [1], [0, 0, 1, 1], [], []>} : vector<8x128xf32>, vector<128x512xf32>, vector<8x512xf32> -> vector<8x512xf32>
    %70 = arith.addf %68, %69 : vector<8x512xf32>
    %71 = vector.extract_strided_slice %70 {offsets = [0, 0], sizes = [8, 384], strides = [1, 1]} : vector<8x512xf32> to vector<8x384xf32>
    %cst_27 = arith.constant 5.000000e-01 : f32
    %72 = vector.broadcast %cst_27 : f32 to vector<8x384xf32>
    %73 = arith.mulf %72, %71 : vector<8x384xf32>
    %74 = math.tanh %73 : vector<8x384xf32>
    %cst_28 = arith.constant 5.000000e-01 : f32
    %75 = vector.broadcast %cst_28 : f32 to vector<8x384xf32>
    %76 = arith.mulf %75, %74 : vector<8x384xf32>
    %cst_29 = arith.constant 5.000000e-01 : f32
    %77 = vector.broadcast %cst_29 : f32 to vector<8x384xf32>
    %78 = arith.addf %76, %77 : vector<8x384xf32>
    %79 = vector.extract_strided_slice %78 {offsets = [0, 0], sizes = [8, 128], strides = [1, 1]} : vector<8x384xf32> to vector<8x128xf32>
    %80 = vector.extract_strided_slice %78 {offsets = [0, 128], sizes = [8, 128], strides = [1, 1]} : vector<8x384xf32> to vector<8x128xf32>
    %81 = vector.extract_strided_slice %78 {offsets = [0, 256], sizes = [8, 128], strides = [1, 1]} : vector<8x384xf32> to vector<8x128xf32>
    %82 = vector.extract_strided_slice %70 {offsets = [0, 384], sizes = [8, 128], strides = [1, 1]} : vector<8x512xf32> to vector<8x128xf32>
    %83 = math.tanh %82 : vector<8x128xf32>
    %84 = arith.mulf %80, %58 : vector<8x128xf32>
    %85 = arith.mulf %79, %83 : vector<8x128xf32>
    %86 = arith.addf %84, %85 : vector<8x128xf32>
    %87 = math.tanh %86 : vector<8x128xf32>
    %88 = arith.mulf %81, %87 : vector<8x128xf32>
    %89 = arith.index_cast %c2_i32 : i32 to index
    %c0_30 = arith.constant 0 : index
    %c0_31 = arith.constant 0 : index
    %90 = vector.load %arg5[%89, %c0_30, %c0_31] : memref<8x8x128xf32, #tpu.memory_space<vmem>>, vector<1x8x128xf32>
    %91 = vector.shape_cast %90 : vector<1x8x128xf32> to vector<8x128xf32>
    %92 = vector.shape_cast %88 : vector<8x128xf32> to vector<1x8x128xf32>
    tpu.vector_store %arg5[%89, %c0_30, %c0_31], %92 {strides = array<i32>} : memref<8x8x128xf32, #tpu.memory_space<vmem>>, vector<1x8x128xf32>,
    %c3_i32 = arith.constant 3 : i32
    %93 = arith.index_cast %c3_i32 : i32 to index
    %c0_32 = arith.constant 0 : index
    %c0_33 = arith.constant 0 : index
    %94 = vector.load %arg2[%93, %c0_32, %c0_33] : memref<8x8x512xf32, #tpu.memory_space<vmem>>, vector<1x8x512xf32>
    %95 = vector.shape_cast %94 : vector<1x8x512xf32> to vector<8x512xf32>
    %96 = arith.addf %95, %6 : vector<8x512xf32>
    %cst_34 = arith.constant dense<0.000000e+00> : vector<8x512xf32>
    %97 = tpu.matmul %88, %3, %cst_34 {dimension_numbers = #tpu.dot_dimension_numbers<[1], [0], [0], [1], [0, 0, 1, 1], [], []>} : vector<8x128xf32>, vector<128x512xf32>, vector<8x512xf32> -> vector<8x512xf32>
    %98 = arith.addf %96, %97 : vector<8x512xf32>
    %99 = vector.extract_strided_slice %98 {offsets = [0, 0], sizes = [8, 384], strides = [1, 1]} : vector<8x512xf32> to vector<8x384xf32>
    %cst_35 = arith.constant 5.000000e-01 : f32
    %100 = vector.broadcast %cst_35 : f32 to vector<8x384xf32>
    %101 = arith.mulf %100, %99 : vector<8x384xf32>
    %102 = math.tanh %101 : vector<8x384xf32>
    %cst_36 = arith.constant 5.000000e-01 : f32
    %103 = vector.broadcast %cst_36 : f32 to vector<8x384xf32>
    %104 = arith.mulf %103, %102 : vector<8x384xf32>
    %cst_37 = arith.constant 5.000000e-01 : f32
    %105 = vector.broadcast %cst_37 : f32 to vector<8x384xf32>
    %106 = arith.addf %104, %105 : vector<8x384xf32>
    %107 = vector.extract_strided_slice %106 {offsets = [0, 0], sizes = [8, 128], strides = [1, 1]} : vector<8x384xf32> to vector<8x128xf32>
    %108 = vector.extract_strided_slice %106 {offsets = [0, 128], sizes = [8, 128], strides = [1, 1]} : vector<8x384xf32> to vector<8x128xf32>
    %109 = vector.extract_strided_slice %106 {offsets = [0, 256], sizes = [8, 128], strides = [1, 1]} : vector<8x384xf32> to vector<8x128xf32>
    %110 = vector.extract_strided_slice %98 {offsets = [0, 384], sizes = [8, 128], strides = [1, 1]} : vector<8x512xf32> to vector<8x128xf32>
    %111 = math.tanh %110 : vector<8x128xf32>
    %112 = arith.mulf %108, %86 : vector<8x128xf32>
    %113 = arith.mulf %107, %111 : vector<8x128xf32>
    %114 = arith.addf %112, %113 : vector<8x128xf32>
    %115 = math.tanh %114 : vector<8x128xf32>
    %116 = arith.mulf %109, %115 : vector<8x128xf32>
    %117 = arith.index_cast %c3_i32 : i32 to index
    %c0_38 = arith.constant 0 : index
    %c0_39 = arith.constant 0 : index
    %118 = vector.load %arg5[%117, %c0_38, %c0_39] : memref<8x8x128xf32, #tpu.memory_space<vmem>>, vector<1x8x128xf32>
    %119 = vector.shape_cast %118 : vector<1x8x128xf32> to vector<8x128xf32>
    %120 = vector.shape_cast %116 : vector<8x128xf32> to vector<1x8x128xf32>
    tpu.vector_store %arg5[%117, %c0_38, %c0_39], %120 {strides = array<i32>} : memref<8x8x128xf32, #tpu.memory_space<vmem>>, vector<1x8x128xf32>,
    %c4_i32 = arith.constant 4 : i32
    %121 = arith.index_cast %c4_i32 : i32 to index
    %c0_40 = arith.constant 0 : index
    %c0_41 = arith.constant 0 : index
    %122 = vector.load %arg2[%121, %c0_40, %c0_41] : memref<8x8x512xf32, #tpu.memory_space<vmem>>, vector<1x8x512xf32>
    %123 = vector.shape_cast %122 : vector<1x8x512xf32> to vector<8x512xf32>
    %124 = arith.addf %123, %6 : vector<8x512xf32>
    %cst_42 = arith.constant dense<0.000000e+00> : vector<8x512xf32>
    %125 = tpu.matmul %116, %3, %cst_42 {dimension_numbers = #tpu.dot_dimension_numbers<[1], [0], [0], [1], [0, 0, 1, 1], [], []>} : vector<8x128xf32>, vector<128x512xf32>, vector<8x512xf32> -> vector<8x512xf32>
    %126 = arith.addf %124, %125 : vector<8x512xf32>
    %127 = vector.extract_strided_slice %126 {offsets = [0, 0], sizes = [8, 384], strides = [1, 1]} : vector<8x512xf32> to vector<8x384xf32>
    %cst_43 = arith.constant 5.000000e-01 : f32
    %128 = vector.broadcast %cst_43 : f32 to vector<8x384xf32>
    %129 = arith.mulf %128, %127 : vector<8x384xf32>
    %130 = math.tanh %129 : vector<8x384xf32>
    %cst_44 = arith.constant 5.000000e-01 : f32
    %131 = vector.broadcast %cst_44 : f32 to vector<8x384xf32>
    %132 = arith.mulf %131, %130 : vector<8x384xf32>
    %cst_45 = arith.constant 5.000000e-01 : f32
    %133 = vector.broadcast %cst_45 : f32 to vector<8x384xf32>
    %134 = arith.addf %132, %133 : vector<8x384xf32>
    %135 = vector.extract_strided_slice %134 {offsets = [0, 0], sizes = [8, 128], strides = [1, 1]} : vector<8x384xf32> to vector<8x128xf32>
    %136 = vector.extract_strided_slice %134 {offsets = [0, 128], sizes = [8, 128], strides = [1, 1]} : vector<8x384xf32> to vector<8x128xf32>
    %137 = vector.extract_strided_slice %134 {offsets = [0, 256], sizes = [8, 128], strides = [1, 1]} : vector<8x384xf32> to vector<8x128xf32>
    %138 = vector.extract_strided_slice %126 {offsets = [0, 384], sizes = [8, 128], strides = [1, 1]} : vector<8x512xf32> to vector<8x128xf32>
    %139 = math.tanh %138 : vector<8x128xf32>
    %140 = arith.mulf %136, %114 : vector<8x128xf32>
    %141 = arith.mulf %135, %139 : vector<8x128xf32>
    %142 = arith.addf %140, %141 : vector<8x128xf32>
    %143 = math.tanh %142 : vector<8x128xf32>
    %144 = arith.mulf %137, %143 : vector<8x128xf32>
    %145 = arith.index_cast %c4_i32 : i32 to index
    %c0_46 = arith.constant 0 : index
    %c0_47 = arith.constant 0 : index
    %146 = vector.load %arg5[%145, %c0_46, %c0_47] : memref<8x8x128xf32, #tpu.memory_space<vmem>>, vector<1x8x128xf32>
    %147 = vector.shape_cast %146 : vector<1x8x128xf32> to vector<8x128xf32>
    %148 = vector.shape_cast %144 : vector<8x128xf32> to vector<1x8x128xf32>
    tpu.vector_store %arg5[%145, %c0_46, %c0_47], %148 {strides = array<i32>} : memref<8x8x128xf32, #tpu.memory_space<vmem>>, vector<1x8x128xf32>,
    %c5_i32 = arith.constant 5 : i32
    %149 = arith.index_cast %c5_i32 : i32 to index
    %c0_48 = arith.constant 0 : index
    %c0_49 = arith.constant 0 : index
    %150 = vector.load %arg2[%149, %c0_48, %c0_49] : memref<8x8x512xf32, #tpu.memory_space<vmem>>, vector<1x8x512xf32>
    %151 = vector.shape_cast %150 : vector<1x8x512xf32> to vector<8x512xf32>
    %152 = arith.addf %151, %6 : vector<8x512xf32>
    %cst_50 = arith.constant dense<0.000000e+00> : vector<8x512xf32>
    %153 = tpu.matmul %144, %3, %cst_50 {dimension_numbers = #tpu.dot_dimension_numbers<[1], [0], [0], [1], [0, 0, 1, 1], [], []>} : vector<8x128xf32>, vector<128x512xf32>, vector<8x512xf32> -> vector<8x512xf32>
    %154 = arith.addf %152, %153 : vector<8x512xf32>
    %155 = vector.extract_strided_slice %154 {offsets = [0, 0], sizes = [8, 384], strides = [1, 1]} : vector<8x512xf32> to vector<8x384xf32>
    %cst_51 = arith.constant 5.000000e-01 : f32
    %156 = vector.broadcast %cst_51 : f32 to vector<8x384xf32>
    %157 = arith.mulf %156, %155 : vector<8x384xf32>
    %158 = math.tanh %157 : vector<8x384xf32>
    %cst_52 = arith.constant 5.000000e-01 : f32
    %159 = vector.broadcast %cst_52 : f32 to vector<8x384xf32>
    %160 = arith.mulf %159, %158 : vector<8x384xf32>
    %cst_53 = arith.constant 5.000000e-01 : f32
    %161 = vector.broadcast %cst_53 : f32 to vector<8x384xf32>
    %162 = arith.addf %160, %161 : vector<8x384xf32>
    %163 = vector.extract_strided_slice %162 {offsets = [0, 0], sizes = [8, 128], strides = [1, 1]} : vector<8x384xf32> to vector<8x128xf32>
    %164 = vector.extract_strided_slice %162 {offsets = [0, 128], sizes = [8, 128], strides = [1, 1]} : vector<8x384xf32> to vector<8x128xf32>
    %165 = vector.extract_strided_slice %162 {offsets = [0, 256], sizes = [8, 128], strides = [1, 1]} : vector<8x384xf32> to vector<8x128xf32>
    %166 = vector.extract_strided_slice %154 {offsets = [0, 384], sizes = [8, 128], strides = [1, 1]} : vector<8x512xf32> to vector<8x128xf32>
    %167 = math.tanh %166 : vector<8x128xf32>
    %168 = arith.mulf %164, %142 : vector<8x128xf32>
    %169 = arith.mulf %163, %167 : vector<8x128xf32>
    %170 = arith.addf %168, %169 : vector<8x128xf32>
    %171 = math.tanh %170 : vector<8x128xf32>
    %172 = arith.mulf %165, %171 : vector<8x128xf32>
    %173 = arith.index_cast %c5_i32 : i32 to index
    %c0_54 = arith.constant 0 : index
    %c0_55 = arith.constant 0 : index
    %174 = vector.load %arg5[%173, %c0_54, %c0_55] : memref<8x8x128xf32, #tpu.memory_space<vmem>>, vector<1x8x128xf32>
    %175 = vector.shape_cast %174 : vector<1x8x128xf32> to vector<8x128xf32>
    %176 = vector.shape_cast %172 : vector<8x128xf32> to vector<1x8x128xf32>
    tpu.vector_store %arg5[%173, %c0_54, %c0_55], %176 {strides = array<i32>} : memref<8x8x128xf32, #tpu.memory_space<vmem>>, vector<1x8x128xf32>,
    %c6_i32 = arith.constant 6 : i32
    %177 = arith.index_cast %c6_i32 : i32 to index
    %c0_56 = arith.constant 0 : index
    %c0_57 = arith.constant 0 : index
    %178 = vector.load %arg2[%177, %c0_56, %c0_57] : memref<8x8x512xf32, #tpu.memory_space<vmem>>, vector<1x8x512xf32>
    %179 = vector.shape_cast %178 : vector<1x8x512xf32> to vector<8x512xf32>
    %180 = arith.addf %179, %6 : vector<8x512xf32>
    %cst_58 = arith.constant dense<0.000000e+00> : vector<8x512xf32>
    %181 = tpu.matmul %172, %3, %cst_58 {dimension_numbers = #tpu.dot_dimension_numbers<[1], [0], [0], [1], [0, 0, 1, 1], [], []>} : vector<8x128xf32>, vector<128x512xf32>, vector<8x512xf32> -> vector<8x512xf32>
    %182 = arith.addf %180, %181 : vector<8x512xf32>
    %183 = vector.extract_strided_slice %182 {offsets = [0, 0], sizes = [8, 384], strides = [1, 1]} : vector<8x512xf32> to vector<8x384xf32>
    %cst_59 = arith.constant 5.000000e-01 : f32
    %184 = vector.broadcast %cst_59 : f32 to vector<8x384xf32>
    %185 = arith.mulf %184, %183 : vector<8x384xf32>
    %186 = math.tanh %185 : vector<8x384xf32>
    %cst_60 = arith.constant 5.000000e-01 : f32
    %187 = vector.broadcast %cst_60 : f32 to vector<8x384xf32>
    %188 = arith.mulf %187, %186 : vector<8x384xf32>
    %cst_61 = arith.constant 5.000000e-01 : f32
    %189 = vector.broadcast %cst_61 : f32 to vector<8x384xf32>
    %190 = arith.addf %188, %189 : vector<8x384xf32>
    %191 = vector.extract_strided_slice %190 {offsets = [0, 0], sizes = [8, 128], strides = [1, 1]} : vector<8x384xf32> to vector<8x128xf32>
    %192 = vector.extract_strided_slice %190 {offsets = [0, 128], sizes = [8, 128], strides = [1, 1]} : vector<8x384xf32> to vector<8x128xf32>
    %193 = vector.extract_strided_slice %190 {offsets = [0, 256], sizes = [8, 128], strides = [1, 1]} : vector<8x384xf32> to vector<8x128xf32>
    %194 = vector.extract_strided_slice %182 {offsets = [0, 384], sizes = [8, 128], strides = [1, 1]} : vector<8x512xf32> to vector<8x128xf32>
    %195 = math.tanh %194 : vector<8x128xf32>
    %196 = arith.mulf %192, %170 : vector<8x128xf32>
    %197 = arith.mulf %191, %195 : vector<8x128xf32>
    %198 = arith.addf %196, %197 : vector<8x128xf32>
    %199 = math.tanh %198 : vector<8x128xf32>
    %200 = arith.mulf %193, %199 : vector<8x128xf32>
    %201 = arith.index_cast %c6_i32 : i32 to index
    %c0_62 = arith.constant 0 : index
    %c0_63 = arith.constant 0 : index
    %202 = vector.load %arg5[%201, %c0_62, %c0_63] : memref<8x8x128xf32, #tpu.memory_space<vmem>>, vector<1x8x128xf32>
    %203 = vector.shape_cast %202 : vector<1x8x128xf32> to vector<8x128xf32>
    %204 = vector.shape_cast %200 : vector<8x128xf32> to vector<1x8x128xf32>
    tpu.vector_store %arg5[%201, %c0_62, %c0_63], %204 {strides = array<i32>} : memref<8x8x128xf32, #tpu.memory_space<vmem>>, vector<1x8x128xf32>,
    %c7_i32 = arith.constant 7 : i32
    %205 = arith.index_cast %c7_i32 : i32 to index
    %c0_64 = arith.constant 0 : index
    %c0_65 = arith.constant 0 : index
    %206 = vector.load %arg2[%205, %c0_64, %c0_65] : memref<8x8x512xf32, #tpu.memory_space<vmem>>, vector<1x8x512xf32>
    %207 = vector.shape_cast %206 : vector<1x8x512xf32> to vector<8x512xf32>
    %208 = arith.addf %207, %6 : vector<8x512xf32>
    %cst_66 = arith.constant dense<0.000000e+00> : vector<8x512xf32>
    %209 = tpu.matmul %200, %3, %cst_66 {dimension_numbers = #tpu.dot_dimension_numbers<[1], [0], [0], [1], [0, 0, 1, 1], [], []>} : vector<8x128xf32>, vector<128x512xf32>, vector<8x512xf32> -> vector<8x512xf32>
    %210 = arith.addf %208, %209 : vector<8x512xf32>
    %211 = vector.extract_strided_slice %210 {offsets = [0, 0], sizes = [8, 384], strides = [1, 1]} : vector<8x512xf32> to vector<8x384xf32>
    %cst_67 = arith.constant 5.000000e-01 : f32
    %212 = vector.broadcast %cst_67 : f32 to vector<8x384xf32>
    %213 = arith.mulf %212, %211 : vector<8x384xf32>
    %214 = math.tanh %213 : vector<8x384xf32>
    %cst_68 = arith.constant 5.000000e-01 : f32
    %215 = vector.broadcast %cst_68 : f32 to vector<8x384xf32>
    %216 = arith.mulf %215, %214 : vector<8x384xf32>
    %cst_69 = arith.constant 5.000000e-01 : f32
    %217 = vector.broadcast %cst_69 : f32 to vector<8x384xf32>
    %218 = arith.addf %216, %217 : vector<8x384xf32>
    %219 = vector.extract_strided_slice %218 {offsets = [0, 0], sizes = [8, 128], strides = [1, 1]} : vector<8x384xf32> to vector<8x128xf32>
    %220 = vector.extract_strided_slice %218 {offsets = [0, 128], sizes = [8, 128], strides = [1, 1]} : vector<8x384xf32> to vector<8x128xf32>
    %221 = vector.extract_strided_slice %218 {offsets = [0, 256], sizes = [8, 128], strides = [1, 1]} : vector<8x384xf32> to vector<8x128xf32>
    %222 = vector.extract_strided_slice %210 {offsets = [0, 384], sizes = [8, 128], strides = [1, 1]} : vector<8x512xf32> to vector<8x128xf32>
    %223 = math.tanh %222 : vector<8x128xf32>
    %224 = arith.mulf %220, %198 : vector<8x128xf32>
    %225 = arith.mulf %219, %223 : vector<8x128xf32>
    %226 = arith.addf %224, %225 : vector<8x128xf32>
    %227 = math.tanh %226 : vector<8x128xf32>
    %228 = arith.mulf %221, %227 : vector<8x128xf32>
    %229 = arith.index_cast %c7_i32 : i32 to index
    %c0_70 = arith.constant 0 : index
    %c0_71 = arith.constant 0 : index
    %230 = vector.load %arg5[%229, %c0_70, %c0_71] : memref<8x8x128xf32, #tpu.memory_space<vmem>>, vector<1x8x128xf32>
    %231 = vector.shape_cast %230 : vector<1x8x128xf32> to vector<8x128xf32>
    %232 = vector.shape_cast %228 : vector<8x128xf32> to vector<1x8x128xf32>
    tpu.vector_store %arg5[%229, %c0_70, %c0_71], %232 {strides = array<i32>} : memref<8x8x128xf32, #tpu.memory_space<vmem>>, vector<1x8x128xf32>,
    %c8_i32 = arith.constant 8 : i32
    %c0_72 = arith.constant 0 : index
    %c0_73 = arith.constant 0 : index
    %233 = vector.load %arg6[%c0_72, %c0_73] : memref<8x128xf32, #tpu.memory_space<vmem>>, vector<8x128xf32>
    tpu.vector_store %arg6[%c0_72, %c0_73], %228 {strides = array<i32>} : memref<8x128xf32, #tpu.memory_space<vmem>>, vector<8x128xf32>,
    %c0_74 = arith.constant 0 : index
    %c0_75 = arith.constant 0 : index
    %234 = vector.load %arg7[%c0_74, %c0_75] : memref<8x128xf32, #tpu.memory_space<vmem>>, vector<8x128xf32>
    tpu.vector_store %arg7[%c0_74, %c0_75], %226 {strides = array<i32>} : memref<8x128xf32, #tpu.memory_space<vmem>>, vector<8x128xf32>,
    return
  }
  func.func @transform_0(%arg0: i32, %arg1: i32) -> (i32, i32, i32) {
    %c0_i32 = arith.constant 0 : i32
    %c0_i32_0 = arith.constant 0 : i32
    return %arg1, %arg0, %c0_i32 : i32, i32, i32
  }
  func.func @transform_1(%arg0: i32, %arg1: i32) -> (i32, i32) {
    %c0_i32 = arith.constant 0 : i32
    %c0_i32_0 = arith.constant 0 : i32
    %c0_i32_1 = arith.constant 0 : i32
    return %c0_i32, %c0_i32_0 : i32, i32
  }
  func.func @transform_2(%arg0: i32, %arg1: i32) -> (i32, i32) {
    %c0_i32 = arith.constant 0 : i32
    %c0_i32_0 = arith.constant 0 : i32
    %c0_i32_1 = arith.constant 0 : i32
    return %c0_i32, %c0_i32_0 : i32, i32
  }
  func.func @transform_3(%arg0: i32, %arg1: i32) -> (i32, i32, i32) {
    %c0_i32 = arith.constant 0 : i32
    %c0_i32_0 = arith.constant 0 : i32
    return %arg1, %arg0, %c0_i32 : i32, i32, i32
  }
  func.func @transform_4(%arg0: i32, %arg1: i32) -> (i32, i32) {
    %c0_i32 = arith.constant 0 : i32
    %c0_i32_0 = arith.constant 0 : i32
    return %arg0, %c0_i32 : i32, i32
  }
  func.func @transform_5(%arg0: i32, %arg1: i32) -> (i32, i32) {
    %c0_i32 = arith.constant 0 : i32
    %c0_i32_0 = arith.constant 0 : i32
    return %arg0, %c0_i32 : i32, i32
  }
}

module attributes {stable_mosaic.version = 11 : i64} {
  func.func @_lstm_recurrence_kernel(%arg0: i32, %arg1: i32, %arg2: memref<8x8x512xf32, #tpu.memory_space<vmem>>, %arg3: memref<128x512xf32, #tpu.memory_space<vmem>>, %arg4: memref<1x512xf32, #tpu.memory_space<vmem>>, %arg5: memref<8x8x128xf32, #tpu.memory_space<vmem>>, %arg6: memref<8x128xf32, #tpu.memory_space<vmem>>, %arg7: memref<8x128xf32, #tpu.memory_space<vmem>>) attributes {dimension_semantics = [#tpu.dimension_semantics<parallel>, #tpu.dimension_semantics<arbitrary>], iteration_bounds = array<i64: 1, 1>, scalar_prefetch = 0 : i64, scratch_operands = 0 : i64, tpu.core_type = #tpu.core_type<tc>, window_params = [{transform_indices = @transform_0, window_bounds = array<i64: 8, 8, 512>}, {pipeline_mode = #tpu.pipeline_mode<synchronous>, transform_indices = @transform_1, window_bounds = array<i64: 128, 512>}, {pipeline_mode = #tpu.pipeline_mode<synchronous>, transform_indices = @transform_2, window_bounds = array<i64: 1, 512>}, {transform_indices = @transform_3, window_bounds = array<i64: 8, 8, 128>}, {transform_indices = @transform_4, window_bounds = array<i64: 8, 128>}, {transform_indices = @transform_5, window_bounds = array<i64: 8, 128>}]} {
    %c0_i32 = arith.constant 0 : i32
    %0 = arith.cmpi eq, %arg1, %c0_i32 : i32
    %1 = arith.extui %0 : i1 to i32
    %c0_i32_0 = arith.constant 0 : i32
    %2 = arith.cmpi ne, %1, %c0_i32_0 : i32
    scf.if %2 {
      %cst_76 = arith.constant 0.000000e+00 : f32
      %235 = vector.broadcast %cst_76 : f32 to vector<8x128xf32>
      %c0_77 = arith.constant 0 : index
      %c0_78 = arith.constant 0 : index
      %236 = vector.load %arg6[%c0_77, %c0_78] : memref<8x128xf32, #tpu.memory_space<vmem>>, vector<8x128xf32>
      tpu.vector_store %arg6[%c0_77, %c0_78], %235 {strides = array<i32>} : memref<8x128xf32, #tpu.memory_space<vmem>>, vector<8x128xf32>,
      %cst_79 = arith.constant 0.000000e+00 : f32
      %237 = vector.broadcast %cst_79 : f32 to vector<8x128xf32>
      %c0_80 = arith.constant 0 : index
      %c0_81 = arith.constant 0 : index
      %238 = vector.load %arg7[%c0_80, %c0_81] : memref<8x128xf32, #tpu.memory_space<vmem>>, vector<8x128xf32>
      tpu.vector_store %arg7[%c0_80, %c0_81], %237 {strides = array<i32>} : memref<8x128xf32, #tpu.memory_space<vmem>>, vector<8x128xf32>,
    } else {
    }
    %c0 = arith.constant 0 : index
    %c0_1 = arith.constant 0 : index
    %3 = vector.load %arg3[%c0, %c0_1] : memref<128x512xf32, #tpu.memory_space<vmem>>, vector<128x512xf32>
    %c0_2 = arith.constant 0 : index
    %c0_3 = arith.constant 0 : index
    %4 = vector.load %arg4[%c0_2, %c0_3] : memref<1x512xf32, #tpu.memory_space<vmem>>, vector<1x512xf32>
    %5 = vector.shape_cast %4 : vector<1x512xf32> to vector<1x512xf32>
    %6 = vector.broadcast %5 : vector<1x512xf32> to vector<8x512xf32>
    %c0_4 = arith.constant 0 : index
    %c0_5 = arith.constant 0 : index
    %7 = vector.load %arg6[%c0_4, %c0_5] : memref<8x128xf32, #tpu.memory_space<vmem>>, vector<8x128xf32>
    %c0_6 = arith.constant 0 : index
    %c0_7 = arith.constant 0 : index
    %8 = vector.load %arg7[%c0_6, %c0_7] : memref<8x128xf32, #tpu.memory_space<vmem>>, vector<8x128xf32>
    %c0_i32_8 = arith.constant 0 : i32
    %9 = arith.index_cast %c0_i32_8 : i32 to index
    %c0_9 = arith.constant 0 : index
    %c0_10 = arith.constant 0 : index
    %10 = vector.load %arg2[%9, %c0_9, %c0_10] : memref<8x8x512xf32, #tpu.memory_space<vmem>>, vector<1x8x512xf32>
    %11 = vector.shape_cast %10 : vector<1x8x512xf32> to vector<8x512xf32>
    %12 = arith.addf %11, %6 : vector<8x512xf32>
    %cst = arith.constant dense<0.000000e+00> : vector<8x512xf32>
    %13 = tpu.matmul %7, %3, %cst {dimension_numbers = #tpu.dot_dimension_numbers<[1], [0], [0], [1], [0, 0, 1, 1], [], []>} : vector<8x128xf32>, vector<128x512xf32>, vector<8x512xf32> -> vector<8x512xf32>
    %14 = arith.addf %12, %13 : vector<8x512xf32>
    %15 = vector.extract_strided_slice %14 {offsets = [0, 0], sizes = [8, 384], strides = [1, 1]} : vector<8x512xf32> to vector<8x384xf32>
    %cst_11 = arith.constant 5.000000e-01 : f32
    %16 = vector.broadcast %cst_11 : f32 to vector<8x384xf32>
    %17 = arith.mulf %16, %15 : vector<8x384xf32>
    %18 = math.tanh %17 : vector<8x384xf32>
    %cst_12 = arith.constant 5.000000e-01 : f32
    %19 = vector.broadcast %cst_12 : f32 to vector<8x384xf32>
    %20 = arith.mulf %19, %18 : vector<8x384xf32>
    %cst_13 = arith.constant 5.000000e-01 : f32
    %21 = vector.broadcast %cst_13 : f32 to vector<8x384xf32>
    %22 = arith.addf %20, %21 : vector<8x384xf32>
    %23 = vector.extract_strided_slice %22 {offsets = [0, 0], sizes = [8, 128], strides = [1, 1]} : vector<8x384xf32> to vector<8x128xf32>
    %24 = vector.extract_strided_slice %22 {offsets = [0, 128], sizes = [8, 128], strides = [1, 1]} : vector<8x384xf32> to vector<8x128xf32>
    %25 = vector.extract_strided_slice %22 {offsets = [0, 256], sizes = [8, 128], strides = [1, 1]} : vector<8x384xf32> to vector<8x128xf32>
    %26 = vector.extract_strided_slice %14 {offsets = [0, 384], sizes = [8, 128], strides = [1, 1]} : vector<8x512xf32> to vector<8x128xf32>
    %27 = math.tanh %26 : vector<8x128xf32>
    %28 = arith.mulf %24, %8 : vector<8x128xf32>
    %29 = arith.mulf %23, %27 : vector<8x128xf32>
    %30 = arith.addf %28, %29 : vector<8x128xf32>
    %31 = math.tanh %30 : vector<8x128xf32>
    %32 = arith.mulf %25, %31 : vector<8x128xf32>
    %33 = arith.index_cast %c0_i32_8 : i32 to index
    %c0_14 = arith.constant 0 : index
    %c0_15 = arith.constant 0 : index
    %34 = vector.load %arg5[%33, %c0_14, %c0_15] : memref<8x8x128xf32, #tpu.memory_space<vmem>>, vector<1x8x128xf32>
    %35 = vector.shape_cast %34 : vector<1x8x128xf32> to vector<8x128xf32>
    %36 = vector.shape_cast %32 : vector<8x128xf32> to vector<1x8x128xf32>
    tpu.vector_store %arg5[%33, %c0_14, %c0_15], %36 {strides = array<i32>} : memref<8x8x128xf32, #tpu.memory_space<vmem>>, vector<1x8x128xf32>,
    %c1_i32 = arith.constant 1 : i32
    %37 = arith.index_cast %c1_i32 : i32 to index
    %c0_16 = arith.constant 0 : index
    %c0_17 = arith.constant 0 : index
    %38 = vector.load %arg2[%37, %c0_16, %c0_17] : memref<8x8x512xf32, #tpu.memory_space<vmem>>, vector<1x8x512xf32>
    %39 = vector.shape_cast %38 : vector<1x8x512xf32> to vector<8x512xf32>
    %40 = arith.addf %39, %6 : vector<8x512xf32>
    %cst_18 = arith.constant dense<0.000000e+00> : vector<8x512xf32>
    %41 = tpu.matmul %32, %3, %cst_18 {dimension_numbers = #tpu.dot_dimension_numbers<[1], [0], [0], [1], [0, 0, 1, 1], [], []>} : vector<8x128xf32>, vector<128x512xf32>, vector<8x512xf32> -> vector<8x512xf32>
    %42 = arith.addf %40, %41 : vector<8x512xf32>
    %43 = vector.extract_strided_slice %42 {offsets = [0, 0], sizes = [8, 384], strides = [1, 1]} : vector<8x512xf32> to vector<8x384xf32>
    %cst_19 = arith.constant 5.000000e-01 : f32
    %44 = vector.broadcast %cst_19 : f32 to vector<8x384xf32>
    %45 = arith.mulf %44, %43 : vector<8x384xf32>
    %46 = math.tanh %45 : vector<8x384xf32>
    %cst_20 = arith.constant 5.000000e-01 : f32
    %47 = vector.broadcast %cst_20 : f32 to vector<8x384xf32>
    %48 = arith.mulf %47, %46 : vector<8x384xf32>
    %cst_21 = arith.constant 5.000000e-01 : f32
    %49 = vector.broadcast %cst_21 : f32 to vector<8x384xf32>
    %50 = arith.addf %48, %49 : vector<8x384xf32>
    %51 = vector.extract_strided_slice %50 {offsets = [0, 0], sizes = [8, 128], strides = [1, 1]} : vector<8x384xf32> to vector<8x128xf32>
    %52 = vector.extract_strided_slice %50 {offsets = [0, 128], sizes = [8, 128], strides = [1, 1]} : vector<8x384xf32> to vector<8x128xf32>
    %53 = vector.extract_strided_slice %50 {offsets = [0, 256], sizes = [8, 128], strides = [1, 1]} : vector<8x384xf32> to vector<8x128xf32>
    %54 = vector.extract_strided_slice %42 {offsets = [0, 384], sizes = [8, 128], strides = [1, 1]} : vector<8x512xf32> to vector<8x128xf32>
    %55 = math.tanh %54 : vector<8x128xf32>
    %56 = arith.mulf %52, %30 : vector<8x128xf32>
    %57 = arith.mulf %51, %55 : vector<8x128xf32>
    %58 = arith.addf %56, %57 : vector<8x128xf32>
    %59 = math.tanh %58 : vector<8x128xf32>
    %60 = arith.mulf %53, %59 : vector<8x128xf32>
    %61 = arith.index_cast %c1_i32 : i32 to index
    %c0_22 = arith.constant 0 : index
    %c0_23 = arith.constant 0 : index
    %62 = vector.load %arg5[%61, %c0_22, %c0_23] : memref<8x8x128xf32, #tpu.memory_space<vmem>>, vector<1x8x128xf32>
    %63 = vector.shape_cast %62 : vector<1x8x128xf32> to vector<8x128xf32>
    %64 = vector.shape_cast %60 : vector<8x128xf32> to vector<1x8x128xf32>
    tpu.vector_store %arg5[%61, %c0_22, %c0_23], %64 {strides = array<i32>} : memref<8x8x128xf32, #tpu.memory_space<vmem>>, vector<1x8x128xf32>,
    %c2_i32 = arith.constant 2 : i32
    %65 = arith.index_cast %c2_i32 : i32 to index
    %c0_24 = arith.constant 0 : index
    %c0_25 = arith.constant 0 : index
    %66 = vector.load %arg2[%65, %c0_24, %c0_25] : memref<8x8x512xf32, #tpu.memory_space<vmem>>, vector<1x8x512xf32>
    %67 = vector.shape_cast %66 : vector<1x8x512xf32> to vector<8x512xf32>
    %68 = arith.addf %67, %6 : vector<8x512xf32>
    %cst_26 = arith.constant dense<0.000000e+00> : vector<8x512xf32>
    %69 = tpu.matmul %60, %3, %cst_26 {dimension_numbers = #tpu.dot_dimension_numbers<[1], [0], [0], [1], [0, 0, 1, 1], [], []>} : vector<8x128xf32>, vector<128x512xf32>, vector<8x512xf32> -> vector<8x512xf32>
    %70 = arith.addf %68, %69 : vector<8x512xf32>
    %71 = vector.extract_strided_slice %70 {offsets = [0, 0], sizes = [8, 384], strides = [1, 1]} : vector<8x512xf32> to vector<8x384xf32>
    %cst_27 = arith.constant 5.000000e-01 : f32
    %72 = vector.broadcast %cst_27 : f32 to vector<8x384xf32>
    %73 = arith.mulf %72, %71 : vector<8x384xf32>
    %74 = math.tanh %73 : vector<8x384xf32>
    %cst_28 = arith.constant 5.000000e-01 : f32
    %75 = vector.broadcast %cst_28 : f32 to vector<8x384xf32>
    %76 = arith.mulf %75, %74 : vector<8x384xf32>
    %cst_29 = arith.constant 5.000000e-01 : f32
    %77 = vector.broadcast %cst_29 : f32 to vector<8x384xf32>
    %78 = arith.addf %76, %77 : vector<8x384xf32>
    %79 = vector.extract_strided_slice %78 {offsets = [0, 0], sizes = [8, 128], strides = [1, 1]} : vector<8x384xf32> to vector<8x128xf32>
    %80 = vector.extract_strided_slice %78 {offsets = [0, 128], sizes = [8, 128], strides = [1, 1]} : vector<8x384xf32> to vector<8x128xf32>
    %81 = vector.extract_strided_slice %78 {offsets = [0, 256], sizes = [8, 128], strides = [1, 1]} : vector<8x384xf32> to vector<8x128xf32>
    %82 = vector.extract_strided_slice %70 {offsets = [0, 384], sizes = [8, 128], strides = [1, 1]} : vector<8x512xf32> to vector<8x128xf32>
    %83 = math.tanh %82 : vector<8x128xf32>
    %84 = arith.mulf %80, %58 : vector<8x128xf32>
    %85 = arith.mulf %79, %83 : vector<8x128xf32>
    %86 = arith.addf %84, %85 : vector<8x128xf32>
    %87 = math.tanh %86 : vector<8x128xf32>
    %88 = arith.mulf %81, %87 : vector<8x128xf32>
    %89 = arith.index_cast %c2_i32 : i32 to index
    %c0_30 = arith.constant 0 : index
    %c0_31 = arith.constant 0 : index
    %90 = vector.load %arg5[%89, %c0_30, %c0_31] : memref<8x8x128xf32, #tpu.memory_space<vmem>>, vector<1x8x128xf32>
    %91 = vector.shape_cast %90 : vector<1x8x128xf32> to vector<8x128xf32>
    %92 = vector.shape_cast %88 : vector<8x128xf32> to vector<1x8x128xf32>
    tpu.vector_store %arg5[%89, %c0_30, %c0_31], %92 {strides = array<i32>} : memref<8x8x128xf32, #tpu.memory_space<vmem>>, vector<1x8x128xf32>,
    %c3_i32 = arith.constant 3 : i32
    %93 = arith.index_cast %c3_i32 : i32 to index
    %c0_32 = arith.constant 0 : index
    %c0_33 = arith.constant 0 : index
    %94 = vector.load %arg2[%93, %c0_32, %c0_33] : memref<8x8x512xf32, #tpu.memory_space<vmem>>, vector<1x8x512xf32>
    %95 = vector.shape_cast %94 : vector<1x8x512xf32> to vector<8x512xf32>
    %96 = arith.addf %95, %6 : vector<8x512xf32>
    %cst_34 = arith.constant dense<0.000000e+00> : vector<8x512xf32>
    %97 = tpu.matmul %88, %3, %cst_34 {dimension_numbers = #tpu.dot_dimension_numbers<[1], [0], [0], [1], [0, 0, 1, 1], [], []>} : vector<8x128xf32>, vector<128x512xf32>, vector<8x512xf32> -> vector<8x512xf32>
    %98 = arith.addf %96, %97 : vector<8x512xf32>
    %99 = vector.extract_strided_slice %98 {offsets = [0, 0], sizes = [8, 384], strides = [1, 1]} : vector<8x512xf32> to vector<8x384xf32>
    %cst_35 = arith.constant 5.000000e-01 : f32
    %100 = vector.broadcast %cst_35 : f32 to vector<8x384xf32>
    %101 = arith.mulf %100, %99 : vector<8x384xf32>
    %102 = math.tanh %101 : vector<8x384xf32>
    %cst_36 = arith.constant 5.000000e-01 : f32
    %103 = vector.broadcast %cst_36 : f32 to vector<8x384xf32>
    %104 = arith.mulf %103, %102 : vector<8x384xf32>
    %cst_37 = arith.constant 5.000000e-01 : f32
    %105 = vector.broadcast %cst_37 : f32 to vector<8x384xf32>
    %106 = arith.addf %104, %105 : vector<8x384xf32>
    %107 = vector.extract_strided_slice %106 {offsets = [0, 0], sizes = [8, 128], strides = [1, 1]} : vector<8x384xf32> to vector<8x128xf32>
    %108 = vector.extract_strided_slice %106 {offsets = [0, 128], sizes = [8, 128], strides = [1, 1]} : vector<8x384xf32> to vector<8x128xf32>
    %109 = vector.extract_strided_slice %106 {offsets = [0, 256], sizes = [8, 128], strides = [1, 1]} : vector<8x384xf32> to vector<8x128xf32>
    %110 = vector.extract_strided_slice %98 {offsets = [0, 384], sizes = [8, 128], strides = [1, 1]} : vector<8x512xf32> to vector<8x128xf32>
    %111 = math.tanh %110 : vector<8x128xf32>
    %112 = arith.mulf %108, %86 : vector<8x128xf32>
    %113 = arith.mulf %107, %111 : vector<8x128xf32>
    %114 = arith.addf %112, %113 : vector<8x128xf32>
    %115 = math.tanh %114 : vector<8x128xf32>
    %116 = arith.mulf %109, %115 : vector<8x128xf32>
    %117 = arith.index_cast %c3_i32 : i32 to index
    %c0_38 = arith.constant 0 : index
    %c0_39 = arith.constant 0 : index
    %118 = vector.load %arg5[%117, %c0_38, %c0_39] : memref<8x8x128xf32, #tpu.memory_space<vmem>>, vector<1x8x128xf32>
    %119 = vector.shape_cast %118 : vector<1x8x128xf32> to vector<8x128xf32>
    %120 = vector.shape_cast %116 : vector<8x128xf32> to vector<1x8x128xf32>
    tpu.vector_store %arg5[%117, %c0_38, %c0_39], %120 {strides = array<i32>} : memref<8x8x128xf32, #tpu.memory_space<vmem>>, vector<1x8x128xf32>,
    %c4_i32 = arith.constant 4 : i32
    %121 = arith.index_cast %c4_i32 : i32 to index
    %c0_40 = arith.constant 0 : index
    %c0_41 = arith.constant 0 : index
    %122 = vector.load %arg2[%121, %c0_40, %c0_41] : memref<8x8x512xf32, #tpu.memory_space<vmem>>, vector<1x8x512xf32>
    %123 = vector.shape_cast %122 : vector<1x8x512xf32> to vector<8x512xf32>
    %124 = arith.addf %123, %6 : vector<8x512xf32>
    %cst_42 = arith.constant dense<0.000000e+00> : vector<8x512xf32>
    %125 = tpu.matmul %116, %3, %cst_42 {dimension_numbers = #tpu.dot_dimension_numbers<[1], [0], [0], [1], [0, 0, 1, 1], [], []>} : vector<8x128xf32>, vector<128x512xf32>, vector<8x512xf32> -> vector<8x512xf32>
    %126 = arith.addf %124, %125 : vector<8x512xf32>
    %127 = vector.extract_strided_slice %126 {offsets = [0, 0], sizes = [8, 384], strides = [1, 1]} : vector<8x512xf32> to vector<8x384xf32>
    %cst_43 = arith.constant 5.000000e-01 : f32
    %128 = vector.broadcast %cst_43 : f32 to vector<8x384xf32>
    %129 = arith.mulf %128, %127 : vector<8x384xf32>
    %130 = math.tanh %129 : vector<8x384xf32>
    %cst_44 = arith.constant 5.000000e-01 : f32
    %131 = vector.broadcast %cst_44 : f32 to vector<8x384xf32>
    %132 = arith.mulf %131, %130 : vector<8x384xf32>
    %cst_45 = arith.constant 5.000000e-01 : f32
    %133 = vector.broadcast %cst_45 : f32 to vector<8x384xf32>
    %134 = arith.addf %132, %133 : vector<8x384xf32>
    %135 = vector.extract_strided_slice %134 {offsets = [0, 0], sizes = [8, 128], strides = [1, 1]} : vector<8x384xf32> to vector<8x128xf32>
    %136 = vector.extract_strided_slice %134 {offsets = [0, 128], sizes = [8, 128], strides = [1, 1]} : vector<8x384xf32> to vector<8x128xf32>
    %137 = vector.extract_strided_slice %134 {offsets = [0, 256], sizes = [8, 128], strides = [1, 1]} : vector<8x384xf32> to vector<8x128xf32>
    %138 = vector.extract_strided_slice %126 {offsets = [0, 384], sizes = [8, 128], strides = [1, 1]} : vector<8x512xf32> to vector<8x128xf32>
    %139 = math.tanh %138 : vector<8x128xf32>
    %140 = arith.mulf %136, %114 : vector<8x128xf32>
    %141 = arith.mulf %135, %139 : vector<8x128xf32>
    %142 = arith.addf %140, %141 : vector<8x128xf32>
    %143 = math.tanh %142 : vector<8x128xf32>
    %144 = arith.mulf %137, %143 : vector<8x128xf32>
    %145 = arith.index_cast %c4_i32 : i32 to index
    %c0_46 = arith.constant 0 : index
    %c0_47 = arith.constant 0 : index
    %146 = vector.load %arg5[%145, %c0_46, %c0_47] : memref<8x8x128xf32, #tpu.memory_space<vmem>>, vector<1x8x128xf32>
    %147 = vector.shape_cast %146 : vector<1x8x128xf32> to vector<8x128xf32>
    %148 = vector.shape_cast %144 : vector<8x128xf32> to vector<1x8x128xf32>
    tpu.vector_store %arg5[%145, %c0_46, %c0_47], %148 {strides = array<i32>} : memref<8x8x128xf32, #tpu.memory_space<vmem>>, vector<1x8x128xf32>,
    %c5_i32 = arith.constant 5 : i32
    %149 = arith.index_cast %c5_i32 : i32 to index
    %c0_48 = arith.constant 0 : index
    %c0_49 = arith.constant 0 : index
    %150 = vector.load %arg2[%149, %c0_48, %c0_49] : memref<8x8x512xf32, #tpu.memory_space<vmem>>, vector<1x8x512xf32>
    %151 = vector.shape_cast %150 : vector<1x8x512xf32> to vector<8x512xf32>
    %152 = arith.addf %151, %6 : vector<8x512xf32>
    %cst_50 = arith.constant dense<0.000000e+00> : vector<8x512xf32>
    %153 = tpu.matmul %144, %3, %cst_50 {dimension_numbers = #tpu.dot_dimension_numbers<[1], [0], [0], [1], [0, 0, 1, 1], [], []>} : vector<8x128xf32>, vector<128x512xf32>, vector<8x512xf32> -> vector<8x512xf32>
    %154 = arith.addf %152, %153 : vector<8x512xf32>
    %155 = vector.extract_strided_slice %154 {offsets = [0, 0], sizes = [8, 384], strides = [1, 1]} : vector<8x512xf32> to vector<8x384xf32>
    %cst_51 = arith.constant 5.000000e-01 : f32
    %156 = vector.broadcast %cst_51 : f32 to vector<8x384xf32>
    %157 = arith.mulf %156, %155 : vector<8x384xf32>
    %158 = math.tanh %157 : vector<8x384xf32>
    %cst_52 = arith.constant 5.000000e-01 : f32
    %159 = vector.broadcast %cst_52 : f32 to vector<8x384xf32>
    %160 = arith.mulf %159, %158 : vector<8x384xf32>
    %cst_53 = arith.constant 5.000000e-01 : f32
    %161 = vector.broadcast %cst_53 : f32 to vector<8x384xf32>
    %162 = arith.addf %160, %161 : vector<8x384xf32>
    %163 = vector.extract_strided_slice %162 {offsets = [0, 0], sizes = [8, 128], strides = [1, 1]} : vector<8x384xf32> to vector<8x128xf32>
    %164 = vector.extract_strided_slice %162 {offsets = [0, 128], sizes = [8, 128], strides = [1, 1]} : vector<8x384xf32> to vector<8x128xf32>
    %165 = vector.extract_strided_slice %162 {offsets = [0, 256], sizes = [8, 128], strides = [1, 1]} : vector<8x384xf32> to vector<8x128xf32>
    %166 = vector.extract_strided_slice %154 {offsets = [0, 384], sizes = [8, 128], strides = [1, 1]} : vector<8x512xf32> to vector<8x128xf32>
    %167 = math.tanh %166 : vector<8x128xf32>
    %168 = arith.mulf %164, %142 : vector<8x128xf32>
    %169 = arith.mulf %163, %167 : vector<8x128xf32>
    %170 = arith.addf %168, %169 : vector<8x128xf32>
    %171 = math.tanh %170 : vector<8x128xf32>
    %172 = arith.mulf %165, %171 : vector<8x128xf32>
    %173 = arith.index_cast %c5_i32 : i32 to index
    %c0_54 = arith.constant 0 : index
    %c0_55 = arith.constant 0 : index
    %174 = vector.load %arg5[%173, %c0_54, %c0_55] : memref<8x8x128xf32, #tpu.memory_space<vmem>>, vector<1x8x128xf32>
    %175 = vector.shape_cast %174 : vector<1x8x128xf32> to vector<8x128xf32>
    %176 = vector.shape_cast %172 : vector<8x128xf32> to vector<1x8x128xf32>
    tpu.vector_store %arg5[%173, %c0_54, %c0_55], %176 {strides = array<i32>} : memref<8x8x128xf32, #tpu.memory_space<vmem>>, vector<1x8x128xf32>,
    %c6_i32 = arith.constant 6 : i32
    %177 = arith.index_cast %c6_i32 : i32 to index
    %c0_56 = arith.constant 0 : index
    %c0_57 = arith.constant 0 : index
    %178 = vector.load %arg2[%177, %c0_56, %c0_57] : memref<8x8x512xf32, #tpu.memory_space<vmem>>, vector<1x8x512xf32>
    %179 = vector.shape_cast %178 : vector<1x8x512xf32> to vector<8x512xf32>
    %180 = arith.addf %179, %6 : vector<8x512xf32>
    %cst_58 = arith.constant dense<0.000000e+00> : vector<8x512xf32>
    %181 = tpu.matmul %172, %3, %cst_58 {dimension_numbers = #tpu.dot_dimension_numbers<[1], [0], [0], [1], [0, 0, 1, 1], [], []>} : vector<8x128xf32>, vector<128x512xf32>, vector<8x512xf32> -> vector<8x512xf32>
    %182 = arith.addf %180, %181 : vector<8x512xf32>
    %183 = vector.extract_strided_slice %182 {offsets = [0, 0], sizes = [8, 384], strides = [1, 1]} : vector<8x512xf32> to vector<8x384xf32>
    %cst_59 = arith.constant 5.000000e-01 : f32
    %184 = vector.broadcast %cst_59 : f32 to vector<8x384xf32>
    %185 = arith.mulf %184, %183 : vector<8x384xf32>
    %186 = math.tanh %185 : vector<8x384xf32>
    %cst_60 = arith.constant 5.000000e-01 : f32
    %187 = vector.broadcast %cst_60 : f32 to vector<8x384xf32>
    %188 = arith.mulf %187, %186 : vector<8x384xf32>
    %cst_61 = arith.constant 5.000000e-01 : f32
    %189 = vector.broadcast %cst_61 : f32 to vector<8x384xf32>
    %190 = arith.addf %188, %189 : vector<8x384xf32>
    %191 = vector.extract_strided_slice %190 {offsets = [0, 0], sizes = [8, 128], strides = [1, 1]} : vector<8x384xf32> to vector<8x128xf32>
    %192 = vector.extract_strided_slice %190 {offsets = [0, 128], sizes = [8, 128], strides = [1, 1]} : vector<8x384xf32> to vector<8x128xf32>
    %193 = vector.extract_strided_slice %190 {offsets = [0, 256], sizes = [8, 128], strides = [1, 1]} : vector<8x384xf32> to vector<8x128xf32>
    %194 = vector.extract_strided_slice %182 {offsets = [0, 384], sizes = [8, 128], strides = [1, 1]} : vector<8x512xf32> to vector<8x128xf32>
    %195 = math.tanh %194 : vector<8x128xf32>
    %196 = arith.mulf %192, %170 : vector<8x128xf32>
    %197 = arith.mulf %191, %195 : vector<8x128xf32>
    %198 = arith.addf %196, %197 : vector<8x128xf32>
    %199 = math.tanh %198 : vector<8x128xf32>
    %200 = arith.mulf %193, %199 : vector<8x128xf32>
    %201 = arith.index_cast %c6_i32 : i32 to index
    %c0_62 = arith.constant 0 : index
    %c0_63 = arith.constant 0 : index
    %202 = vector.load %arg5[%201, %c0_62, %c0_63] : memref<8x8x128xf32, #tpu.memory_space<vmem>>, vector<1x8x128xf32>
    %203 = vector.shape_cast %202 : vector<1x8x128xf32> to vector<8x128xf32>
    %204 = vector.shape_cast %200 : vector<8x128xf32> to vector<1x8x128xf32>
    tpu.vector_store %arg5[%201, %c0_62, %c0_63], %204 {strides = array<i32>} : memref<8x8x128xf32, #tpu.memory_space<vmem>>, vector<1x8x128xf32>,
    %c7_i32 = arith.constant 7 : i32
    %205 = arith.index_cast %c7_i32 : i32 to index
    %c0_64 = arith.constant 0 : index
    %c0_65 = arith.constant 0 : index
    %206 = vector.load %arg2[%205, %c0_64, %c0_65] : memref<8x8x512xf32, #tpu.memory_space<vmem>>, vector<1x8x512xf32>
    %207 = vector.shape_cast %206 : vector<1x8x512xf32> to vector<8x512xf32>
    %208 = arith.addf %207, %6 : vector<8x512xf32>
    %cst_66 = arith.constant dense<0.000000e+00> : vector<8x512xf32>
    %209 = tpu.matmul %200, %3, %cst_66 {dimension_numbers = #tpu.dot_dimension_numbers<[1], [0], [0], [1], [0, 0, 1, 1], [], []>} : vector<8x128xf32>, vector<128x512xf32>, vector<8x512xf32> -> vector<8x512xf32>
    %210 = arith.addf %208, %209 : vector<8x512xf32>
    %211 = vector.extract_strided_slice %210 {offsets = [0, 0], sizes = [8, 384], strides = [1, 1]} : vector<8x512xf32> to vector<8x384xf32>
    %cst_67 = arith.constant 5.000000e-01 : f32
    %212 = vector.broadcast %cst_67 : f32 to vector<8x384xf32>
    %213 = arith.mulf %212, %211 : vector<8x384xf32>
    %214 = math.tanh %213 : vector<8x384xf32>
    %cst_68 = arith.constant 5.000000e-01 : f32
    %215 = vector.broadcast %cst_68 : f32 to vector<8x384xf32>
    %216 = arith.mulf %215, %214 : vector<8x384xf32>
    %cst_69 = arith.constant 5.000000e-01 : f32
    %217 = vector.broadcast %cst_69 : f32 to vector<8x384xf32>
    %218 = arith.addf %216, %217 : vector<8x384xf32>
    %219 = vector.extract_strided_slice %218 {offsets = [0, 0], sizes = [8, 128], strides = [1, 1]} : vector<8x384xf32> to vector<8x128xf32>
    %220 = vector.extract_strided_slice %218 {offsets = [0, 128], sizes = [8, 128], strides = [1, 1]} : vector<8x384xf32> to vector<8x128xf32>
    %221 = vector.extract_strided_slice %218 {offsets = [0, 256], sizes = [8, 128], strides = [1, 1]} : vector<8x384xf32> to vector<8x128xf32>
    %222 = vector.extract_strided_slice %210 {offsets = [0, 384], sizes = [8, 128], strides = [1, 1]} : vector<8x512xf32> to vector<8x128xf32>
    %223 = math.tanh %222 : vector<8x128xf32>
    %224 = arith.mulf %220, %198 : vector<8x128xf32>
    %225 = arith.mulf %219, %223 : vector<8x128xf32>
    %226 = arith.addf %224, %225 : vector<8x128xf32>
    %227 = math.tanh %226 : vector<8x128xf32>
    %228 = arith.mulf %221, %227 : vector<8x128xf32>
    %229 = arith.index_cast %c7_i32 : i32 to index
    %c0_70 = arith.constant 0 : index
    %c0_71 = arith.constant 0 : index
    %230 = vector.load %arg5[%229, %c0_70, %c0_71] : memref<8x8x128xf32, #tpu.memory_space<vmem>>, vector<1x8x128xf32>
    %231 = vector.shape_cast %230 : vector<1x8x128xf32> to vector<8x128xf32>
    %232 = vector.shape_cast %228 : vector<8x128xf32> to vector<1x8x128xf32>
    tpu.vector_store %arg5[%229, %c0_70, %c0_71], %232 {strides = array<i32>} : memref<8x8x128xf32, #tpu.memory_space<vmem>>, vector<1x8x128xf32>,
    %c8_i32 = arith.constant 8 : i32
    %c0_72 = arith.constant 0 : index
    %c0_73 = arith.constant 0 : index
    %233 = vector.load %arg6[%c0_72, %c0_73] : memref<8x128xf32, #tpu.memory_space<vmem>>, vector<8x128xf32>
    tpu.vector_store %arg6[%c0_72, %c0_73], %228 {strides = array<i32>} : memref<8x128xf32, #tpu.memory_space<vmem>>, vector<8x128xf32>,
    %c0_74 = arith.constant 0 : index
    %c0_75 = arith.constant 0 : index
    %234 = vector.load %arg7[%c0_74, %c0_75] : memref<8x128xf32, #tpu.memory_space<vmem>>, vector<8x128xf32>
    tpu.vector_store %arg7[%c0_74, %c0_75], %226 {strides = array<i32>} : memref<8x128xf32, #tpu.memory_space<vmem>>, vector<8x128xf32>,
    return
  }
  func.func @transform_0(%arg0: i32, %arg1: i32) -> (i32, i32, i32) {
    %c0_i32 = arith.constant 0 : i32
    %c0_i32_0 = arith.constant 0 : i32
    return %arg1, %arg0, %c0_i32 : i32, i32, i32
  }
  func.func @transform_1(%arg0: i32, %arg1: i32) -> (i32, i32) {
    %c0_i32 = arith.constant 0 : i32
    %c0_i32_0 = arith.constant 0 : i32
    %c0_i32_1 = arith.constant 0 : i32
    return %c0_i32, %c0_i32_0 : i32, i32
  }
  func.func @transform_2(%arg0: i32, %arg1: i32) -> (i32, i32) {
    %c0_i32 = arith.constant 0 : i32
    %c0_i32_0 = arith.constant 0 : i32
    %c0_i32_1 = arith.constant 0 : i32
    return %c0_i32, %c0_i32_0 : i32, i32
  }
  func.func @transform_3(%arg0: i32, %arg1: i32) -> (i32, i32, i32) {
    %c0_i32 = arith.constant 0 : i32
    %c0_i32_0 = arith.constant 0 : i32
    return %arg1, %arg0, %c0_i32 : i32, i32, i32
  }
  func.func @transform_4(%arg0: i32, %arg1: i32) -> (i32, i32) {
    %c0_i32 = arith.constant 0 : i32
    %c0_i32_0 = arith.constant 0 : i32
    return %arg0, %c0_i32 : i32, i32
  }
  func.func @transform_5(%arg0: i32, %arg1: i32) -> (i32, i32) {
    %c0_i32 = arith.constant 0 : i32
    %c0_i32_0 = arith.constant 0 : i32
    return %arg0, %c0_i32 : i32, i32
  }
}

</mosaic_0001>

<bundles_post_ra>
// kernel: tpu_custom_call.1
= control target key start
LH: loop header
LB: loop body
LE: loop exit
PB: predicated region body
PF: predicated region fallthrough
CT: control target
= control target key end

     0   :  { %11 = vsyncpa [#allocation3], 0  ;;  %s2789_s0 = inlined_call_operand.hbm [shape: f32[8,8,512], index: 0, kind: input, shape index: {}]   ;;  %s2790_s1 = inlined_call_operand.hbm [shape: f32[128,512], index: 1, kind: input, shape index: {}]   ;;  %s2791_s2 = inlined_call_operand.hbm [shape: f32[1,512], index: 2, kind: input, shape index: {}]   ;;  %s2792_s3 = inlined_call_operand.hbm [shape: f32[8,8,128], index: 3, kind: output, shape index: {0}]   ;;  %s2793_s4 = inlined_call_operand.hbm [shape: f32[8,128], index: 4, kind: output, shape index: {1}]   ;;  %s2794_s5 = inlined_call_operand.hbm [shape: f32[8,128], index: 5, kind: output, shape index: {2}]  }
   0x1   :  { %12 = vsyncpa [#allocation6], 0 }
   0x2   :  { %13 = vsyncpa [#allocation4], 0 }
   0x3   :  { %14 = vsyncpa [#allocation10], 0  ;;  %s1880_s18 = smov [#allocation5]   ;;  %s1881_s20 = smov [#allocation2]  }
   0x4   :  { %s32_s19 = sshll.u32 %s1880_s18, 4  ;;  %s20_s21 = sshll.u32 %s1881_s20, 4  ;;  %s33_s19 = int_to_ptr.vmem [resolvable:$true] %s32_s19  ;;  %s21_s21 = int_to_ptr.vmem [resolvable:$true] %s20_s21 }
   0x5   :  { %s1760_s22 = scalar_lea.vmem %s33_s19, 8192  ;;  %p1765_p1 = scmp.lt.s32.totalorder %s33_s19, %s33_s19 }
   0x6   :  { %p1761_p0 = scmp.ne.s32.totalorder %s33_s19, %s1760_s22  ;;  %p1766_p2 = scmp.lt.s32.totalorder %s1760_s22, %s1760_s22 }
   0x8   :  { %p1767_p3 = por %p1766_p2, %p1765_p1 }
   0xa   :  { %p1768_p4 = pnand %p1767_p3, %p1761_p0 }
   0xc   :  { %1771 = shalt.err (!%p1768_p4)
}
   0xd   :  { %s1882_s23 = smov 512   ;;  %s1883_s24 = smov 32  }
   0xe   :  { %38 = dma.hbm_to_vmem [thread:$0]  %s2790_s1, 8192, %s33_s19, [#allocation6], %s1882_s23, %s1882_s23, %s1883_s24  }
   0xf   :  { %s1780_s27 = scalar_lea.vmem %s21_s21, 4096  ;;  %p1785_p6 = scmp.lt.s32.totalorder %s21_s21, %s21_s21 }
  0x10   :  { %p1781_p5 = scmp.ne.s32.totalorder %s21_s21, %s1780_s27  ;;  %p1786_p7 = scmp.lt.s32.totalorder %s1780_s27, %s1780_s27 }
  0x12   :  { %p1787_p8 = por %p1786_p7, %p1785_p6 }
  0x14   :  { %p1788_p9 = pnand %p1787_p8, %p1781_p5 }
  0x16   :  { %1791 = shalt.err (!%p1788_p9)
}
  0x17   :  { %26 = dma.hbm_to_vmem [thread:$0]  %s2789_s0, 4096, %s21_s21, [#allocation3], %s1882_s23, %s1882_s23, %s1883_s24  }
  0x18   :  { %s1884_s30 = smov [#allocation7]  }
  0x19   :  { %s45_s6 = sshll.u32 %s1884_s30, 4  ;;  %s46_s6 = int_to_ptr.vmem [resolvable:$true] %s45_s6 }
  0x1a   :  { %s1800_s7 = scalar_lea.vmem %s46_s6, 64  ;;  %p1805_p11 = scmp.lt.s32.totalorder %s46_s6, %s46_s6 }
  0x1b   :  { %p1801_p10 = scmp.ne.s32.totalorder %s46_s6, %s1800_s7  ;;  %p1806_p12 = scmp.lt.s32.totalorder %s1800_s7, %s1800_s7 }
  0x1d   :  { %p1807_p13 = por %p1806_p12, %p1805_p11 }
  0x1f   :  { %p1808_p0 = pnand %p1807_p13, %p1801_p10 }
  0x21   :  { %1811 = shalt.err (!%p1808_p0)
}
  0x22   :  { %48 = dma.hbm_to_vmem [thread:$0]  %s2791_s2, 64, %s46_s6, [#allocation6]  }
  0x23   :  { %1872 = dma.done.wait [#allocation3], 4096  }
  0x24   :  { %1873 = vsyncadd [#allocation3], 4294963200 }
  0x25   :  { %1874 = dma.done.wait [#allocation6], 8256  }
  0x26   :  { %1875 = vsyncadd [#allocation6], 4294959040  ;;  %v2795_v0 = vmov 0.0   ;;  %v1932_v1 = vld [vmem:[#allocation5 + $0x1e8] sm:$0xff]  ;;  %v1934_v2 = vld [vmem:[#allocation5 + $0x1e0] sm:$0xff]  ;;  %s1886_s0 = smov [#allocation9]  }
  0x27   :  { %224 = vmatprep.mubr.f32.mxu0 %v2795_v0  ;;  %295 = vmatprep.mubr.f32.mxu1 %v2795_v0  ;;  %2900 = vst [vmem:[#allocation16_spill] sm:$0xff] %v1932_v1  ;;  %v1936_v3 = vld [vmem:[#allocation5 + $0x1c8] sm:$0xff]  ;;  %v1939_v4 = vld [vmem:[#allocation5 + $0x1c0] sm:$0xff]  ;;  %v1941_v5 = vld [vmem:[#allocation5 + $0x1f8] sm:$0xff]  ;;  %s1570_s2 = sshll.u32 %s1886_s0, 4  ;;  %s1887_s9 = smov [#allocation8]   ;;  %s1571_s2 = int_to_ptr.vmem [resolvable:$true] %s1570_s2 }
  0x28   :  { %160 = vmatprep.subr.mxu0 %v1932_v1  ;;  %2901 = vst [vmem:[#allocation17_spill] sm:$0xff] %v1941_v5  ;;  %v1944_v6 = vld [vmem:[#allocation5 + $0x1a8] sm:$0xff]  ;;  %231 = vmatprep.subr.mxu1 %v1941_v5  ;;  %v1947_v7 = vld [vmem:[#allocation5 + $0x1f0] sm:$0xff]  ;;  %v1950_v8 = vld [vmem:[#allocation5 + $0x1a0] sm:$0xff]  ;;  %s1557_s10 = sshll.u32 %s1887_s9, 4  ;;  %s1888_s11 = smov [#allocation11]   ;;  %s1558_s10 = int_to_ptr.vmem [resolvable:$true] %s1557_s10 }
  0x29   :  { %161 = vmatpush1.msra.mxu0 %v1934_v2  ;;  %232 = vmatpush1.msra.mxu1 %v1947_v7  ;;  %v1953_v9 = vld [vmem:[#allocation5 + $0x1d8] sm:$0xff]  ;;  %v1955_v10 = vld [vmem:[#allocation5 + $0x1d0] sm:$0xff]  ;;  %v1958_v11 = vld [vmem:[#allocation5 + $0x188] sm:$0xff]  ;;  %s1580_s12 = sshll.u32 %s1888_s11, 4  ;;  %s1812_s13 = scalar_lea.vmem %s1571_s2, 128  ;;  %s1581_s12 = int_to_ptr.vmem [resolvable:$true] %s1580_s12 }
  0x2a   :  { %162 = vmatprep.subr.mxu0 %v1936_v3  ;;  %233 = vmatprep.subr.mxu1 %v1953_v9  ;;  %v1961_v12 = vld [vmem:[#allocation5 + $0x1b8] sm:$0xff]  ;;  %v1964_v13 = vld [vmem:[#allocation5 + $0x180] sm:$0xff]  ;;  %v1967_v14 = vld [vmem:[#allocation5 + $0x1b0] sm:$0xff]  ;;  %p1813_p1 = scmp.ne.s32.totalorder %s1571_s2, %s1812_s13  ;;  %p1817_p2 = scmp.lt.s32.totalorder %s1571_s2, %s1571_s2 }
  0x2b   :  { %163 = vmatpush1.msra.mxu0 %v1939_v4  ;;  %234 = vmatpush1.msra.mxu1 %v1955_v10  ;;  %v1969_v15 = vld [vmem:[#allocation5 + $0x198] sm:$0xff]  ;;  %v1972_v16 = vld [vmem:[#allocation5 + $0x168] sm:$0xff]  ;;  %v1975_v17 = vld [vmem:[#allocation5 + $0x190] sm:$0xff]  ;;  %p1818_p3 = scmp.lt.s32.totalorder %s1812_s13, %s1812_s13 }
  0x2c   :  { %164 = vmatprep.subr.mxu0 %v1944_v6  ;;  %235 = vmatprep.subr.mxu1 %v1961_v12  ;;  %v1978_v18 = vld [vmem:[#allocation5 + $0x160] sm:$0xff]  ;;  %v1981_v19 = vld [vmem:[#allocation5 + $0x178] sm:$0xff]  ;;  %v1984_v20 = vld [vmem:[#allocation5 + $0x148] sm:$0xff] }
  0x2d   :  { %165 = vmatpush1.msra.mxu0 %v1950_v8  ;;  %236 = vmatpush1.msra.mxu1 %v1967_v14  ;;  %v1987_v21 = vld [vmem:[#allocation5 + $0x170] sm:$0xff]  ;;  %v1990_v22 = vld [vmem:[#allocation5 + $0x140] sm:$0xff]  ;;  %v1993_v23 = vld [vmem:[#allocation5 + $0x158] sm:$0xff]  ;;  %p1819_p4 = por %p1818_p3, %p1817_p2 }
  0x2e   :  { %166 = vmatprep.subr.mxu0 %v1958_v11  ;;  %237 = vmatprep.subr.mxu1 %v1969_v15  ;;  %v1996_v24 = vld [vmem:[#allocation5 + $0x128] sm:$0xff]  ;;  %v1999_v25 = vld [vmem:[#allocation5 + $0x150] sm:$0xff]  ;;  %v2002_v26 = vld [vmem:[#allocation5 + $0x120] sm:$0xff] }
  0x2f   :  { %167 = vmatpush1.msra.mxu0 %v1964_v13  ;;  %238 = vmatpush1.msra.mxu1 %v1975_v17  ;;  %v2005_v27 = vld [vmem:[#allocation5 + $0x138] sm:$0xff]  ;;  %v2008_v28 = vld [vmem:[#allocation5 + $0x108] sm:$0xff]  ;;  %v2011_v29 = vld [vmem:[#allocation5 + $0x130] sm:$0xff]  ;;  %p1820_p5 = pnand %p1819_p4, %p1813_p1 }
  0x30   :  { %168 = vmatprep.subr.mxu0 %v1972_v16  ;;  %239 = vmatprep.subr.mxu1 %v1981_v19  ;;  %v2014_v30 = vld [vmem:[#allocation5 + $0x100] sm:$0xff]  ;;  %v2017_v31 = vld [vmem:[#allocation5 + $0x118] sm:$0xff]  ;;  %v2020_v32 = vld [vmem:[#allocation5 + $0xe8] sm:$0xff] }
  0x31   :  { %169 = vmatpush1.msra.mxu0 %v1978_v18  ;;  %240 = vmatpush1.msra.mxu1 %v1987_v21  ;;  %v2023_v33 = vld [vmem:[#allocation5 + $0x110] sm:$0xff]  ;;  %v2026_v34 = vld [vmem:[#allocation5 + $0xe0] sm:$0xff]  ;;  %v2029_v35 = vld [vmem:[#allocation5 + $0xf8] sm:$0xff] }
  0x32   :  { %170 = vmatprep.subr.mxu0 %v1984_v20  ;;  %241 = vmatprep.subr.mxu1 %v1993_v23  ;;  %v2032_v36 = vld [vmem:[#allocation5 + $0xc8] sm:$0xff]  ;;  %v2035_v37 = vld [vmem:[#allocation5 + $0xf0] sm:$0xff]  ;;  %v2038_v38 = vld [vmem:[#allocation5 + $0xc0] sm:$0xff] }
  0x33   :  { %171 = vmatpush1.msra.mxu0 %v1990_v22  ;;  %242 = vmatpush1.msra.mxu1 %v1999_v25  ;;  %v2041_v39 = vld [vmem:[#allocation5 + $0xd8] sm:$0xff]  ;;  %v2044_v40 = vld [vmem:[#allocation5 + $0xa8] sm:$0xff]  ;;  %v2047_v41 = vld [vmem:[#allocation5 + $0xd0] sm:$0xff] }
  0x34   :  { %172 = vmatprep.subr.mxu0 %v1996_v24  ;;  %243 = vmatprep.subr.mxu1 %v2005_v27  ;;  %v2050_v42 = vld [vmem:[#allocation5 + $0xa0] sm:$0xff]  ;;  %v2053_v43 = vld [vmem:[#allocation5 + $0xb8] sm:$0xff]  ;;  %v2056_v44 = vld [vmem:[#allocation5 + $0x88] sm:$0xff] }
  0x35   :  { %173 = vmatpush1.msra.mxu0 %v2002_v26  ;;  %244 = vmatpush1.msra.mxu1 %v2011_v29  ;;  %2902 = vst [vmem:[#allocation18_spill] sm:$0xff] %v2056_v44  ;;  %v2059_v45 = vld [vmem:[#allocation5 + $0xb0] sm:$0xff]  ;;  %v2062_v46 = vld [vmem:[#allocation5 + $0x80] sm:$0xff]  ;;  %v2065_v47 = vld [vmem:[#allocation5 + $0x98] sm:$0xff] }
  0x36   :  { %174 = vmatprep.subr.mxu0 %v2008_v28  ;;  %245 = vmatprep.subr.mxu1 %v2017_v31  ;;  %2903 = vst [vmem:[#allocation19_spill] sm:$0xff] %v2059_v45  ;;  %2904 = vst [vmem:[#allocation20_spill] sm:$0xff] %v2062_v46  ;;  %v2068_v48 = vld [vmem:[#allocation5 + $0x68] sm:$0xff]  ;;  %v2071_v49 = vld [vmem:[#allocation5 + $0x90] sm:$0xff] }
  0x37   :  { %175 = vmatpush1.msra.mxu0 %v2014_v30  ;;  %246 = vmatpush1.msra.mxu1 %v2023_v33  ;;  %2905 = vst [vmem:[#allocation21_spill] sm:$0xff] %v2065_v47  ;;  %2906 = vst [vmem:[#allocation22_spill] sm:$0xff] %v2068_v48  ;;  %v2074_v50 = vld [vmem:[#allocation5 + $0x60] sm:$0xff]  ;;  %v2077_v51 = vld [vmem:[#allocation5 + $0x78] sm:$0xff] }
  0x38   :  { %176 = vmatprep.subr.mxu0 %v2020_v32  ;;  %247 = vmatprep.subr.mxu1 %v2029_v35  ;;  %2907 = vst [vmem:[#allocation23_spill] sm:$0xff] %v2071_v49  ;;  %2908 = vst [vmem:[#allocation24_spill] sm:$0xff] %v2074_v50  ;;  %v2080_v52 = vld [vmem:[#allocation5 + $0x48] sm:$0xff]  ;;  %v2083_v53 = vld [vmem:[#allocation5 + $0x70] sm:$0xff] }
  0x39   :  { %177 = vmatpush1.msra.mxu0 %v2026_v34  ;;  %248 = vmatpush1.msra.mxu1 %v2035_v37  ;;  %2909 = vst [vmem:[#allocation25_spill] sm:$0xff] %v2077_v51  ;;  %2910 = vst [vmem:[#allocation26_spill] sm:$0xff] %v2080_v52  ;;  %v2086_v54 = vld [vmem:[#allocation5 + $0x40] sm:$0xff]  ;;  %v2089_v55 = vld [vmem:[#allocation5 + $0x58] sm:$0xff] }
  0x3a   :  { %178 = vmatprep.subr.mxu0 %v2032_v36  ;;  %249 = vmatprep.subr.mxu1 %v2041_v39  ;;  %2911 = vst [vmem:[#allocation27_spill] sm:$0xff] %v2083_v53  ;;  %2912 = vst [vmem:[#allocation28_spill] sm:$0xff] %v2086_v54  ;;  %v2092_v56 = vld [vmem:[#allocation5 + $0x28] sm:$0xff]  ;;  %v2095_v57 = vld [vmem:[#allocation5 + $0x50] sm:$0xff] }
  0x3b   :  { %179 = vmatpush1.msra.mxu0 %v2038_v38  ;;  %250 = vmatpush1.msra.mxu1 %v2047_v41  ;;  %2913 = vst [vmem:[#allocation29_spill] sm:$0xff] %v2089_v55  ;;  %2914 = vst [vmem:[#allocation30_spill] sm:$0xff] %v2092_v56  ;;  %v2098_v58 = vld [vmem:[#allocation5 + $0x20] sm:$0xff]  ;;  %v2101_v59 = vld [vmem:[#allocation5 + $0x38] sm:$0xff] }
  0x3c   :  { %180 = vmatprep.subr.mxu0 %v2044_v40  ;;  %251 = vmatprep.subr.mxu1 %v2053_v43  ;;  %2915 = vst [vmem:[#allocation31_spill] sm:$0xff] %v2095_v57  ;;  %2916 = vst [vmem:[#allocation32_spill] sm:$0xff] %v2098_v58  ;;  %v2104_v60 = vld [vmem:[#allocation5 + $0x8] sm:$0xff]  ;;  %v2107_v61 = vld [vmem:[#allocation5 + $0x30] sm:$0xff] }
  0x3d   :  { %181 = vmatpush1.msra.mxu0 %v2050_v42  ;;  %252 = vmatpush1.msra.mxu1 %v2059_v45  ;;  %2917 = vst [vmem:[#allocation33_spill] sm:$0xff] %v2101_v59  ;;  %2918 = vst [vmem:[#allocation34_spill] sm:$0xff] %v2104_v60  ;;  %v2110_v62 = vld [vmem:[#allocation5] sm:$0xff]  ;;  %v2113_v63 = vld [vmem:[#allocation5 + $0x18] sm:$0xff] }
  0x3e   :  { %182 = vmatprep.subr.mxu0 %v2056_v44  ;;  %253 = vmatprep.subr.mxu1 %v2065_v47  ;;  %2919 = vst [vmem:[#allocation35_spill] sm:$0xff] %v2107_v61  ;;  %2920 = vst [vmem:[#allocation36_spill] sm:$0xff] %v2110_v62  ;;  %v2117_v0 = vld [vmem:[#allocation5 + $0x10] sm:$0xff] }
  0x3f   :  { %183 = vmatpush1.msra.mxu0 %v2062_v46  ;;  %254 = vmatpush1.msra.mxu1 %v2071_v49  ;;  %2921 = vst [vmem:[#allocation37_spill] sm:$0xff] %v2113_v63  ;;  %2922 = vst [vmem:[#allocation38_spill] sm:$0xff] %v2117_v0 }
  0x40   :  { %184 = vmatprep.subr.mxu0 %v2068_v48  ;;  %255 = vmatprep.subr.mxu1 %v2077_v51 }
  0x41   :  { %185 = vmatpush1.msra.mxu0 %v2074_v50  ;;  %256 = vmatpush1.msra.mxu1 %v2083_v53 }
  0x42   :  { %186 = vmatprep.subr.mxu0 %v2080_v52  ;;  %257 = vmatprep.subr.mxu1 %v2089_v55 }
  0x43   :  { %187 = vmatpush1.msra.mxu0 %v2086_v54  ;;  %258 = vmatpush1.msra.mxu1 %v2095_v57 }
  0x44   :  { %188 = vmatprep.subr.mxu0 %v2092_v56  ;;  %259 = vmatprep.subr.mxu1 %v2101_v59  ;;  %v2923_v56 = vmov 0.0  }
  0x45   :  { %189 = vmatpush1.msra.mxu0 %v2098_v58  ;;  %260 = vmatpush1.msra.mxu1 %v2107_v61 }
  0x46   :  { %190 = vmatprep.subr.mxu0 %v2104_v60  ;;  %261 = vmatprep.subr.mxu1 %v2113_v63 }
  0x47   :  { %191 = vmatpush1.msra.mxu0 %v2110_v62  ;;  %262 = vmatpush1.msra.mxu1 %v2117_v0 }
  0x48   :  { %225 = vmatmul.mubr.f32.vlgmr.msra.gmra.mxu0 %v2923_v56  ;;  %296 = vmatmul.mubr.f32.vlgmr.msra.gmra.mxu1 %v2923_v56 }
  0x49   :  { %334 = vmatprep.subr.mxu0 %v1932_v1  ;;  %405 = vmatprep.subr.mxu1 %v1941_v5 }
  0x4a   :  { %335 = vmatpush1.msra.mxu0 %v1934_v2  ;;  %406 = vmatpush1.msra.mxu1 %v1947_v7 }
  0x4b   :  { %336 = vmatprep.subr.mxu0 %v1936_v3  ;;  %407 = vmatprep.subr.mxu1 %v1953_v9 }
  0x4c   :  { %337 = vmatpush1.msra.mxu0 %v1939_v4  ;;  %408 = vmatpush1.msra.mxu1 %v1955_v10 }
  0x4d   :  { %338 = vmatprep.subr.mxu0 %v1944_v6  ;;  %409 = vmatprep.subr.mxu1 %v1961_v12 }
  0x4e   :  { %339 = vmatpush1.msra.mxu0 %v1950_v8  ;;  %410 = vmatpush1.msra.mxu1 %v1967_v14 }
  0x4f   :  { %340 = vmatprep.subr.mxu0 %v1958_v11  ;;  %411 = vmatprep.subr.mxu1 %v1969_v15 }
  0x50   :  { %341 = vmatpush1.msra.mxu0 %v1964_v13  ;;  %412 = vmatpush1.msra.mxu1 %v1975_v17 }
  0x51   :  { %342 = vmatprep.subr.mxu0 %v1972_v16  ;;  %413 = vmatprep.subr.mxu1 %v1981_v19 }
  0x52   :  { %343 = vmatpush1.msra.mxu0 %v1978_v18  ;;  %414 = vmatpush1.msra.mxu1 %v1987_v21 }
  0x53   :  { %344 = vmatprep.subr.mxu0 %v1984_v20  ;;  %415 = vmatprep.subr.mxu1 %v1993_v23 }
  0x54   :  { %345 = vmatpush1.msra.mxu0 %v1990_v22  ;;  %416 = vmatpush1.msra.mxu1 %v1999_v25 }
  0x55   :  { %346 = vmatprep.subr.mxu0 %v1996_v24  ;;  %417 = vmatprep.subr.mxu1 %v2005_v27 }
  0x56   :  { %347 = vmatpush1.msra.mxu0 %v2002_v26  ;;  %418 = vmatpush1.msra.mxu1 %v2011_v29 }
  0x57   :  { %348 = vmatprep.subr.mxu0 %v2008_v28  ;;  %419 = vmatprep.subr.mxu1 %v2017_v31 }
  0x58   :  { %349 = vmatpush1.msra.mxu0 %v2014_v30  ;;  %420 = vmatpush1.msra.mxu1 %v2023_v33 }
  0x59   :  { %350 = vmatprep.subr.mxu0 %v2020_v32  ;;  %421 = vmatprep.subr.mxu1 %v2029_v35 }
  0x5a   :  { %351 = vmatpush1.msra.mxu0 %v2026_v34  ;;  %422 = vmatpush1.msra.mxu1 %v2035_v37 }
  0x5b   :  { %352 = vmatprep.subr.mxu0 %v2032_v36  ;;  %423 = vmatprep.subr.mxu1 %v2041_v39 }
  0x5c   :  { %353 = vmatpush1.msra.mxu0 %v2038_v38  ;;  %424 = vmatpush1.msra.mxu1 %v2047_v41 }
  0x5d   :  { %354 = vmatprep.subr.mxu0 %v2044_v40  ;;  %425 = vmatprep.subr.mxu1 %v2053_v43 }
  0x5e   :  { %355 = vmatpush1.msra.mxu0 %v2050_v42  ;;  %426 = vmatpush1.msra.mxu1 %v2059_v45 }
  0x5f   :  { %356 = vmatprep.subr.mxu0 %v2056_v44  ;;  %427 = vmatprep.subr.mxu1 %v2065_v47  ;;  %v2924_v47 = vld [vmem:[#allocation30_spill] sm:$0xff] }
  0x60   :  { %357 = vmatpush1.msra.mxu0 %v2062_v46  ;;  %428 = vmatpush1.msra.mxu1 %v2071_v49 }
  0x61   :  { %358 = vmatprep.subr.mxu0 %v2068_v48  ;;  %429 = vmatprep.subr.mxu1 %v2077_v51 }
  0x62   :  { %359 = vmatpush1.msra.mxu0 %v2074_v50  ;;  %430 = vmatpush1.msra.mxu1 %v2083_v53 }
  0x63   :  { %360 = vmatprep.subr.mxu0 %v2080_v52  ;;  %431 = vmatprep.subr.mxu1 %v2089_v55  ;;  %v153_v55 = vld [vmem:[#allocation2 + $0x8] sm:$0xff] }
  0x64   :  { %361 = vmatpush1.msra.mxu0 %v2086_v54  ;;  %432 = vmatpush1.msra.mxu1 %v2095_v57  ;;  %v152_v54 = vld [vmem:[#allocation2] sm:$0xff] }
  0x65   :  { %362 = vmatprep.subr.mxu0 %v2924_v47  ;;  %433 = vmatprep.subr.mxu1 %v2101_v59  ;;  %v130_v59 = vlaneseq }
  0x66   :  { %363 = vmatpush1.msra.mxu0 %v2098_v58  ;;  %434 = vmatpush1.msra.mxu1 %v2107_v61  ;;  %v128_v61 = vld [vmem:[#allocation7] sm:$0xf] }
  0x67   :  { %364 = vmatprep.subr.mxu0 %v2104_v60  ;;  %435 = vmatprep.subr.mxu1 %v2113_v63  ;;  %v131_v58 = vshrl.u32 %v130_v59, 7 }
  0x68   :  { %365 = vmatpush1.msra.mxu0 %v2110_v62  ;;  %398 = vmatprep.mubr.f32.mxu0 %v2923_v56 }
  0x69   :  { %436 = vmatpush1.msra.mxu1 %v2117_v0  ;;  %469 = vmatprep.mubr.f32.mxu1 %v2923_v56  ;;  %v132_v47 = vsub.s32 0, %v131_v58  ;;  %v136_v57 = vsub.s32 1, %v131_v58  ;;  %v144_v63 = vsub.s32 3, %v131_v58  ;;  %v155_v56 = vld [vmem:[#allocation2 + $0x18] sm:$0xff]  ;;  %v140_v59 = vsub.s32 2, %v131_v58 }
  0x6a   :  { %509 = vmatprep.subr.mxu0 %v1932_v1  ;;  %580 = vmatprep.subr.mxu1 %v1941_v5 }
  0x6b   :  { %v2194_v60 = vrot.slane %v128_v61, %v132_v47  ;;  %v2196_v62 = vrot.slane %v128_v61, %v136_v57  ;;  %v2199_v52 = vrot.slane %v128_v61, %v144_v63  ;;  %v2203_v44 = vrot.slane %v128_v61, %v140_v59  ;;  %v154_v63 = vld [vmem:[#allocation2 + $0x10] sm:$0xff] }
  0x6d   :  { %2925 = vst [vmem:[#allocation39_spill] sm:$0xff] %v2194_v60  ;;  %2926 = vst [vmem:[#allocation40_spill] sm:$0xff] %v2196_v62  ;;  %v156_v0 = vadd.f32 %v152_v54, %v2194_v60  ;;  %v157_v1 = vadd.f32 %v153_v55, %v2196_v62  ;;  %v159_v51 = vadd.f32 %v155_v56, %v2199_v52 }
  0x6e   :  { %2927 = vst [vmem:[#allocation41_spill] sm:$0xff] %v2199_v52  ;;  %v158_v60 = vadd.f32 %v154_v63, %v2203_v44  ;;  %v2933_v63 = vld [vmem:[#allocation25_spill] sm:$0xff] }
 0x108   :  { %v226_v5 = vpop.f32.mrf.mxu0  ;;  %v297_v50 = vpop.f32.mrf.mxu1 }
 0x109   :  { %v302_v53 = vadd.f32 %v226_v5, %v156_v0  ;;  %v304_v55 = vadd.f32 %v297_v50, %v158_v60  ;;  %v2929_v60 = vld [vmem:[#allocation21_spill] sm:$0xff] }
 0x10a   :  { %v228_v47 = vpop.f32.mrf.mxu0  ;;  %v299_v46 = vpop.f32.mrf.mxu1 }
 0x10b   :  { %v306_v48 = vmul.f32 0.5, %v302_v53  ;;  %v303_v49 = vadd.f32 %v228_v47, %v157_v1  ;;  %v305_v54 = vadd.f32 %v299_v46, %v159_v51  ;;  %v308_v0 = vmul.f32 0.5, %v304_v55  ;;  %v2934_v55 = vld [vmem:[#allocation24_spill] sm:$0xff] }
 0x10d   :  { %1608 = vtanh.f32 %v306_v48  ;;  %v307_v57 = vmul.f32 0.5, %v303_v49 }
 0x10f   :  { %1610 = vtanh.f32 %v307_v57  ;;  %v2931_v57 = vld [vmem:[#allocation23_spill] sm:$0xff] }
 0x110   :  { %1612 = vtanh.f32 %v305_v54  ;;  %v2932_v54 = vld [vmem:[#allocation22_spill] sm:$0xff] }
 0x111   :  { %1614 = vtanh.f32 %v308_v0  ;;  %v2935_v0 = vld [vmem:[#allocation27_spill] sm:$0xff] }
 0x11a   :  { %v1609_v5 = vpop.eup %1608 }
 0x11b   :  { %v312_v58 = vmul.f32 0.5, %v1609_v5  ;;  %v2936_v5 = vld [vmem:[#allocation26_spill] sm:$0xff] }
 0x11c   :  { %v1611_v62 = vpop.eup %1610 }
 0x11d   :  { %v315_v56 = vadd.f32 0.5, %v312_v58  ;;  %v313_v52 = vmul.f32 0.5, %v1611_v62  ;;  %v1613_v1 = vpop.eup %1612  ;;  %v2930_v62 = vld [vmem:[#allocation20_spill] sm:$0xff]  ;;  %v2937_v58 = vld [vmem:[#allocation29_spill] sm:$0xff] }
 0x11e   :  { %v1615_v46 = vpop.eup %1614 }
 0x11f   :  { %v316_v53 = vadd.f32 0.5, %v313_v52  ;;  %v320_v49 = vmul.f32 %v1613_v1, %v315_v56  ;;  %v314_v51 = vmul.f32 0.5, %v1615_v46  ;;  %v2928_v52 = vld [vmem:[#allocation18_spill] sm:$0xff]  ;;  %v2938_v56 = vld [vmem:[#allocation28_spill] sm:$0xff]  ;;  %v2939_v1 = vld [vmem:[#allocation31_spill] sm:$0xff] }
 0x120   :  { %v2943_v46 = vld [vmem:[#allocation35_spill] sm:$0xff] }
 0x121   :  { %v319_v48 = vmul.f32 0.0, %v316_v53  ;;  %v317_v59 = vadd.f32 0.5, %v314_v51  ;;  %v2940_v53 = vld [vmem:[#allocation30_spill] sm:$0xff] }
 0x122   :  { %v2944_v51 = vld [vmem:[#allocation34_spill] sm:$0xff] }
 0x123   :  { %v2206_v61 = vadd.f32 %v320_v49, %v319_v48  ;;  %v2941_v48 = vld [vmem:[#allocation33_spill] sm:$0xff]  ;;  %v2942_v49 = vld [vmem:[#allocation32_spill] sm:$0xff] }
 0x125   :  { %1616 = vtanh.f32 %v2206_v61 }
 0x132   :  { %v1617_v47 = vpop.eup %1616 }
 0x133   :  { %v323_v50 = vmul.f32 %v1617_v47, %v317_v59  ;;  %v2945_v59 = vld [vmem:[#allocation37_spill] sm:$0xff]  ;;  %v2946_v47 = vld [vmem:[#allocation36_spill] sm:$0xff] }
 0x135   :  { %324 = vst [vmem:[#allocation8] sm:$0xff] %v323_v50  ;;  %399 = vmatmul.mubr.f32.vlgmr.msra.gmra.mxu0 %v323_v50  ;;  %470 = vmatmul.mubr.f32.vlgmr.msra.gmra.mxu1 %v323_v50  ;;  %v2947_v50 = vmov 0.0  }
 0x136   :  { %510 = vmatpush1.msra.mxu0 %v1934_v2  ;;  %581 = vmatpush1.msra.mxu1 %v1947_v7 }
 0x137   :  { %511 = vmatprep.subr.mxu0 %v1936_v3  ;;  %582 = vmatprep.subr.mxu1 %v1953_v9 }
 0x138   :  { %512 = vmatpush1.msra.mxu0 %v1939_v4  ;;  %583 = vmatpush1.msra.mxu1 %v1955_v10 }
 0x139   :  { %513 = vmatprep.subr.mxu0 %v1944_v6  ;;  %584 = vmatprep.subr.mxu1 %v1961_v12 }
 0x13a   :  { %514 = vmatpush1.msra.mxu0 %v1950_v8  ;;  %585 = vmatpush1.msra.mxu1 %v1967_v14 }
 0x13b   :  { %515 = vmatprep.subr.mxu0 %v1958_v11  ;;  %586 = vmatprep.subr.mxu1 %v1969_v15 }
 0x13c   :  { %516 = vmatpush1.msra.mxu0 %v1964_v13  ;;  %587 = vmatpush1.msra.mxu1 %v1975_v17 }
 0x13d   :  { %517 = vmatprep.subr.mxu0 %v1972_v16  ;;  %588 = vmatprep.subr.mxu1 %v1981_v19 }
 0x13e   :  { %518 = vmatpush1.msra.mxu0 %v1978_v18  ;;  %589 = vmatpush1.msra.mxu1 %v1987_v21 }
 0x13f   :  { %519 = vmatprep.subr.mxu0 %v1984_v20  ;;  %590 = vmatprep.subr.mxu1 %v1993_v23 }
 0x140   :  { %520 = vmatpush1.msra.mxu0 %v1990_v22  ;;  %591 = vmatpush1.msra.mxu1 %v1999_v25 }
 0x141   :  { %521 = vmatprep.subr.mxu0 %v1996_v24  ;;  %592 = vmatprep.subr.mxu1 %v2005_v27 }
 0x142   :  { %522 = vmatpush1.msra.mxu0 %v2002_v26  ;;  %593 = vmatpush1.msra.mxu1 %v2011_v29 }
 0x143   :  { %523 = vmatprep.subr.mxu0 %v2008_v28  ;;  %594 = vmatprep.subr.mxu1 %v2017_v31 }
 0x144   :  { %524 = vmatpush1.msra.mxu0 %v2014_v30  ;;  %595 = vmatpush1.msra.mxu1 %v2023_v33 }
 0x145   :  { %525 = vmatprep.subr.mxu0 %v2020_v32  ;;  %596 = vmatprep.subr.mxu1 %v2029_v35 }
 0x146   :  { %526 = vmatpush1.msra.mxu0 %v2026_v34  ;;  %597 = vmatpush1.msra.mxu1 %v2035_v37 }
 0x147   :  { %527 = vmatprep.subr.mxu0 %v2032_v36  ;;  %598 = vmatprep.subr.mxu1 %v2041_v39 }
 0x148   :  { %528 = vmatpush1.msra.mxu0 %v2038_v38  ;;  %599 = vmatpush1.msra.mxu1 %v2047_v41 }
 0x149   :  { %529 = vmatprep.subr.mxu0 %v2044_v40  ;;  %600 = vmatprep.subr.mxu1 %v2053_v43 }
 0x14a   :  { %530 = vmatpush1.msra.mxu0 %v2050_v42  ;;  %601 = vmatpush1.msra.mxu1 %v2059_v45 }
 0x14b   :  { %531 = vmatprep.subr.mxu0 %v2928_v52  ;;  %602 = vmatprep.subr.mxu1 %v2929_v60  ;;  %v328_v60 = vld [vmem:[#allocation2 + $0x30] sm:$0xff] }
 0x14c   :  { %532 = vmatpush1.msra.mxu0 %v2930_v62  ;;  %603 = vmatpush1.msra.mxu1 %v2931_v57  ;;  %v332_v52 = vadd.f32 %v328_v60, %v2203_v44 }
 0x14d   :  { %533 = vmatprep.subr.mxu0 %v2932_v54  ;;  %604 = vmatprep.subr.mxu1 %v2933_v63 }
 0x14e   :  { %534 = vmatpush1.msra.mxu0 %v2934_v55  ;;  %605 = vmatpush1.msra.mxu1 %v2935_v0  ;;  %v329_v55 = vld [vmem:[#allocation2 + $0x38] sm:$0xff] }
 0x14f   :  { %535 = vmatprep.subr.mxu0 %v2936_v5  ;;  %606 = vmatprep.subr.mxu1 %v2937_v58  ;;  %v2948_v58 = vld [vmem:[#allocation38_spill] sm:$0xff]  ;;  %v2952_v5 = vld [vmem:[#allocation40_spill] sm:$0xff] }
 0x150   :  { %536 = vmatpush1.msra.mxu0 %v2938_v56  ;;  %607 = vmatpush1.msra.mxu1 %v2939_v1  ;;  %v2949_v1 = vld [vmem:[#allocation16_spill] sm:$0xff]  ;;  %v2951_v56 = vld [vmem:[#allocation39_spill] sm:$0xff] }
 0x151   :  { %537 = vmatprep.subr.mxu0 %v2940_v53  ;;  %608 = vmatprep.subr.mxu1 %v2941_v48  ;;  %v2950_v53 = vld [vmem:[#allocation17_spill] sm:$0xff] }
 0x152   :  { %538 = vmatpush1.msra.mxu0 %v2942_v49  ;;  %609 = vmatpush1.msra.mxu1 %v2943_v46  ;;  %v326_v48 = vld [vmem:[#allocation2 + $0x20] sm:$0xff]  ;;  %v327_v49 = vld [vmem:[#allocation2 + $0x28] sm:$0xff] }
 0x153   :  { %539 = vmatprep.subr.mxu0 %v2944_v51  ;;  %610 = vmatprep.subr.mxu1 %v2945_v59  ;;  %v330_v46 = vadd.f32 %v326_v48, %v2951_v56  ;;  %v331_v51 = vadd.f32 %v327_v49, %v2952_v5 }
 0x154   :  { %540 = vmatpush1.msra.mxu0 %v2946_v47  ;;  %573 = vmatprep.mubr.f32.mxu0 %v2947_v50 }
 0x155   :  { %611 = vmatpush1.msra.mxu1 %v2948_v58  ;;  %644 = vmatprep.mubr.f32.mxu1 %v2947_v50  ;;  %v2953_v58 = vld [vmem:[#allocation41_spill] sm:$0xff] }
 0x156   :  { %684 = vmatprep.subr.mxu0 %v2949_v1  ;;  %755 = vmatprep.subr.mxu1 %v2950_v53  ;;  %v333_v62 = vadd.f32 %v329_v55, %v2953_v58 }
 0x1f5   :  { %v400_v0 = vpop.f32.mrf.mxu0  ;;  %v471_v59 = vpop.f32.mrf.mxu1 }
 0x1f6   :  { %v476_v47 = vadd.f32 %v400_v0, %v330_v46  ;;  %v478_v48 = vadd.f32 %v471_v59, %v332_v52  ;;  %v2958_v59 = vld [vmem:[#allocation23_spill] sm:$0xff] }
 0x1f7   :  { %v402_v63 = vpop.f32.mrf.mxu0  ;;  %v473_v50 = vpop.f32.mrf.mxu1 }
 0x1f8   :  { %v480_v54 = vmul.f32 0.5, %v476_v47  ;;  %v477_v57 = vadd.f32 %v402_v63, %v331_v51  ;;  %v479_v53 = vadd.f32 %v473_v50, %v333_v62  ;;  %v482_v49 = vmul.f32 0.5, %v478_v48  ;;  %v2959_v47 = vld [vmem:[#allocation22_spill] sm:$0xff]  ;;  %v2960_v50 = vld [vmem:[#allocation25_spill] sm:$0xff]  ;;  %v2961_v48 = vld [vmem:[#allocation24_spill] sm:$0xff] }
 0x1fa   :  { %1618 = vtanh.f32 %v480_v54  ;;  %v481_v1 = vmul.f32 0.5, %v477_v57 }
 0x1fc   :  { %1620 = vtanh.f32 %v481_v1 }
 0x1fd   :  { %1622 = vtanh.f32 %v479_v53 }
 0x1fe   :  { %1624 = vtanh.f32 %v482_v49  ;;  %v2962_v49 = vld [vmem:[#allocation27_spill] sm:$0xff] }
 0x207   :  { %v1619_v5 = vpop.eup %1618 }
 0x208   :  { %v486_v56 = vmul.f32 0.5, %v1619_v5  ;;  %v2956_v5 = vld [vmem:[#allocation21_spill] sm:$0xff] }
 0x209   :  { %v1621_v45 = vpop.eup %1620 }
 0x20a   :  { %v489_v0 = vadd.f32 0.5, %v486_v56  ;;  %v487_v46 = vmul.f32 0.5, %v1621_v45  ;;  %v1623_v51 = vpop.eup %1622  ;;  %v2954_v45 = vld [vmem:[#allocation19_spill] sm:$0xff]  ;;  %v2957_v56 = vld [vmem:[#allocation20_spill] sm:$0xff] }
 0x20b   :  { %v1625_v62 = vpop.eup %1624 }
 0x20c   :  { %v490_v63 = vadd.f32 0.5, %v487_v46  ;;  %v494_v54 = vmul.f32 %v1623_v51, %v489_v0  ;;  %v488_v60 = vmul.f32 0.5, %v1625_v62  ;;  %v2963_v0 = vld [vmem:[#allocation26_spill] sm:$0xff]  ;;  %v2964_v46 = vld [vmem:[#allocation29_spill] sm:$0xff]  ;;  %v2966_v51 = vld [vmem:[#allocation31_spill] sm:$0xff] }
 0x20d   :  { %v2969_v62 = vld [vmem:[#allocation32_spill] sm:$0xff] }
 0x20e   :  { %v493_v55 = vmul.f32 %v490_v63, %v2206_v61  ;;  %v491_v1 = vadd.f32 0.5, %v488_v60  ;;  %v2955_v61 = vld [vmem:[#allocation18_spill] sm:$0xff]  ;;  %v2965_v63 = vld [vmem:[#allocation28_spill] sm:$0xff]  ;;  %v2970_v60 = vld [vmem:[#allocation35_spill] sm:$0xff] }
 0x210   :  { %v2280_v57 = vadd.f32 %v494_v54, %v493_v55  ;;  %v2967_v55 = vld [vmem:[#allocation30_spill] sm:$0xff]  ;;  %v2968_v54 = vld [vmem:[#allocation33_spill] sm:$0xff] }
 0x212   :  { %1626 = vtanh.f32 %v2280_v57 }
 0x21f   :  { %v1627_v52 = vpop.eup %1626 }
 0x220   :  { %v497_v53 = vmul.f32 %v1627_v52, %v491_v1  ;;  %v2971_v1 = vld [vmem:[#allocation34_spill] sm:$0xff]  ;;  %v2972_v52 = vld [vmem:[#allocation37_spill] sm:$0xff] }
 0x222   :  { %499 = vst [vmem:[#allocation8 + $0x8] sm:$0xff] %v497_v53  ;;  %574 = vmatmul.mubr.f32.vlgmr.msra.gmra.mxu0 %v497_v53  ;;  %645 = vmatmul.mubr.f32.vlgmr.msra.gmra.mxu1 %v497_v53  ;;  %v2973_v53 = vld [vmem:[#allocation36_spill] sm:$0xff] }
 0x223   :  { %685 = vmatpush1.msra.mxu0 %v1934_v2  ;;  %756 = vmatpush1.msra.mxu1 %v1947_v7 }
 0x224   :  { %686 = vmatprep.subr.mxu0 %v1936_v3  ;;  %757 = vmatprep.subr.mxu1 %v1953_v9 }
 0x225   :  { %687 = vmatpush1.msra.mxu0 %v1939_v4  ;;  %758 = vmatpush1.msra.mxu1 %v1955_v10 }
 0x226   :  { %688 = vmatprep.subr.mxu0 %v1944_v6  ;;  %759 = vmatprep.subr.mxu1 %v1961_v12 }
 0x227   :  { %689 = vmatpush1.msra.mxu0 %v1950_v8  ;;  %760 = vmatpush1.msra.mxu1 %v1967_v14 }
 0x228   :  { %690 = vmatprep.subr.mxu0 %v1958_v11  ;;  %761 = vmatprep.subr.mxu1 %v1969_v15 }
 0x229   :  { %691 = vmatpush1.msra.mxu0 %v1964_v13  ;;  %762 = vmatpush1.msra.mxu1 %v1975_v17 }
 0x22a   :  { %692 = vmatprep.subr.mxu0 %v1972_v16  ;;  %763 = vmatprep.subr.mxu1 %v1981_v19 }
 0x22b   :  { %693 = vmatpush1.msra.mxu0 %v1978_v18  ;;  %764 = vmatpush1.msra.mxu1 %v1987_v21 }
 0x22c   :  { %694 = vmatprep.subr.mxu0 %v1984_v20  ;;  %765 = vmatprep.subr.mxu1 %v1993_v23 }
 0x22d   :  { %695 = vmatpush1.msra.mxu0 %v1990_v22  ;;  %766 = vmatpush1.msra.mxu1 %v1999_v25 }
 0x22e   :  { %696 = vmatprep.subr.mxu0 %v1996_v24  ;;  %767 = vmatprep.subr.mxu1 %v2005_v27 }
 0x22f   :  { %697 = vmatpush1.msra.mxu0 %v2002_v26  ;;  %768 = vmatpush1.msra.mxu1 %v2011_v29 }
 0x230   :  { %698 = vmatprep.subr.mxu0 %v2008_v28  ;;  %769 = vmatprep.subr.mxu1 %v2017_v31 }
 0x231   :  { %699 = vmatpush1.msra.mxu0 %v2014_v30  ;;  %770 = vmatpush1.msra.mxu1 %v2023_v33 }
 0x232   :  { %700 = vmatprep.subr.mxu0 %v2020_v32  ;;  %771 = vmatprep.subr.mxu1 %v2029_v35 }
 0x233   :  { %701 = vmatpush1.msra.mxu0 %v2026_v34  ;;  %772 = vmatpush1.msra.mxu1 %v2035_v37 }
 0x234   :  { %702 = vmatprep.subr.mxu0 %v2032_v36  ;;  %773 = vmatprep.subr.mxu1 %v2041_v39 }
 0x235   :  { %703 = vmatpush1.msra.mxu0 %v2038_v38  ;;  %774 = vmatpush1.msra.mxu1 %v2047_v41 }
 0x236   :  { %704 = vmatprep.subr.mxu0 %v2044_v40  ;;  %775 = vmatprep.subr.mxu1 %v2053_v43 }
 0x237   :  { %705 = vmatpush1.msra.mxu0 %v2050_v42  ;;  %776 = vmatpush1.msra.mxu1 %v2954_v45 }
 0x238   :  { %706 = vmatprep.subr.mxu0 %v2955_v61  ;;  %777 = vmatprep.subr.mxu1 %v2956_v5  ;;  %v503_v5 = vld [vmem:[#allocation2 + $0x50] sm:$0xff] }
 0x239   :  { %707 = vmatpush1.msra.mxu0 %v2957_v56  ;;  %778 = vmatpush1.msra.mxu1 %v2958_v59  ;;  %v507_v61 = vadd.f32 %v503_v5, %v2203_v44 }
 0x23a   :  { %708 = vmatprep.subr.mxu0 %v2959_v47  ;;  %779 = vmatprep.subr.mxu1 %v2960_v50  ;;  %v504_v50 = vld [vmem:[#allocation2 + $0x58] sm:$0xff] }
 0x23b   :  { %709 = vmatpush1.msra.mxu0 %v2961_v48  ;;  %780 = vmatpush1.msra.mxu1 %v2962_v49  ;;  %v2979_v49 = vld [vmem:[#allocation40_spill] sm:$0xff] }
 0x23c   :  { %710 = vmatprep.subr.mxu0 %v2963_v0  ;;  %781 = vmatprep.subr.mxu1 %v2964_v46  ;;  %v2974_v0 = vmov 0.0   ;;  %v2975_v46 = vld [vmem:[#allocation38_spill] sm:$0xff] }
 0x23d   :  { %711 = vmatpush1.msra.mxu0 %v2965_v63  ;;  %782 = vmatpush1.msra.mxu1 %v2966_v51  ;;  %v2976_v51 = vld [vmem:[#allocation16_spill] sm:$0xff]  ;;  %v2978_v63 = vld [vmem:[#allocation39_spill] sm:$0xff] }
 0x23e   :  { %712 = vmatprep.subr.mxu0 %v2967_v55  ;;  %783 = vmatprep.subr.mxu1 %v2968_v54  ;;  %v2977_v55 = vld [vmem:[#allocation17_spill] sm:$0xff] }
 0x23f   :  { %713 = vmatpush1.msra.mxu0 %v2969_v62  ;;  %784 = vmatpush1.msra.mxu1 %v2970_v60  ;;  %v501_v54 = vld [vmem:[#allocation2 + $0x40] sm:$0xff]  ;;  %v502_v62 = vld [vmem:[#allocation2 + $0x48] sm:$0xff] }
 0x240   :  { %714 = vmatprep.subr.mxu0 %v2971_v1  ;;  %785 = vmatprep.subr.mxu1 %v2972_v52  ;;  %v505_v60 = vadd.f32 %v501_v54, %v2978_v63  ;;  %v506_v1 = vadd.f32 %v502_v62, %v2979_v49 }
 0x241   :  { %715 = vmatpush1.msra.mxu0 %v2973_v53  ;;  %748 = vmatprep.mubr.f32.mxu0 %v2974_v0 }
 0x242   :  { %786 = vmatpush1.msra.mxu1 %v2975_v46  ;;  %819 = vmatprep.mubr.f32.mxu1 %v2974_v0  ;;  %v508_v46 = vadd.f32 %v504_v50, %v2953_v58 }
 0x243   :  { %859 = vmatprep.subr.mxu0 %v2976_v51  ;;  %930 = vmatprep.subr.mxu1 %v2977_v55 }
 0x2e2   :  { %v575_v48 = vpop.f32.mrf.mxu0  ;;  %v646_v52 = vpop.f32.mrf.mxu1 }
 0x2e3   :  { %v651_v53 = vadd.f32 %v575_v48, %v505_v60  ;;  %v653_v54 = vadd.f32 %v646_v52, %v507_v61 }
 0x2e4   :  { %v577_v47 = vpop.f32.mrf.mxu0  ;;  %v648_v0 = vpop.f32.mrf.mxu1 }
 0x2e5   :  { %v655_v59 = vmul.f32 0.5, %v651_v53  ;;  %v652_v56 = vadd.f32 %v577_v47, %v506_v1  ;;  %v654_v55 = vadd.f32 %v648_v0, %v508_v46  ;;  %v657_v62 = vmul.f32 0.5, %v653_v54 }
 0x2e7   :  { %1628 = vtanh.f32 %v655_v59  ;;  %v656_v51 = vmul.f32 0.5, %v652_v56 }
 0x2e9   :  { %1630 = vtanh.f32 %v656_v51 }
 0x2ea   :  { %1632 = vtanh.f32 %v654_v55 }
 0x2eb   :  { %1634 = vtanh.f32 %v657_v62 }
 0x2f4   :  { %v1629_v49 = vpop.eup %1628 }
 0x2f5   :  { %v661_v63 = vmul.f32 0.5, %v1629_v49 }
 0x2f6   :  { %v1631_v45 = vpop.eup %1630 }
 0x2f7   :  { %v664_v48 = vadd.f32 0.5, %v661_v63  ;;  %v662_v60 = vmul.f32 0.5, %v1631_v45  ;;  %v1633_v1 = vpop.eup %1632 }
 0x2f8   :  { %v1635_v0 = vpop.eup %1634 }
 0x2f9   :  { %v665_v47 = vadd.f32 0.5, %v662_v60  ;;  %v669_v59 = vmul.f32 %v1633_v1, %v664_v48  ;;  %v663_v5 = vmul.f32 0.5, %v1635_v0 }
 0x2fb   :  { %v668_v50 = vmul.f32 %v665_v47, %v2280_v57  ;;  %v666_v46 = vadd.f32 0.5, %v663_v5 }
 0x2fd   :  { %v2354_v56 = vadd.f32 %v669_v59, %v668_v50 }
 0x2ff   :  { %1636 = vtanh.f32 %v2354_v56 }
 0x30c   :  { %v1637_v61 = vpop.eup %1636 }
 0x30d   :  { %v672_v52 = vmul.f32 %v1637_v61, %v666_v46 }
 0x30f   :  { %674 = vst [vmem:[#allocation8 + $0x10] sm:$0xff] %v672_v52  ;;  %749 = vmatmul.mubr.f32.vlgmr.msra.gmra.mxu0 %v672_v52  ;;  %820 = vmatmul.mubr.f32.vlgmr.msra.gmra.mxu1 %v672_v52  ;;  %v2435_v52 = vld [vmem:[#allocation5 + $0x1e0] sm:$0xff] }
 0x310   :  { %860 = vmatpush1.msra.mxu0 %v1934_v2  ;;  %931 = vmatpush1.msra.mxu1 %v1947_v7  ;;  %v2980_v2 = vld [vmem:[#allocation19_spill] sm:$0xff] }
 0x311   :  { %861 = vmatprep.subr.mxu0 %v1936_v3  ;;  %932 = vmatprep.subr.mxu1 %v1953_v9  ;;  %v2981_v3 = vld [vmem:[#allocation18_spill] sm:$0xff]  ;;  %v2984_v7 = vld [vmem:[#allocation23_spill] sm:$0xff]  ;;  %v2986_v9 = vld [vmem:[#allocation25_spill] sm:$0xff] }
 0x312   :  { %862 = vmatpush1.msra.mxu0 %v1939_v4  ;;  %933 = vmatpush1.msra.mxu1 %v1955_v10  ;;  %v2982_v4 = vld [vmem:[#allocation21_spill] sm:$0xff]  ;;  %v2987_v10 = vld [vmem:[#allocation24_spill] sm:$0xff] }
 0x313   :  { %863 = vmatprep.subr.mxu0 %v1944_v6  ;;  %934 = vmatprep.subr.mxu1 %v1961_v12  ;;  %v2983_v6 = vld [vmem:[#allocation20_spill] sm:$0xff]  ;;  %v2989_v12 = vld [vmem:[#allocation26_spill] sm:$0xff] }
 0x314   :  { %864 = vmatpush1.msra.mxu0 %v1950_v8  ;;  %935 = vmatpush1.msra.mxu1 %v1967_v14  ;;  %v2985_v8 = vld [vmem:[#allocation22_spill] sm:$0xff]  ;;  %v2991_v14 = vld [vmem:[#allocation28_spill] sm:$0xff] }
 0x315   :  { %865 = vmatprep.subr.mxu0 %v1958_v11  ;;  %936 = vmatprep.subr.mxu1 %v1969_v15  ;;  %v2988_v11 = vld [vmem:[#allocation27_spill] sm:$0xff] }
 0x316   :  { %866 = vmatpush1.msra.mxu0 %v1964_v13  ;;  %937 = vmatpush1.msra.mxu1 %v1975_v17  ;;  %v2990_v13 = vld [vmem:[#allocation29_spill] sm:$0xff]  ;;  %v2992_v15 = vld [vmem:[#allocation31_spill] sm:$0xff] }
 0x317   :  { %867 = vmatprep.subr.mxu0 %v1972_v16  ;;  %938 = vmatprep.subr.mxu1 %v1981_v19  ;;  %v2993_v16 = vld [vmem:[#allocation30_spill] sm:$0xff]  ;;  %v2994_v17 = vld [vmem:[#allocation33_spill] sm:$0xff]  ;;  %v2996_v19 = vld [vmem:[#allocation35_spill] sm:$0xff] }
 0x318   :  { %868 = vmatpush1.msra.mxu0 %v1978_v18  ;;  %939 = vmatpush1.msra.mxu1 %v1987_v21  ;;  %v2995_v18 = vld [vmem:[#allocation32_spill] sm:$0xff]  ;;  %v2998_v21 = vld [vmem:[#allocation37_spill] sm:$0xff] }
 0x319   :  { %869 = vmatprep.subr.mxu0 %v1984_v20  ;;  %940 = vmatprep.subr.mxu1 %v1993_v23  ;;  %v2997_v20 = vld [vmem:[#allocation34_spill] sm:$0xff]  ;;  %v3000_v23 = vmov 0.0  }
 0x31a   :  { %870 = vmatpush1.msra.mxu0 %v1990_v22  ;;  %941 = vmatpush1.msra.mxu1 %v1999_v25  ;;  %v2999_v22 = vld [vmem:[#allocation36_spill] sm:$0xff]  ;;  %v2421_v25 = vld [vmem:[#allocation5 + $0x1e8] sm:$0xff] }
 0x31b   :  { %871 = vmatprep.subr.mxu0 %v1996_v24  ;;  %942 = vmatprep.subr.mxu1 %v2005_v27  ;;  %v3001_v24 = vld [vmem:[#allocation38_spill] sm:$0xff]  ;;  %3002 = vst [vmem:[#allocation41_spill] sm:$0xff] %v2421_v25 }
 0x31c   :  { %872 = vmatpush1.msra.mxu0 %v2002_v26  ;;  %943 = vmatpush1.msra.mxu1 %v2011_v29  ;;  %v2424_v26 = vld [vmem:[#allocation5 + $0x1f8] sm:$0xff]  ;;  %v676_v27 = vld [vmem:[#allocation2 + $0x60] sm:$0xff]  ;;  %v3004_v29 = vld [vmem:[#allocation39_spill] sm:$0xff] }
 0x31d   :  { %873 = vmatprep.subr.mxu0 %v2008_v28  ;;  %944 = vmatprep.subr.mxu1 %v2017_v31  ;;  %3003 = vst [vmem:[#allocation16_spill] sm:$0xff] %v2424_v26  ;;  %v677_v28 = vld [vmem:[#allocation2 + $0x68] sm:$0xff]  ;;  %v3005_v31 = vld [vmem:[#allocation40_spill] sm:$0xff] }
 0x31e   :  { %874 = vmatpush1.msra.mxu0 %v2014_v30  ;;  %945 = vmatpush1.msra.mxu1 %v2023_v33  ;;  %v680_v30 = vadd.f32 %v676_v27, %v3004_v29  ;;  %v2504_v27 = vld [vmem:[#allocation5 + $0x138] sm:$0xff] }
 0x31f   :  { %875 = vmatprep.subr.mxu0 %v2020_v32  ;;  %946 = vmatprep.subr.mxu1 %v2029_v35  ;;  %v681_v32 = vadd.f32 %v677_v28, %v3005_v31  ;;  %v679_v35 = vld [vmem:[#allocation2 + $0x78] sm:$0xff]  ;;  %v2507_v28 = vld [vmem:[#allocation5 + $0x120] sm:$0xff] }
 0x320   :  { %876 = vmatpush1.msra.mxu0 %v2026_v34  ;;  %947 = vmatpush1.msra.mxu1 %v2035_v37 }
 0x321   :  { %877 = vmatprep.subr.mxu0 %v2032_v36  ;;  %948 = vmatprep.subr.mxu1 %v2041_v39 }
 0x322   :  { %878 = vmatpush1.msra.mxu0 %v2038_v38  ;;  %949 = vmatpush1.msra.mxu1 %v2047_v41 }
 0x323   :  { %879 = vmatprep.subr.mxu0 %v2044_v40  ;;  %950 = vmatprep.subr.mxu1 %v2053_v43  ;;  %v683_v40 = vadd.f32 %v679_v35, %v2953_v58  ;;  %v678_v43 = vld [vmem:[#allocation2 + $0x70] sm:$0xff] }
 0x324   :  { %880 = vmatpush1.msra.mxu0 %v2050_v42  ;;  %951 = vmatpush1.msra.mxu1 %v2980_v2  ;;  %v682_v45 = vadd.f32 %v678_v43, %v2203_v44  ;;  %v2438_v2 = vld [vmem:[#allocation5 + $0x1f0] sm:$0xff] }
 0x325   :  { %881 = vmatprep.subr.mxu0 %v2981_v3  ;;  %952 = vmatprep.subr.mxu1 %v2982_v4  ;;  %v2444_v3 = vld [vmem:[#allocation5 + $0x1d8] sm:$0xff]  ;;  %v2447_v4 = vld [vmem:[#allocation5 + $0x1c0] sm:$0xff]  ;;  %v2522_v35 = vld [vmem:[#allocation5 + $0x110] sm:$0xff] }
 0x326   :  { %882 = vmatpush1.msra.mxu0 %v2983_v6  ;;  %953 = vmatpush1.msra.mxu1 %v2984_v7  ;;  %v2450_v6 = vld [vmem:[#allocation5 + $0x1d0] sm:$0xff]  ;;  %v2453_v7 = vld [vmem:[#allocation5 + $0x1a8] sm:$0xff] }
 0x327   :  { %883 = vmatprep.subr.mxu0 %v2985_v8  ;;  %954 = vmatprep.subr.mxu1 %v2986_v9  ;;  %v2456_v8 = vld [vmem:[#allocation5 + $0x1b8] sm:$0xff]  ;;  %v2459_v9 = vld [vmem:[#allocation5 + $0x1a0] sm:$0xff]  ;;  %v2546_v43 = vld [vmem:[#allocation5 + $0xd0] sm:$0xff] }
 0x328   :  { %884 = vmatpush1.msra.mxu0 %v2987_v10  ;;  %955 = vmatpush1.msra.mxu1 %v2988_v11  ;;  %v2462_v10 = vld [vmem:[#allocation5 + $0x1b0] sm:$0xff]  ;;  %v2465_v11 = vld [vmem:[#allocation5 + $0x188] sm:$0xff] }
 0x329   :  { %885 = vmatprep.subr.mxu0 %v2989_v12  ;;  %956 = vmatprep.subr.mxu1 %v2990_v13  ;;  %v2468_v12 = vld [vmem:[#allocation5 + $0x198] sm:$0xff]  ;;  %v2471_v13 = vld [vmem:[#allocation5 + $0x180] sm:$0xff] }
 0x32a   :  { %886 = vmatpush1.msra.mxu0 %v2991_v14  ;;  %957 = vmatpush1.msra.mxu1 %v2992_v15  ;;  %v2474_v14 = vld [vmem:[#allocation5 + $0x190] sm:$0xff]  ;;  %v2477_v15 = vld [vmem:[#allocation5 + $0x168] sm:$0xff] }
 0x32b   :  { %887 = vmatprep.subr.mxu0 %v2993_v16  ;;  %958 = vmatprep.subr.mxu1 %v2994_v17  ;;  %v2480_v16 = vld [vmem:[#allocation5 + $0x178] sm:$0xff]  ;;  %v2483_v17 = vld [vmem:[#allocation5 + $0x160] sm:$0xff] }
 0x32c   :  { %888 = vmatpush1.msra.mxu0 %v2995_v18  ;;  %959 = vmatpush1.msra.mxu1 %v2996_v19  ;;  %v2486_v18 = vld [vmem:[#allocation5 + $0x170] sm:$0xff]  ;;  %v2489_v19 = vld [vmem:[#allocation5 + $0x148] sm:$0xff] }
 0x32d   :  { %889 = vmatprep.subr.mxu0 %v2997_v20  ;;  %960 = vmatprep.subr.mxu1 %v2998_v21  ;;  %v2492_v20 = vld [vmem:[#allocation5 + $0x158] sm:$0xff]  ;;  %v2495_v21 = vld [vmem:[#allocation5 + $0x140] sm:$0xff] }
 0x32e   :  { %890 = vmatpush1.msra.mxu0 %v2999_v22  ;;  %923 = vmatprep.mubr.f32.mxu0 %v3000_v23  ;;  %v2498_v22 = vld [vmem:[#allocation5 + $0x150] sm:$0xff] }
 0x32f   :  { %961 = vmatpush1.msra.mxu1 %v3001_v24  ;;  %994 = vmatprep.mubr.f32.mxu1 %v3000_v23  ;;  %v2501_v24 = vld [vmem:[#allocation5 + $0x128] sm:$0xff] }
 0x330   :  { %1034 = vmatprep.subr.mxu0 %v2421_v25  ;;  %1105 = vmatprep.subr.mxu1 %v2424_v26 }
 0x3cf   :  { %v750_v33 = vpop.f32.mrf.mxu0  ;;  %v821_v34 = vpop.f32.mrf.mxu1 }
 0x3d0   :  { %v826_v36 = vadd.f32 %v750_v33, %v680_v30  ;;  %v828_v49 = vadd.f32 %v821_v34, %v682_v45  ;;  %v2510_v30 = vld [vmem:[#allocation5 + $0x130] sm:$0xff]  ;;  %v2516_v33 = vld [vmem:[#allocation5 + $0x118] sm:$0xff]  ;;  %v2519_v34 = vld [vmem:[#allocation5 + $0x100] sm:$0xff] }
 0x3d1   :  { %v752_v37 = vpop.f32.mrf.mxu0  ;;  %v823_v41 = vpop.f32.mrf.mxu1  ;;  %v2552_v45 = vld [vmem:[#allocation5 + $0xb8] sm:$0xff] }
 0x3d2   :  { %v830_v38 = vmul.f32 0.5, %v826_v36  ;;  %v827_v39 = vadd.f32 %v752_v37, %v681_v32  ;;  %v829_v57 = vadd.f32 %v823_v41, %v683_v40  ;;  %v832_v63 = vmul.f32 0.5, %v828_v49  ;;  %v2513_v32 = vld [vmem:[#allocation5 + $0x108] sm:$0xff]  ;;  %v2528_v37 = vld [vmem:[#allocation5 + $0xf8] sm:$0xff]  ;;  %v2555_v49 = vld [vmem:[#allocation5 + $0xa0] sm:$0xff] }
 0x3d3   :  { %v2525_v36 = vld [vmem:[#allocation5 + $0xe8] sm:$0xff]  ;;  %v2540_v41 = vld [vmem:[#allocation5 + $0xd8] sm:$0xff] }
 0x3d4   :  { %1638 = vtanh.f32 %v830_v38  ;;  %v831_v42 = vmul.f32 0.5, %v827_v39  ;;  %v2531_v38 = vld [vmem:[#allocation5 + $0xe0] sm:$0xff]  ;;  %v2534_v39 = vld [vmem:[#allocation5 + $0xf0] sm:$0xff]  ;;  %v2537_v40 = vld [vmem:[#allocation5 + $0xc8] sm:$0xff] }
 0x3d6   :  { %1640 = vtanh.f32 %v831_v42  ;;  %v2543_v42 = vld [vmem:[#allocation5 + $0xc0] sm:$0xff] }
 0x3d7   :  { %1642 = vtanh.f32 %v829_v57  ;;  %v2549_v57 = vld [vmem:[#allocation5 + $0xa8] sm:$0xff] }
 0x3d8   :  { %1644 = vtanh.f32 %v832_v63  ;;  %v2558_v63 = vld [vmem:[#allocation5 + $0xb0] sm:$0xff] }
 0x3d9   :  { %3006 = vst [vmem:[#allocation17_spill] sm:$0xff] %v2558_v63 }
 0x3e1   :  { %v1639_v53 = vpop.eup %1638 }
 0x3e2   :  { %v836_v51 = vmul.f32 0.5, %v1639_v53  ;;  %v2561_v53 = vld [vmem:[#allocation5 + $0x88] sm:$0xff] }
 0x3e3   :  { %v1641_v55 = vpop.eup %1640  ;;  %3007 = vst [vmem:[#allocation19_spill] sm:$0xff] %v2561_v53 }
 0x3e4   :  { %v839_v54 = vadd.f32 0.5, %v836_v51  ;;  %v837_v62 = vmul.f32 0.5, %v1641_v55  ;;  %v1643_v60 = vpop.eup %1642  ;;  %v2564_v51 = vld [vmem:[#allocation5 + $0x98] sm:$0xff]  ;;  %v2567_v55 = vld [vmem:[#allocation5 + $0x80] sm:$0xff] }
 0x3e5   :  { %v1645_v59 = vpop.eup %1644  ;;  %3008 = vst [vmem:[#allocation18_spill] sm:$0xff] %v2564_v51  ;;  %3009 = vst [vmem:[#allocation21_spill] sm:$0xff] %v2567_v55 }
 0x3e6   :  { %v840_v48 = vadd.f32 0.5, %v837_v62  ;;  %v844_v1 = vmul.f32 %v1643_v60, %v839_v54  ;;  %v838_v0 = vmul.f32 0.5, %v1645_v59  ;;  %v2570_v54 = vld [vmem:[#allocation5 + $0x90] sm:$0xff]  ;;  %v2573_v62 = vld [vmem:[#allocation5 + $0x68] sm:$0xff]  ;;  %v2579_v60 = vld [vmem:[#allocation5 + $0x60] sm:$0xff] }
 0x3e7   :  { %3010 = vst [vmem:[#allocation20_spill] sm:$0xff] %v2570_v54  ;;  %3011 = vst [vmem:[#allocation23_spill] sm:$0xff] %v2573_v62  ;;  %v2588_v59 = vld [vmem:[#allocation5 + $0x58] sm:$0xff] }
 0x3e8   :  { %v843_v47 = vmul.f32 %v840_v48, %v2354_v56  ;;  %v841_v5 = vadd.f32 0.5, %v838_v0  ;;  %v2441_v56 = vld [vmem:[#allocation5 + $0x1c8] sm:$0xff]  ;;  %v2576_v48 = vld [vmem:[#allocation5 + $0x78] sm:$0xff]  ;;  %3013 = vst [vmem:[#allocation25_spill] sm:$0xff] %v2579_v60  ;;  %3016 = vst [vmem:[#allocation26_spill] sm:$0xff] %v2588_v59 }
 0x3e9   :  { %3012 = vst [vmem:[#allocation22_spill] sm:$0xff] %v2576_v48  ;;  %v2591_v0 = vld [vmem:[#allocation5 + $0x40] sm:$0xff] }
 0x3ea   :  { %v2432_v50 = vadd.f32 %v844_v1, %v843_v47  ;;  %v2582_v47 = vld [vmem:[#allocation5 + $0x70] sm:$0xff]  ;;  %v2585_v1 = vld [vmem:[#allocation5 + $0x48] sm:$0xff]  ;;  %3017 = vst [vmem:[#allocation29_spill] sm:$0xff] %v2591_v0 }
 0x3eb   :  { %3014 = vst [vmem:[#allocation24_spill] sm:$0xff] %v2582_v47  ;;  %3015 = vst [vmem:[#allocation27_spill] sm:$0xff] %v2585_v1 }
 0x3ec   :  { %1646 = vtanh.f32 %v2432_v50 }
 0x3f9   :  { %v1647_v46 = vpop.eup %1646 }
 0x3fa   :  { %v847_v61 = vmul.f32 %v1647_v46, %v841_v5  ;;  %v2594_v5 = vld [vmem:[#allocation5 + $0x50] sm:$0xff]  ;;  %v2597_v46 = vld [vmem:[#allocation5 + $0x28] sm:$0xff] }
 0x3fb   :  { %3018 = vst [vmem:[#allocation28_spill] sm:$0xff] %v2594_v5  ;;  %3019 = vst [vmem:[#allocation31_spill] sm:$0xff] %v2597_v46 }
 0x3fc   :  { %849 = vst [vmem:[#allocation8 + $0x18] sm:$0xff] %v847_v61  ;;  %924 = vmatmul.mubr.f32.vlgmr.msra.gmra.mxu0 %v847_v61  ;;  %995 = vmatmul.mubr.f32.vlgmr.msra.gmra.mxu1 %v847_v61  ;;  %v2600_v61 = vld [vmem:[#allocation5 + $0x38] sm:$0xff] }
 0x3fd   :  { %1035 = vmatpush1.msra.mxu0 %v2435_v52  ;;  %1106 = vmatpush1.msra.mxu1 %v2438_v2  ;;  %3020 = vst [vmem:[#allocation30_spill] sm:$0xff] %v2600_v61 }
 0x3fe   :  { %1036 = vmatprep.subr.mxu0 %v2441_v56  ;;  %1107 = vmatprep.subr.mxu1 %v2444_v3 }
 0x3ff   :  { %1037 = vmatpush1.msra.mxu0 %v2447_v4  ;;  %1108 = vmatpush1.msra.mxu1 %v2450_v6 }
 0x400   :  { %1038 = vmatprep.subr.mxu0 %v2453_v7  ;;  %1109 = vmatprep.subr.mxu1 %v2456_v8 }
 0x401   :  { %1039 = vmatpush1.msra.mxu0 %v2459_v9  ;;  %1110 = vmatpush1.msra.mxu1 %v2462_v10 }
 0x402   :  { %1040 = vmatprep.subr.mxu0 %v2465_v11  ;;  %1111 = vmatprep.subr.mxu1 %v2468_v12 }
 0x403   :  { %1041 = vmatpush1.msra.mxu0 %v2471_v13  ;;  %1112 = vmatpush1.msra.mxu1 %v2474_v14 }
 0x404   :  { %1042 = vmatprep.subr.mxu0 %v2477_v15  ;;  %1113 = vmatprep.subr.mxu1 %v2480_v16 }
 0x405   :  { %1043 = vmatpush1.msra.mxu0 %v2483_v17  ;;  %1114 = vmatpush1.msra.mxu1 %v2486_v18 }
 0x406   :  { %1044 = vmatprep.subr.mxu0 %v2489_v19  ;;  %1115 = vmatprep.subr.mxu1 %v2492_v20 }
 0x407   :  { %1045 = vmatpush1.msra.mxu0 %v2495_v21  ;;  %1116 = vmatpush1.msra.mxu1 %v2498_v22 }
 0x408   :  { %1046 = vmatprep.subr.mxu0 %v2501_v24  ;;  %1117 = vmatprep.subr.mxu1 %v2504_v27 }
 0x409   :  { %1047 = vmatpush1.msra.mxu0 %v2507_v28  ;;  %1118 = vmatpush1.msra.mxu1 %v2510_v30 }
 0x40a   :  { %1048 = vmatprep.subr.mxu0 %v2513_v32  ;;  %1119 = vmatprep.subr.mxu1 %v2516_v33 }
 0x40b   :  { %1049 = vmatpush1.msra.mxu0 %v2519_v34  ;;  %1120 = vmatpush1.msra.mxu1 %v2522_v35 }
 0x40c   :  { %1050 = vmatprep.subr.mxu0 %v2525_v36  ;;  %1121 = vmatprep.subr.mxu1 %v2528_v37 }
 0x40d   :  { %1051 = vmatpush1.msra.mxu0 %v2531_v38  ;;  %1122 = vmatpush1.msra.mxu1 %v2534_v39 }
 0x40e   :  { %1052 = vmatprep.subr.mxu0 %v2537_v40  ;;  %1123 = vmatprep.subr.mxu1 %v2540_v41 }
 0x40f   :  { %1053 = vmatpush1.msra.mxu0 %v2543_v42  ;;  %1124 = vmatpush1.msra.mxu1 %v2546_v43 }
 0x410   :  { %1054 = vmatprep.subr.mxu0 %v2549_v57  ;;  %1125 = vmatprep.subr.mxu1 %v2552_v45 }
 0x411   :  { %1055 = vmatpush1.msra.mxu0 %v2555_v49  ;;  %1126 = vmatpush1.msra.mxu1 %v2558_v63 }
 0x412   :  { %1056 = vmatprep.subr.mxu0 %v2561_v53  ;;  %1127 = vmatprep.subr.mxu1 %v2564_v51  ;;  %v853_v51 = vld [vmem:[#allocation2 + $0x90] sm:$0xff] }
 0x413   :  { %1057 = vmatpush1.msra.mxu0 %v2567_v55  ;;  %1128 = vmatpush1.msra.mxu1 %v2570_v54  ;;  %v857_v53 = vadd.f32 %v853_v51, %v2203_v44 }
 0x414   :  { %1058 = vmatprep.subr.mxu0 %v2573_v62  ;;  %1129 = vmatprep.subr.mxu1 %v2576_v48 }
 0x415   :  { %1059 = vmatpush1.msra.mxu0 %v2579_v60  ;;  %1130 = vmatpush1.msra.mxu1 %v2582_v47  ;;  %v854_v60 = vld [vmem:[#allocation2 + $0x98] sm:$0xff] }
 0x416   :  { %1060 = vmatprep.subr.mxu0 %v2585_v1  ;;  %1131 = vmatprep.subr.mxu1 %v2588_v59  ;;  %v2603_v1 = vld [vmem:[#allocation5 + $0x20] sm:$0xff]  ;;  %v2606_v59 = vld [vmem:[#allocation5 + $0x30] sm:$0xff] }
 0x417   :  { %1061 = vmatpush1.msra.mxu0 %v2591_v0  ;;  %1132 = vmatpush1.msra.mxu1 %v2594_v5  ;;  %3021 = vst [vmem:[#allocation33_spill] sm:$0xff] %v2603_v1  ;;  %3022 = vst [vmem:[#allocation32_spill] sm:$0xff] %v2606_v59  ;;  %v2609_v0 = vld [vmem:[#allocation5 + $0x8] sm:$0xff]  ;;  %v2612_v5 = vld [vmem:[#allocation5 + $0x18] sm:$0xff] }
 0x418   :  { %1062 = vmatprep.subr.mxu0 %v2597_v46  ;;  %1133 = vmatprep.subr.mxu1 %v2600_v61  ;;  %3023 = vst [vmem:[#allocation35_spill] sm:$0xff] %v2609_v0  ;;  %3024 = vst [vmem:[#allocation34_spill] sm:$0xff] %v2612_v5  ;;  %v2615_v46 = vld [vmem:[#allocation5] sm:$0xff]  ;;  %v2619_v61 = vld [vmem:[#allocation5 + $0x10] sm:$0xff] }
 0x419   :  { %1063 = vmatpush1.msra.mxu0 %v2603_v1  ;;  %1134 = vmatpush1.msra.mxu1 %v2606_v59  ;;  %3025 = vst [vmem:[#allocation37_spill] sm:$0xff] %v2615_v46  ;;  %3026 = vst [vmem:[#allocation36_spill] sm:$0xff] %v2619_v61  ;;  %v852_v59 = vld [vmem:[#allocation2 + $0x88] sm:$0xff] }
 0x41a   :  { %1064 = vmatprep.subr.mxu0 %v2609_v0  ;;  %1135 = vmatprep.subr.mxu1 %v2612_v5  ;;  %v851_v0 = vld [vmem:[#allocation2 + $0x80] sm:$0xff]  ;;  %v856_v1 = vadd.f32 %v852_v59, %v3005_v31 }
 0x41b   :  { %1065 = vmatpush1.msra.mxu0 %v2615_v46  ;;  %1098 = vmatprep.mubr.f32.mxu0 %v3000_v23  ;;  %v855_v5 = vadd.f32 %v851_v0, %v3004_v29 }
 0x41c   :  { %1136 = vmatpush1.msra.mxu1 %v2619_v61  ;;  %1169 = vmatprep.mubr.f32.mxu1 %v3000_v23  ;;  %v858_v61 = vadd.f32 %v854_v60, %v2953_v58 }
 0x41d   :  { %1209 = vmatprep.subr.mxu0 %v2421_v25  ;;  %1280 = vmatprep.subr.mxu1 %v2424_v26 }
 0x4bc   :  { %v925_v47 = vpop.f32.mrf.mxu0  ;;  %v996_v46 = vpop.f32.mrf.mxu1 }
 0x4bd   :  { %v1001_v48 = vadd.f32 %v925_v47, %v855_v5  ;;  %v1003_v0 = vadd.f32 %v996_v46, %v857_v53  ;;  %v3031_v5 = vld [vmem:[#allocation20_spill] sm:$0xff]  ;;  %v3032_v46 = vld [vmem:[#allocation23_spill] sm:$0xff] }
 0x4be   :  { %v927_v62 = vpop.f32.mrf.mxu0  ;;  %v998_v23 = vpop.f32.mrf.mxu1 }
 0x4bf   :  { %v1005_v54 = vmul.f32 0.5, %v1001_v48  ;;  %v1002_v55 = vadd.f32 %v927_v62, %v856_v1  ;;  %v1004_v26 = vadd.f32 %v998_v23, %v858_v61  ;;  %v1007_v59 = vmul.f32 0.5, %v1003_v0  ;;  %v3033_v61 = vld [vmem:[#allocation22_spill] sm:$0xff]  ;;  %v3034_v0 = vld [vmem:[#allocation25_spill] sm:$0xff] }
 0x4c1   :  { %1648 = vtanh.f32 %v1005_v54  ;;  %v1006_v25 = vmul.f32 0.5, %v1002_v55 }
 0x4c3   :  { %1650 = vtanh.f32 %v1006_v25 }
 0x4c4   :  { %1652 = vtanh.f32 %v1004_v26 }
 0x4c5   :  { %1654 = vtanh.f32 %v1007_v59  ;;  %v3035_v59 = vld [vmem:[#allocation24_spill] sm:$0xff] }
 0x4ce   :  { %v1649_v31 = vpop.eup %1648 }
 0x4cf   :  { %v1011_v29 = vmul.f32 0.5, %v1649_v31  ;;  %v3028_v31 = vld [vmem:[#allocation19_spill] sm:$0xff] }
 0x4d0   :  { %v1651_v63 = vpop.eup %1650 }
 0x4d1   :  { %v1014_v47 = vadd.f32 0.5, %v1011_v29  ;;  %v1012_v48 = vmul.f32 0.5, %v1651_v63  ;;  %v1653_v1 = vpop.eup %1652  ;;  %v3027_v29 = vld [vmem:[#allocation17_spill] sm:$0xff] }
 0x4d2   :  { %v1655_v23 = vpop.eup %1654  ;;  %v3030_v63 = vld [vmem:[#allocation21_spill] sm:$0xff] }
 0x4d3   :  { %v1015_v62 = vadd.f32 0.5, %v1012_v48  ;;  %v1019_v54 = vmul.f32 %v1653_v1, %v1014_v47  ;;  %v1013_v25 = vmul.f32 0.5, %v1655_v23  ;;  %v3036_v47 = vld [vmem:[#allocation27_spill] sm:$0xff]  ;;  %v3037_v48 = vld [vmem:[#allocation26_spill] sm:$0xff]  ;;  %v3039_v1 = vld [vmem:[#allocation28_spill] sm:$0xff] }
 0x4d4   :  { %v3042_v23 = vld [vmem:[#allocation33_spill] sm:$0xff] }
 0x4d5   :  { %v1018_v60 = vmul.f32 %v1015_v62, %v2432_v50  ;;  %v1016_v26 = vadd.f32 0.5, %v1013_v25  ;;  %v3029_v50 = vld [vmem:[#allocation18_spill] sm:$0xff]  ;;  %v3038_v62 = vld [vmem:[#allocation29_spill] sm:$0xff]  ;;  %v3043_v25 = vld [vmem:[#allocation32_spill] sm:$0xff] }
 0x4d7   :  { %v2630_v55 = vadd.f32 %v1019_v54, %v1018_v60  ;;  %v3040_v60 = vld [vmem:[#allocation31_spill] sm:$0xff]  ;;  %v3041_v54 = vld [vmem:[#allocation30_spill] sm:$0xff] }
 0x4d9   :  { %1656 = vtanh.f32 %v2630_v55 }
 0x4e6   :  { %v1657_v53 = vpop.eup %1656 }
 0x4e7   :  { %v1022_v51 = vmul.f32 %v1657_v53, %v1016_v26  ;;  %v3044_v26 = vld [vmem:[#allocation35_spill] sm:$0xff]  ;;  %v3045_v53 = vld [vmem:[#allocation34_spill] sm:$0xff] }
 0x4e9   :  { %1024 = vst [vmem:[#allocation8 + $0x20] sm:$0xff] %v1022_v51  ;;  %1099 = vmatmul.mubr.f32.vlgmr.msra.gmra.mxu0 %v1022_v51  ;;  %1170 = vmatmul.mubr.f32.vlgmr.msra.gmra.mxu1 %v1022_v51  ;;  %v3046_v51 = vld [vmem:[#allocation37_spill] sm:$0xff] }
 0x4ea   :  { %1210 = vmatpush1.msra.mxu0 %v2435_v52  ;;  %1281 = vmatpush1.msra.mxu1 %v2438_v2 }
 0x4eb   :  { %1211 = vmatprep.subr.mxu0 %v2441_v56  ;;  %1282 = vmatprep.subr.mxu1 %v2444_v3 }
 0x4ec   :  { %1212 = vmatpush1.msra.mxu0 %v2447_v4  ;;  %1283 = vmatpush1.msra.mxu1 %v2450_v6 }
 0x4ed   :  { %1213 = vmatprep.subr.mxu0 %v2453_v7  ;;  %1284 = vmatprep.subr.mxu1 %v2456_v8 }
 0x4ee   :  { %1214 = vmatpush1.msra.mxu0 %v2459_v9  ;;  %1285 = vmatpush1.msra.mxu1 %v2462_v10 }
 0x4ef   :  { %1215 = vmatprep.subr.mxu0 %v2465_v11  ;;  %1286 = vmatprep.subr.mxu1 %v2468_v12 }
 0x4f0   :  { %1216 = vmatpush1.msra.mxu0 %v2471_v13  ;;  %1287 = vmatpush1.msra.mxu1 %v2474_v14 }
 0x4f1   :  { %1217 = vmatprep.subr.mxu0 %v2477_v15  ;;  %1288 = vmatprep.subr.mxu1 %v2480_v16 }
 0x4f2   :  { %1218 = vmatpush1.msra.mxu0 %v2483_v17  ;;  %1289 = vmatpush1.msra.mxu1 %v2486_v18 }
 0x4f3   :  { %1219 = vmatprep.subr.mxu0 %v2489_v19  ;;  %1290 = vmatprep.subr.mxu1 %v2492_v20 }
 0x4f4   :  { %1220 = vmatpush1.msra.mxu0 %v2495_v21  ;;  %1291 = vmatpush1.msra.mxu1 %v2498_v22 }
 0x4f5   :  { %1221 = vmatprep.subr.mxu0 %v2501_v24  ;;  %1292 = vmatprep.subr.mxu1 %v2504_v27 }
 0x4f6   :  { %1222 = vmatpush1.msra.mxu0 %v2507_v28  ;;  %1293 = vmatpush1.msra.mxu1 %v2510_v30 }
 0x4f7   :  { %1223 = vmatprep.subr.mxu0 %v2513_v32  ;;  %1294 = vmatprep.subr.mxu1 %v2516_v33 }
 0x4f8   :  { %1224 = vmatpush1.msra.mxu0 %v2519_v34  ;;  %1295 = vmatpush1.msra.mxu1 %v2522_v35 }
 0x4f9   :  { %1225 = vmatprep.subr.mxu0 %v2525_v36  ;;  %1296 = vmatprep.subr.mxu1 %v2528_v37 }
 0x4fa   :  { %1226 = vmatpush1.msra.mxu0 %v2531_v38  ;;  %1297 = vmatpush1.msra.mxu1 %v2534_v39 }
 0x4fb   :  { %1227 = vmatprep.subr.mxu0 %v2537_v40  ;;  %1298 = vmatprep.subr.mxu1 %v2540_v41 }
 0x4fc   :  { %1228 = vmatpush1.msra.mxu0 %v2543_v42  ;;  %1299 = vmatpush1.msra.mxu1 %v2546_v43 }
 0x4fd   :  { %1229 = vmatprep.subr.mxu0 %v2549_v57  ;;  %1300 = vmatprep.subr.mxu1 %v2552_v45 }
 0x4fe   :  { %1230 = vmatpush1.msra.mxu0 %v2555_v49  ;;  %1301 = vmatpush1.msra.mxu1 %v3027_v29 }
 0x4ff   :  { %1231 = vmatprep.subr.mxu0 %v3028_v31  ;;  %1302 = vmatprep.subr.mxu1 %v3029_v50  ;;  %v1028_v50 = vld [vmem:[#allocation2 + $0xb0] sm:$0xff] }
 0x500   :  { %1232 = vmatpush1.msra.mxu0 %v3030_v63  ;;  %1303 = vmatpush1.msra.mxu1 %v3031_v5  ;;  %v1032_v31 = vadd.f32 %v1028_v50, %v2203_v44 }
 0x501   :  { %1233 = vmatprep.subr.mxu0 %v3032_v46  ;;  %1304 = vmatprep.subr.mxu1 %v3033_v61  ;;  %v1029_v61 = vld [vmem:[#allocation2 + $0xb8] sm:$0xff] }
 0x502   :  { %1234 = vmatpush1.msra.mxu0 %v3034_v0  ;;  %1305 = vmatpush1.msra.mxu1 %v3035_v59  ;;  %v3052_v59 = vld [vmem:[#allocation40_spill] sm:$0xff] }
 0x503   :  { %1235 = vmatprep.subr.mxu0 %v3036_v47  ;;  %1306 = vmatprep.subr.mxu1 %v3037_v48  ;;  %v3047_v47 = vmov 0.0   ;;  %v3048_v48 = vld [vmem:[#allocation36_spill] sm:$0xff] }
 0x504   :  { %1236 = vmatpush1.msra.mxu0 %v3038_v62  ;;  %1307 = vmatpush1.msra.mxu1 %v3039_v1  ;;  %v3049_v1 = vld [vmem:[#allocation41_spill] sm:$0xff]  ;;  %v3051_v62 = vld [vmem:[#allocation39_spill] sm:$0xff] }
 0x505   :  { %1237 = vmatprep.subr.mxu0 %v3040_v60  ;;  %1308 = vmatprep.subr.mxu1 %v3041_v54  ;;  %v3050_v60 = vld [vmem:[#allocation16_spill] sm:$0xff]  ;;  %v1026_v54 = vld [vmem:[#allocation2 + $0xa0] sm:$0xff] }
 0x506   :  { %1238 = vmatpush1.msra.mxu0 %v3042_v23  ;;  %1309 = vmatpush1.msra.mxu1 %v3043_v25  ;;  %v1027_v23 = vld [vmem:[#allocation2 + $0xa8] sm:$0xff]  ;;  %v1030_v25 = vadd.f32 %v1026_v54, %v3051_v62 }
 0x507   :  { %1239 = vmatprep.subr.mxu0 %v3044_v26  ;;  %1310 = vmatprep.subr.mxu1 %v3045_v53  ;;  %v1031_v26 = vadd.f32 %v1027_v23, %v3052_v59 }
 0x508   :  { %1240 = vmatpush1.msra.mxu0 %v3046_v51  ;;  %1273 = vmatprep.mubr.f32.mxu0 %v3047_v47 }
 0x509   :  { %1311 = vmatpush1.msra.mxu1 %v3048_v48  ;;  %1344 = vmatprep.mubr.f32.mxu1 %v3047_v47  ;;  %v1033_v48 = vadd.f32 %v1029_v61, %v2953_v58 }
 0x50a   :  { %1384 = vmatprep.subr.mxu0 %v3049_v1  ;;  %1455 = vmatprep.subr.mxu1 %v3050_v60 }
 0x5a9   :  { %v1100_v0 = vpop.f32.mrf.mxu0  ;;  %v1171_v53 = vpop.f32.mrf.mxu1 }
 0x5aa   :  { %v1176_v51 = vadd.f32 %v1100_v0, %v1030_v25  ;;  %v1178_v54 = vadd.f32 %v1171_v53, %v1032_v31 }
 0x5ab   :  { %v1102_v46 = vpop.f32.mrf.mxu0  ;;  %v1173_v47 = vpop.f32.mrf.mxu1 }
 0x5ac   :  { %v1180_v5 = vmul.f32 0.5, %v1176_v51  ;;  %v1177_v63 = vadd.f32 %v1102_v46, %v1031_v26  ;;  %v1179_v60 = vadd.f32 %v1173_v47, %v1033_v48  ;;  %v1182_v23 = vmul.f32 0.5, %v1178_v54 }
 0x5ae   :  { %1658 = vtanh.f32 %v1180_v5  ;;  %v1181_v1 = vmul.f32 0.5, %v1177_v63 }
 0x5b0   :  { %1660 = vtanh.f32 %v1181_v1 }
 0x5b1   :  { %1662 = vtanh.f32 %v1179_v60 }
 0x5b2   :  { %1664 = vtanh.f32 %v1182_v23 }
 0x5bb   :  { %v1659_v59 = vpop.eup %1658 }
 0x5bc   :  { %v1186_v62 = vmul.f32 0.5, %v1659_v59 }
 0x5bd   :  { %v1661_v29 = vpop.eup %1660 }
 0x5be   :  { %v1189_v0 = vadd.f32 0.5, %v1186_v62  ;;  %v1187_v25 = vmul.f32 0.5, %v1661_v29  ;;  %v1663_v26 = vpop.eup %1662 }
 0x5bf   :  { %v1665_v47 = vpop.eup %1664 }
 0x5c0   :  { %v1190_v46 = vadd.f32 0.5, %v1187_v25  ;;  %v1194_v5 = vmul.f32 %v1663_v26, %v1189_v0  ;;  %v1188_v50 = vmul.f32 0.5, %v1665_v47 }
 0x5c2   :  { %v1193_v61 = vmul.f32 %v1190_v46, %v2630_v55  ;;  %v1191_v48 = vadd.f32 0.5, %v1188_v50 }
 0x5c4   :  { %v2704_v63 = vadd.f32 %v1194_v5, %v1193_v61 }
 0x5c6   :  { %1666 = vtanh.f32 %v2704_v63 }
 0x5d3   :  { %v1667_v31 = vpop.eup %1666 }
 0x5d4   :  { %v1197_v53 = vmul.f32 %v1667_v31, %v1191_v48  ;;  %v1376_v48 = vld [vmem:[#allocation2 + $0xe0] sm:$0xff]  ;;  %v1377_v31 = vld [vmem:[#allocation2 + $0xe8] sm:$0xff] }
 0x5d6   :  { %1199 = vst [vmem:[#allocation8 + $0x28] sm:$0xff] %v1197_v53  ;;  %1274 = vmatmul.mubr.f32.vlgmr.msra.gmra.mxu0 %v1197_v53  ;;  %1345 = vmatmul.mubr.f32.vlgmr.msra.gmra.mxu1 %v1197_v53 }
 0x5d7   :  { %1385 = vmatpush1.msra.mxu0 %v2435_v52  ;;  %1456 = vmatpush1.msra.mxu1 %v2438_v2  ;;  %v3053_v52 = vld [vmem:[#allocation17_spill] sm:$0xff]  ;;  %v3054_v2 = vld [vmem:[#allocation19_spill] sm:$0xff] }
 0x5d8   :  { %1386 = vmatprep.subr.mxu0 %v2441_v56  ;;  %1457 = vmatprep.subr.mxu1 %v2444_v3  ;;  %v3055_v56 = vld [vmem:[#allocation18_spill] sm:$0xff]  ;;  %v3056_v3 = vld [vmem:[#allocation21_spill] sm:$0xff] }
 0x5d9   :  { %1387 = vmatpush1.msra.mxu0 %v2447_v4  ;;  %1458 = vmatpush1.msra.mxu1 %v2450_v6  ;;  %v3057_v4 = vld [vmem:[#allocation20_spill] sm:$0xff]  ;;  %v3058_v6 = vld [vmem:[#allocation23_spill] sm:$0xff] }
 0x5da   :  { %1388 = vmatprep.subr.mxu0 %v2453_v7  ;;  %1459 = vmatprep.subr.mxu1 %v2456_v8  ;;  %v3059_v7 = vld [vmem:[#allocation22_spill] sm:$0xff]  ;;  %v3060_v8 = vld [vmem:[#allocation25_spill] sm:$0xff] }
 0x5db   :  { %1389 = vmatpush1.msra.mxu0 %v2459_v9  ;;  %1460 = vmatpush1.msra.mxu1 %v2462_v10  ;;  %v3061_v9 = vld [vmem:[#allocation24_spill] sm:$0xff]  ;;  %v3062_v10 = vld [vmem:[#allocation27_spill] sm:$0xff] }
 0x5dc   :  { %1390 = vmatprep.subr.mxu0 %v2465_v11  ;;  %1461 = vmatprep.subr.mxu1 %v2468_v12  ;;  %v3063_v11 = vld [vmem:[#allocation26_spill] sm:$0xff]  ;;  %v3064_v12 = vld [vmem:[#allocation29_spill] sm:$0xff] }
 0x5dd   :  { %1391 = vmatpush1.msra.mxu0 %v2471_v13  ;;  %1462 = vmatpush1.msra.mxu1 %v2474_v14  ;;  %v3065_v13 = vld [vmem:[#allocation28_spill] sm:$0xff]  ;;  %v3066_v14 = vld [vmem:[#allocation31_spill] sm:$0xff] }
 0x5de   :  { %1392 = vmatprep.subr.mxu0 %v2477_v15  ;;  %1463 = vmatprep.subr.mxu1 %v2480_v16  ;;  %v3067_v15 = vld [vmem:[#allocation30_spill] sm:$0xff]  ;;  %v3068_v16 = vld [vmem:[#allocation33_spill] sm:$0xff] }
 0x5df   :  { %1393 = vmatpush1.msra.mxu0 %v2483_v17  ;;  %1464 = vmatpush1.msra.mxu1 %v2486_v18  ;;  %v3069_v17 = vld [vmem:[#allocation32_spill] sm:$0xff]  ;;  %v3070_v18 = vld [vmem:[#allocation35_spill] sm:$0xff] }
 0x5e0   :  { %1394 = vmatprep.subr.mxu0 %v2489_v19  ;;  %1465 = vmatprep.subr.mxu1 %v2492_v20  ;;  %v3071_v19 = vld [vmem:[#allocation34_spill] sm:$0xff]  ;;  %v3072_v20 = vld [vmem:[#allocation37_spill] sm:$0xff] }
 0x5e1   :  { %1395 = vmatpush1.msra.mxu0 %v2495_v21  ;;  %1466 = vmatpush1.msra.mxu1 %v2498_v22  ;;  %v3073_v21 = vmov 0.0   ;;  %v3074_v22 = vld [vmem:[#allocation36_spill] sm:$0xff] }
 0x5e2   :  { %1396 = vmatprep.subr.mxu0 %v2501_v24  ;;  %1467 = vmatprep.subr.mxu1 %v2504_v27  ;;  %v1201_v24 = vld [vmem:[#allocation2 + $0xc0] sm:$0xff]  ;;  %v1202_v27 = vld [vmem:[#allocation2 + $0xc8] sm:$0xff] }
 0x5e3   :  { %1397 = vmatpush1.msra.mxu0 %v2507_v28  ;;  %1468 = vmatpush1.msra.mxu1 %v2510_v30  ;;  %v3075_v28 = vld [vmem:[#allocation39_spill] sm:$0xff] }
 0x5e4   :  { %1398 = vmatprep.subr.mxu0 %v2513_v32  ;;  %1469 = vmatprep.subr.mxu1 %v2516_v33  ;;  %v1205_v30 = vadd.f32 %v1201_v24, %v3075_v28  ;;  %v3076_v32 = vld [vmem:[#allocation40_spill] sm:$0xff]  ;;  %v1380_v53 = vadd.f32 %v1376_v48, %v3075_v28 }
 0x5e5   :  { %1399 = vmatpush1.msra.mxu0 %v2519_v34  ;;  %1470 = vmatpush1.msra.mxu1 %v2522_v35  ;;  %v1206_v33 = vadd.f32 %v1202_v27, %v3076_v32 }
 0x5e6   :  { %1400 = vmatprep.subr.mxu0 %v2525_v36  ;;  %1471 = vmatprep.subr.mxu1 %v2528_v37  ;;  %v1204_v36 = vld [vmem:[#allocation2 + $0xd8] sm:$0xff] }
 0x5e7   :  { %1401 = vmatpush1.msra.mxu0 %v2531_v38  ;;  %1472 = vmatpush1.msra.mxu1 %v2534_v39 }
 0x5e8   :  { %1402 = vmatprep.subr.mxu0 %v2537_v40  ;;  %1473 = vmatprep.subr.mxu1 %v2540_v41  ;;  %v1208_v41 = vadd.f32 %v1204_v36, %v2953_v58 }
 0x5e9   :  { %1403 = vmatpush1.msra.mxu0 %v2543_v42  ;;  %1474 = vmatpush1.msra.mxu1 %v2546_v43 }
 0x5ea   :  { %1404 = vmatprep.subr.mxu0 %v2549_v57  ;;  %1475 = vmatprep.subr.mxu1 %v2552_v45  ;;  %v1203_v57 = vld [vmem:[#allocation2 + $0xd0] sm:$0xff] }
 0x5eb   :  { %1405 = vmatpush1.msra.mxu0 %v2555_v49  ;;  %1476 = vmatpush1.msra.mxu1 %v3053_v52  ;;  %v1207_v49 = vadd.f32 %v1203_v57, %v2203_v44  ;;  %v1381_v52 = vadd.f32 %v1377_v31, %v3076_v32 }
 0x5ec   :  { %1406 = vmatprep.subr.mxu0 %v3054_v2  ;;  %1477 = vmatprep.subr.mxu1 %v3055_v56 }
 0x5ed   :  { %1407 = vmatpush1.msra.mxu0 %v3056_v3  ;;  %1478 = vmatpush1.msra.mxu1 %v3057_v4 }
 0x5ee   :  { %1408 = vmatprep.subr.mxu0 %v3058_v6  ;;  %1479 = vmatprep.subr.mxu1 %v3059_v7 }
 0x5ef   :  { %1409 = vmatpush1.msra.mxu0 %v3060_v8  ;;  %1480 = vmatpush1.msra.mxu1 %v3061_v9 }
 0x5f0   :  { %1410 = vmatprep.subr.mxu0 %v3062_v10  ;;  %1481 = vmatprep.subr.mxu1 %v3063_v11  ;;  %v1378_v11 = vld [vmem:[#allocation2 + $0xf0] sm:$0xff] }
 0x5f1   :  { %1411 = vmatpush1.msra.mxu0 %v3064_v12  ;;  %1482 = vmatpush1.msra.mxu1 %v3065_v13  ;;  %v1382_v13 = vadd.f32 %v1378_v11, %v2203_v44 }
 0x5f2   :  { %1412 = vmatprep.subr.mxu0 %v3066_v14  ;;  %1483 = vmatprep.subr.mxu1 %v3067_v15 }
 0x5f3   :  { %1413 = vmatpush1.msra.mxu0 %v3068_v16  ;;  %1484 = vmatpush1.msra.mxu1 %v3069_v17 }
 0x5f4   :  { %1414 = vmatprep.subr.mxu0 %v3070_v18  ;;  %1485 = vmatprep.subr.mxu1 %v3071_v19 }
 0x5f5   :  { %1415 = vmatpush1.msra.mxu0 %v3072_v20  ;;  %1448 = vmatprep.mubr.f32.mxu0 %v3073_v21 }
 0x5f6   :  { %1486 = vmatpush1.msra.mxu1 %v3074_v22  ;;  %1519 = vmatprep.mubr.f32.mxu1 %v3073_v21 }
 0x696   :  { %v1275_v34 = vpop.f32.mrf.mxu0  ;;  %v1346_v35 = vpop.f32.mrf.mxu1 }
 0x697   :  { %v1351_v37 = vadd.f32 %v1275_v34, %v1205_v30  ;;  %v1353_v55 = vadd.f32 %v1346_v35, %v1207_v49 }
 0x698   :  { %v1277_v38 = vpop.f32.mrf.mxu0  ;;  %v1348_v42 = vpop.f32.mrf.mxu1 }
 0x699   :  { %v1355_v39 = vmul.f32 0.5, %v1351_v37  ;;  %v1352_v40 = vadd.f32 %v1277_v38, %v1206_v33  ;;  %v1354_v45 = vadd.f32 %v1348_v42, %v1208_v41  ;;  %v1357_v29 = vmul.f32 0.5, %v1353_v55 }
 0x69b   :  { %1668 = vtanh.f32 %v1355_v39  ;;  %v1356_v43 = vmul.f32 0.5, %v1352_v40 }
 0x69d   :  { %1670 = vtanh.f32 %v1356_v43 }
 0x69e   :  { %1672 = vtanh.f32 %v1354_v45 }
 0x69f   :  { %1674 = vtanh.f32 %v1357_v29 }
 0x6a8   :  { %v1669_v59 = vpop.eup %1668 }
 0x6a9   :  { %v1361_v62 = vmul.f32 0.5, %v1669_v59 }
 0x6aa   :  { %v1671_v51 = vpop.eup %1670 }
 0x6ab   :  { %v1364_v1 = vadd.f32 0.5, %v1361_v62  ;;  %v1362_v60 = vmul.f32 0.5, %v1671_v51  ;;  %v1673_v23 = vpop.eup %1672 }
 0x6ac   :  { %v1675_v26 = vpop.eup %1674 }
 0x6ad   :  { %v1365_v54 = vadd.f32 0.5, %v1362_v60  ;;  %v1369_v25 = vmul.f32 %v1673_v23, %v1364_v1  ;;  %v1363_v61 = vmul.f32 0.5, %v1675_v26 }
 0x6af   :  { %v1368_v0 = vmul.f32 %v1365_v54, %v2704_v63  ;;  %v1366_v5 = vadd.f32 0.5, %v1363_v61  ;;  %v1379_v63 = vld [vmem:[#allocation2 + $0xf8] sm:$0xff] }
 0x6b0   :  { %v1383_v8 = vadd.f32 %v1379_v63, %v2953_v58 }
 0x6b1   :  { %v1370_v46 = vadd.f32 %v1369_v25, %v1368_v0 }
 0x6b3   :  { %1676 = vtanh.f32 %v1370_v46 }
 0x6c0   :  { %v1677_v47 = vpop.eup %1676 }
 0x6c1   :  { %v1372_v50 = vmul.f32 %v1677_v47, %v1366_v5 }
 0x6c3   :  { %1374 = vst [vmem:[#allocation8 + $0x30] sm:$0xff] %v1372_v50  ;;  %1449 = vmatmul.mubr.f32.vlgmr.msra.gmra.mxu0 %v1372_v50  ;;  %1520 = vmatmul.mubr.f32.vlgmr.msra.gmra.mxu1 %v1372_v50 }
 0x783   :  { %v1450_v2 = vpop.f32.mrf.mxu0  ;;  %v1521_v56 = vpop.f32.mrf.mxu1 }
 0x784   :  { %v1526_v3 = vadd.f32 %v1450_v2, %v1380_v53  ;;  %v1528_v14 = vadd.f32 %v1521_v56, %v1382_v13 }
 0x785   :  { %v1452_v4 = vpop.f32.mrf.mxu0  ;;  %v1523_v9 = vpop.f32.mrf.mxu1 }
 0x786   :  { %v1530_v6 = vmul.f32 0.5, %v1526_v3  ;;  %v1527_v7 = vadd.f32 %v1452_v4, %v1381_v52  ;;  %v1529_v12 = vadd.f32 %v1523_v9, %v1383_v8  ;;  %v1532_v15 = vmul.f32 0.5, %v1528_v14 }
 0x788   :  { %1678 = vtanh.f32 %v1530_v6  ;;  %v1531_v10 = vmul.f32 0.5, %v1527_v7 }
 0x78a   :  { %1680 = vtanh.f32 %v1531_v10 }
 0x78b   :  { %1682 = vtanh.f32 %v1529_v12 }
 0x78c   :  { %1684 = vtanh.f32 %v1532_v15 }
 0x795   :  { %v1679_v16 = vpop.eup %1678 }
 0x796   :  { %v1536_v17 = vmul.f32 0.5, %v1679_v16 }
 0x797   :  { %v1681_v18 = vpop.eup %1680 }
 0x798   :  { %v1539_v19 = vadd.f32 0.5, %v1536_v17  ;;  %v1537_v20 = vmul.f32 0.5, %v1681_v18  ;;  %v1683_v22 = vpop.eup %1682 }
 0x799   :  { %v1685_v28 = vpop.eup %1684 }
 0x79a   :  { %v1540_v21 = vadd.f32 0.5, %v1537_v20  ;;  %v1544_v24 = vmul.f32 %v1683_v22, %v1539_v19  ;;  %v1538_v30 = vmul.f32 0.5, %v1685_v28 }
 0x79c   :  { %v1543_v58 = vmul.f32 %v1540_v21, %v1370_v46  ;;  %v1541_v44 = vadd.f32 0.5, %v1538_v30 }
 0x79e   :  { %v1545_v27 = vadd.f32 %v1544_v24, %v1543_v58 }
 0x7a0   :  { %1686 = vtanh.f32 %v1545_v27  ;;  %1551 = vst [vmem:[#allocation11] sm:$0xff] %v1545_v27 }
 0x7ad   :  { %v1687_v32 = vpop.eup %1686 }
 0x7ae   :  { %v1547_v33 = vmul.f32 %v1687_v32, %v1541_v44 }
 0x7b0   :  { %1549 = vst [vmem:[#allocation8 + $0x38] sm:$0xff] %v1547_v33  ;;  %1550 = vst [vmem:[#allocation9] sm:$0xff] %v1547_v33 }
 0x7b1   :  { %1823 = shalt.err (!%p1820_p5)
}
 0x7b2   :  { %1573 = dma.vmem_to_hbm [thread:$0]  %s1571_s2, 128, %s2793_s4, [#allocation10]  }
 0x7b3   :  { %s1832_s16 = scalar_lea.vmem %s1558_s10, 1024  ;;  %p1837_p7 = scmp.lt.s32.totalorder %s1558_s10, %s1558_s10 }
 0x7b4   :  { %p1833_p6 = scmp.ne.s32.totalorder %s1558_s10, %s1832_s16  ;;  %p1838_p8 = scmp.lt.s32.totalorder %s1832_s16, %s1832_s16 }
 0x7b6   :  { %p1839_p9 = por %p1838_p8, %p1837_p7 }
 0x7b8   :  { %p1840_p10 = pnand %p1839_p9, %p1833_p6 }
 0x7ba   :  { %1843 = shalt.err (!%p1840_p10)
}
 0x7bb   :  { %s1889_s17 = smov 128   ;;  %s1890_s18 = smov 8  }
 0x7bc   :  { %1563 = dma.vmem_to_hbm [thread:$0]  %s1558_s10, 1024, %s2792_s3, [#allocation4], %s1889_s17, %s1889_s17, %s1890_s18  }
 0x7bd   :  { %s1852_s21 = scalar_lea.vmem %s1581_s12, 128  ;;  %p1857_p12 = scmp.lt.s32.totalorder %s1581_s12, %s1581_s12 }
 0x7be   :  { %p1853_p11 = scmp.ne.s32.totalorder %s1581_s12, %s1852_s21  ;;  %p1858_p13 = scmp.lt.s32.totalorder %s1852_s21, %s1852_s21 }
 0x7c0   :  { %p1859_p0 = por %p1858_p13, %p1857_p12 }
 0x7c2   :  { %p1860_p1 = pnand %p1859_p0, %p1853_p11 }
 0x7c4   :  { %1863 = shalt.err (!%p1860_p1)
}
 0x7c5   :  { %1583 = dma.vmem_to_hbm [thread:$0]  %s1581_s12, 128, %s2794_s5, [#allocation10]  }
 0x7c6   :  { %1876 = dma.done.wait [#allocation4], 1024  }
 0x7c7   :  { %1877 = vsyncadd [#allocation4], 4294966272 }
 0x7c8   :  { %1878 = dma.done.wait [#allocation10], 256  }
 0x7c9   :  { %1879 = vsyncadd [#allocation10], 4294967040 }
 0x7ca   :  { %1593 = vsyncpa [#allocation3], 1 }
 0x7cb   :  { %1594 = vsyncpa [#allocation6], 1 }
 0x7cc   :  { %1595 = vsyncpa [#allocation4], 1 }
 0x7cd   :  { %1596 = vsyncpa [#allocation10], 1 }

// kernel: tpu_custom_call.1
= control target key start
LH: loop header
LB: loop body
LE: loop exit
PB: predicated region body
PF: predicated region fallthrough
CT: control target
= control target key end

     0   :  { %11 = vsyncpa [#allocation3], 0  ;;  %s2789_s0 = inlined_call_operand.hbm [shape: f32[8,8,512], index: 0, kind: input, shape index: {}]   ;;  %s2790_s1 = inlined_call_operand.hbm [shape: f32[128,512], index: 1, kind: input, shape index: {}]   ;;  %s2791_s2 = inlined_call_operand.hbm [shape: f32[1,512], index: 2, kind: input, shape index: {}]   ;;  %s2792_s3 = inlined_call_operand.hbm [shape: f32[8,8,128], index: 3, kind: output, shape index: {0}]   ;;  %s2793_s4 = inlined_call_operand.hbm [shape: f32[8,128], index: 4, kind: output, shape index: {1}]   ;;  %s2794_s5 = inlined_call_operand.hbm [shape: f32[8,128], index: 5, kind: output, shape index: {2}]  }
   0x1   :  { %12 = vsyncpa [#allocation6], 0 }
   0x2   :  { %13 = vsyncpa [#allocation4], 0 }
   0x3   :  { %14 = vsyncpa [#allocation10], 0  ;;  %s1880_s18 = smov [#allocation5]   ;;  %s1881_s20 = smov [#allocation2]  }
   0x4   :  { %s32_s19 = sshll.u32 %s1880_s18, 4  ;;  %s20_s21 = sshll.u32 %s1881_s20, 4  ;;  %s33_s19 = int_to_ptr.vmem [resolvable:$true] %s32_s19  ;;  %s21_s21 = int_to_ptr.vmem [resolvable:$true] %s20_s21 }
   0x5   :  { %s1760_s22 = scalar_lea.vmem %s33_s19, 8192  ;;  %p1765_p1 = scmp.lt.s32.totalorder %s33_s19, %s33_s19 }
   0x6   :  { %p1761_p0 = scmp.ne.s32.totalorder %s33_s19, %s1760_s22  ;;  %p1766_p2 = scmp.lt.s32.totalorder %s1760_s22, %s1760_s22 }
   0x8   :  { %p1767_p3 = por %p1766_p2, %p1765_p1 }
   0xa   :  { %p1768_p4 = pnand %p1767_p3, %p1761_p0 }
   0xc   :  { %1771 = shalt.err (!%p1768_p4)
}
   0xd   :  { %s1882_s23 = smov 512   ;;  %s1883_s24 = smov 32  }
   0xe   :  { %38 = dma.hbm_to_vmem [thread:$0]  %s2790_s1, 8192, %s33_s19, [#allocation6], %s1882_s23, %s1882_s23, %s1883_s24  }
   0xf   :  { %s1780_s27 = scalar_lea.vmem %s21_s21, 4096  ;;  %p1785_p6 = scmp.lt.s32.totalorder %s21_s21, %s21_s21 }
  0x10   :  { %p1781_p5 = scmp.ne.s32.totalorder %s21_s21, %s1780_s27  ;;  %p1786_p7 = scmp.lt.s32.totalorder %s1780_s27, %s1780_s27 }
  0x12   :  { %p1787_p8 = por %p1786_p7, %p1785_p6 }
  0x14   :  { %p1788_p9 = pnand %p1787_p8, %p1781_p5 }
  0x16   :  { %1791 = shalt.err (!%p1788_p9)
}
  0x17   :  { %26 = dma.hbm_to_vmem [thread:$0]  %s2789_s0, 4096, %s21_s21, [#allocation3], %s1882_s23, %s1882_s23, %s1883_s24  }
  0x18   :  { %s1884_s30 = smov [#allocation7]  }
  0x19   :  { %s45_s6 = sshll.u32 %s1884_s30, 4  ;;  %s46_s6 = int_to_ptr.vmem [resolvable:$true] %s45_s6 }
  0x1a   :  { %s1800_s7 = scalar_lea.vmem %s46_s6, 64  ;;  %p1805_p11 = scmp.lt.s32.totalorder %s46_s6, %s46_s6 }
  0x1b   :  { %p1801_p10 = scmp.ne.s32.totalorder %s46_s6, %s1800_s7  ;;  %p1806_p12 = scmp.lt.s32.totalorder %s1800_s7, %s1800_s7 }
  0x1d   :  { %p1807_p13 = por %p1806_p12, %p1805_p11 }
  0x1f   :  { %p1808_p0 = pnand %p1807_p13, %p1801_p10 }
  0x21   :  { %1811 = shalt.err (!%p1808_p0)
}
  0x22   :  { %48 = dma.hbm_to_vmem [thread:$0]  %s2791_s2, 64, %s46_s6, [#allocation6]  }
  0x23   :  { %1872 = dma.done.wait [#allocation3], 4096  }
  0x24   :  { %1873 = vsyncadd [#allocation3], 4294963200 }
  0x25   :  { %1874 = dma.done.wait [#allocation6], 8256  }
  0x26   :  { %1875 = vsyncadd [#allocation6], 4294959040  ;;  %v2795_v0 = vmov 0.0   ;;  %v1932_v1 = vld [vmem:[#allocation5 + $0x1e8] sm:$0xff]  ;;  %v1934_v2 = vld [vmem:[#allocation5 + $0x1e0] sm:$0xff]  ;;  %s1886_s0 = smov [#allocation9]  }
  0x27   :  { %224 = vmatprep.mubr.f32.mxu0 %v2795_v0  ;;  %295 = vmatprep.mubr.f32.mxu1 %v2795_v0  ;;  %2900 = vst [vmem:[#allocation16_spill] sm:$0xff] %v1932_v1  ;;  %v1936_v3 = vld [vmem:[#allocation5 + $0x1c8] sm:$0xff]  ;;  %v1939_v4 = vld [vmem:[#allocation5 + $0x1c0] sm:$0xff]  ;;  %v1941_v5 = vld [vmem:[#allocation5 + $0x1f8] sm:$0xff]  ;;  %s1570_s2 = sshll.u32 %s1886_s0, 4  ;;  %s1887_s9 = smov [#allocation8]   ;;  %s1571_s2 = int_to_ptr.vmem [resolvable:$true] %s1570_s2 }
  0x28   :  { %160 = vmatprep.subr.mxu0 %v1932_v1  ;;  %2901 = vst [vmem:[#allocation17_spill] sm:$0xff] %v1941_v5  ;;  %v1944_v6 = vld [vmem:[#allocation5 + $0x1a8] sm:$0xff]  ;;  %231 = vmatprep.subr.mxu1 %v1941_v5  ;;  %v1947_v7 = vld [vmem:[#allocation5 + $0x1f0] sm:$0xff]  ;;  %v1950_v8 = vld [vmem:[#allocation5 + $0x1a0] sm:$0xff]  ;;  %s1557_s10 = sshll.u32 %s1887_s9, 4  ;;  %s1888_s11 = smov [#allocation11]   ;;  %s1558_s10 = int_to_ptr.vmem [resolvable:$true] %s1557_s10 }
  0x29   :  { %161 = vmatpush1.msra.mxu0 %v1934_v2  ;;  %232 = vmatpush1.msra.mxu1 %v1947_v7  ;;  %v1953_v9 = vld [vmem:[#allocation5 + $0x1d8] sm:$0xff]  ;;  %v1955_v10 = vld [vmem:[#allocation5 + $0x1d0] sm:$0xff]  ;;  %v1958_v11 = vld [vmem:[#allocation5 + $0x188] sm:$0xff]  ;;  %s1580_s12 = sshll.u32 %s1888_s11, 4  ;;  %s1812_s13 = scalar_lea.vmem %s1571_s2, 128  ;;  %s1581_s12 = int_to_ptr.vmem [resolvable:$true] %s1580_s12 }
  0x2a   :  { %162 = vmatprep.subr.mxu0 %v1936_v3  ;;  %233 = vmatprep.subr.mxu1 %v1953_v9  ;;  %v1961_v12 = vld [vmem:[#allocation5 + $0x1b8] sm:$0xff]  ;;  %v1964_v13 = vld [vmem:[#allocation5 + $0x180] sm:$0xff]  ;;  %v1967_v14 = vld [vmem:[#allocation5 + $0x1b0] sm:$0xff]  ;;  %p1813_p1 = scmp.ne.s32.totalorder %s1571_s2, %s1812_s13  ;;  %p1817_p2 = scmp.lt.s32.totalorder %s1571_s2, %s1571_s2 }
  0x2b   :  { %163 = vmatpush1.msra.mxu0 %v1939_v4  ;;  %234 = vmatpush1.msra.mxu1 %v1955_v10  ;;  %v1969_v15 = vld [vmem:[#allocation5 + $0x198] sm:$0xff]  ;;  %v1972_v16 = vld [vmem:[#allocation5 + $0x168] sm:$0xff]  ;;  %v1975_v17 = vld [vmem:[#allocation5 + $0x190] sm:$0xff]  ;;  %p1818_p3 = scmp.lt.s32.totalorder %s1812_s13, %s1812_s13 }
  0x2c   :  { %164 = vmatprep.subr.mxu0 %v1944_v6  ;;  %235 = vmatprep.subr.mxu1 %v1961_v12  ;;  %v1978_v18 = vld [vmem:[#allocation5 + $0x160] sm:$0xff]  ;;  %v1981_v19 = vld [vmem:[#allocation5 + $0x178] sm:$0xff]  ;;  %v1984_v20 = vld [vmem:[#allocation5 + $0x148] sm:$0xff] }
  0x2d   :  { %165 = vmatpush1.msra.mxu0 %v1950_v8  ;;  %236 = vmatpush1.msra.mxu1 %v1967_v14  ;;  %v1987_v21 = vld [vmem:[#allocation5 + $0x170] sm:$0xff]  ;;  %v1990_v22 = vld [vmem:[#allocation5 + $0x140] sm:$0xff]  ;;  %v1993_v23 = vld [vmem:[#allocation5 + $0x158] sm:$0xff]  ;;  %p1819_p4 = por %p1818_p3, %p1817_p2 }
  0x2e   :  { %166 = vmatprep.subr.mxu0 %v1958_v11  ;;  %237 = vmatprep.subr.mxu1 %v1969_v15  ;;  %v1996_v24 = vld [vmem:[#allocation5 + $0x128] sm:$0xff]  ;;  %v1999_v25 = vld [vmem:[#allocation5 + $0x150] sm:$0xff]  ;;  %v2002_v26 = vld [vmem:[#allocation5 + $0x120] sm:$0xff] }
  0x2f   :  { %167 = vmatpush1.msra.mxu0 %v1964_v13  ;;  %238 = vmatpush1.msra.mxu1 %v1975_v17  ;;  %v2005_v27 = vld [vmem:[#allocation5 + $0x138] sm:$0xff]  ;;  %v2008_v28 = vld [vmem:[#allocation5 + $0x108] sm:$0xff]  ;;  %v2011_v29 = vld [vmem:[#allocation5 + $0x130] sm:$0xff]  ;;  %p1820_p5 = pnand %p1819_p4, %p1813_p1 }
  0x30   :  { %168 = vmatprep.subr.mxu0 %v1972_v16  ;;  %239 = vmatprep.subr.mxu1 %v1981_v19  ;;  %v2014_v30 = vld [vmem:[#allocation5 + $0x100] sm:$0xff]  ;;  %v2017_v31 = vld [vmem:[#allocation5 + $0x118] sm:$0xff]  ;;  %v2020_v32 = vld [vmem:[#allocation5 + $0xe8] sm:$0xff] }
  0x31   :  { %169 = vmatpush1.msra.mxu0 %v1978_v18  ;;  %240 = vmatpush1.msra.mxu1 %v1987_v21  ;;  %v2023_v33 = vld [vmem:[#allocation5 + $0x110] sm:$0xff]  ;;  %v2026_v34 = vld [vmem:[#allocation5 + $0xe0] sm:$0xff]  ;;  %v2029_v35 = vld [vmem:[#allocation5 + $0xf8] sm:$0xff] }
  0x32   :  { %170 = vmatprep.subr.mxu0 %v1984_v20  ;;  %241 = vmatprep.subr.mxu1 %v1993_v23  ;;  %v2032_v36 = vld [vmem:[#allocation5 + $0xc8] sm:$0xff]  ;;  %v2035_v37 = vld [vmem:[#allocation5 + $0xf0] sm:$0xff]  ;;  %v2038_v38 = vld [vmem:[#allocation5 + $0xc0] sm:$0xff] }
  0x33   :  { %171 = vmatpush1.msra.mxu0 %v1990_v22  ;;  %242 = vmatpush1.msra.mxu1 %v1999_v25  ;;  %v2041_v39 = vld [vmem:[#allocation5 + $0xd8] sm:$0xff]  ;;  %v2044_v40 = vld [vmem:[#allocation5 + $0xa8] sm:$0xff]  ;;  %v2047_v41 = vld [vmem:[#allocation5 + $0xd0] sm:$0xff] }
  0x34   :  { %172 = vmatprep.subr.mxu0 %v1996_v24  ;;  %243 = vmatprep.subr.mxu1 %v2005_v27  ;;  %v2050_v42 = vld [vmem:[#allocation5 + $0xa0] sm:$0xff]  ;;  %v2053_v43 = vld [vmem:[#allocation5 + $0xb8] sm:$0xff]  ;;  %v2056_v44 = vld [vmem:[#allocation5 + $0x88] sm:$0xff] }
  0x35   :  { %173 = vmatpush1.msra.mxu0 %v2002_v26  ;;  %244 = vmatpush1.msra.mxu1 %v2011_v29  ;;  %2902 = vst [vmem:[#allocation18_spill] sm:$0xff] %v2056_v44  ;;  %v2059_v45 = vld [vmem:[#allocation5 + $0xb0] sm:$0xff]  ;;  %v2062_v46 = vld [vmem:[#allocation5 + $0x80] sm:$0xff]  ;;  %v2065_v47 = vld [vmem:[#allocation5 + $0x98] sm:$0xff] }
  0x36   :  { %174 = vmatprep.subr.mxu0 %v2008_v28  ;;  %245 = vmatprep.subr.mxu1 %v2017_v31  ;;  %2903 = vst [vmem:[#allocation19_spill] sm:$0xff] %v2059_v45  ;;  %2904 = vst [vmem:[#allocation20_spill] sm:$0xff] %v2062_v46  ;;  %v2068_v48 = vld [vmem:[#allocation5 + $0x68] sm:$0xff]  ;;  %v2071_v49 = vld [vmem:[#allocation5 + $0x90] sm:$0xff] }
  0x37   :  { %175 = vmatpush1.msra.mxu0 %v2014_v30  ;;  %246 = vmatpush1.msra.mxu1 %v2023_v33  ;;  %2905 = vst [vmem:[#allocation21_spill] sm:$0xff] %v2065_v47  ;;  %2906 = vst [vmem:[#allocation22_spill] sm:$0xff] %v2068_v48  ;;  %v2074_v50 = vld [vmem:[#allocation5 + $0x60] sm:$0xff]  ;;  %v2077_v51 = vld [vmem:[#allocation5 + $0x78] sm:$0xff] }
  0x38   :  { %176 = vmatprep.subr.mxu0 %v2020_v32  ;;  %247 = vmatprep.subr.mxu1 %v2029_v35  ;;  %2907 = vst [vmem:[#allocation23_spill] sm:$0xff] %v2071_v49  ;;  %2908 = vst [vmem:[#allocation24_spill] sm:$0xff] %v2074_v50  ;;  %v2080_v52 = vld [vmem:[#allocation5 + $0x48] sm:$0xff]  ;;  %v2083_v53 = vld [vmem:[#allocation5 + $0x70] sm:$0xff] }
  0x39   :  { %177 = vmatpush1.msra.mxu0 %v2026_v34  ;;  %248 = vmatpush1.msra.mxu1 %v2035_v37  ;;  %2909 = vst [vmem:[#allocation25_spill] sm:$0xff] %v2077_v51  ;;  %2910 = vst [vmem:[#allocation26_spill] sm:$0xff] %v2080_v52  ;;  %v2086_v54 = vld [vmem:[#allocation5 + $0x40] sm:$0xff]  ;;  %v2089_v55 = vld [vmem:[#allocation5 + $0x58] sm:$0xff] }
  0x3a   :  { %178 = vmatprep.subr.mxu0 %v2032_v36  ;;  %249 = vmatprep.subr.mxu1 %v2041_v39  ;;  %2911 = vst [vmem:[#allocation27_spill] sm:$0xff] %v2083_v53  ;;  %2912 = vst [vmem:[#allocation28_spill] sm:$0xff] %v2086_v54  ;;  %v2092_v56 = vld [vmem:[#allocation5 + $0x28] sm:$0xff]  ;;  %v2095_v57 = vld [vmem:[#allocation5 + $0x50] sm:$0xff] }
  0x3b   :  { %179 = vmatpush1.msra.mxu0 %v2038_v38  ;;  %250 = vmatpush1.msra.mxu1 %v2047_v41  ;;  %2913 = vst [vmem:[#allocation29_spill] sm:$0xff] %v2089_v55  ;;  %2914 = vst [vmem:[#allocation30_spill] sm:$0xff] %v2092_v56  ;;  %v2098_v58 = vld [vmem:[#allocation5 + $0x20] sm:$0xff]  ;;  %v2101_v59 = vld [vmem:[#allocation5 + $0x38] sm:$0xff] }
  0x3c   :  { %180 = vmatprep.subr.mxu0 %v2044_v40  ;;  %251 = vmatprep.subr.mxu1 %v2053_v43  ;;  %2915 = vst [vmem:[#allocation31_spill] sm:$0xff] %v2095_v57  ;;  %2916 = vst [vmem:[#allocation32_spill] sm:$0xff] %v2098_v58  ;;  %v2104_v60 = vld [vmem:[#allocation5 + $0x8] sm:$0xff]  ;;  %v2107_v61 = vld [vmem:[#allocation5 + $0x30] sm:$0xff] }
  0x3d   :  { %181 = vmatpush1.msra.mxu0 %v2050_v42  ;;  %252 = vmatpush1.msra.mxu1 %v2059_v45  ;;  %2917 = vst [vmem:[#allocation33_spill] sm:$0xff] %v2101_v59  ;;  %2918 = vst [vmem:[#allocation34_spill] sm:$0xff] %v2104_v60  ;;  %v2110_v62 = vld [vmem:[#allocation5] sm:$0xff]  ;;  %v2113_v63 = vld [vmem:[#allocation5 + $0x18] sm:$0xff] }
  0x3e   :  { %182 = vmatprep.subr.mxu0 %v2056_v44  ;;  %253 = vmatprep.subr.mxu1 %v2065_v47  ;;  %2919 = vst [vmem:[#allocation35_spill] sm:$0xff] %v2107_v61  ;;  %2920 = vst [vmem:[#allocation36_spill] sm:$0xff] %v2110_v62  ;;  %v2117_v0 = vld [vmem:[#allocation5 + $0x10] sm:$0xff] }
  0x3f   :  { %183 = vmatpush1.msra.mxu0 %v2062_v46  ;;  %254 = vmatpush1.msra.mxu1 %v2071_v49  ;;  %2921 = vst [vmem:[#allocation37_spill] sm:$0xff] %v2113_v63  ;;  %2922 = vst [vmem:[#allocation38_spill] sm:$0xff] %v2117_v0 }
  0x40   :  { %184 = vmatprep.subr.mxu0 %v2068_v48  ;;  %255 = vmatprep.subr.mxu1 %v2077_v51 }
  0x41   :  { %185 = vmatpush1.msra.mxu0 %v2074_v50  ;;  %256 = vmatpush1.msra.mxu1 %v2083_v53 }
  0x42   :  { %186 = vmatprep.subr.mxu0 %v2080_v52  ;;  %257 = vmatprep.subr.mxu1 %v2089_v55 }
  0x43   :  { %187 = vmatpush1.msra.mxu0 %v2086_v54  ;;  %258 = vmatpush1.msra.mxu1 %v2095_v57 }
  0x44   :  { %188 = vmatprep.subr.mxu0 %v2092_v56  ;;  %259 = vmatprep.subr.mxu1 %v2101_v59  ;;  %v2923_v56 = vmov 0.0  }
  0x45   :  { %189 = vmatpush1.msra.mxu0 %v2098_v58  ;;  %260 = vmatpush1.msra.mxu1 %v2107_v61 }
  0x46   :  { %190 = vmatprep.subr.mxu0 %v2104_v60  ;;  %261 = vmatprep.subr.mxu1 %v2113_v63 }
  0x47   :  { %191 = vmatpush1.msra.mxu0 %v2110_v62  ;;  %262 = vmatpush1.msra.mxu1 %v2117_v0 }
  0x48   :  { %225 = vmatmul.mubr.f32.vlgmr.msra.gmra.mxu0 %v2923_v56  ;;  %296 = vmatmul.mubr.f32.vlgmr.msra.gmra.mxu1 %v2923_v56 }
  0x49   :  { %334 = vmatprep.subr.mxu0 %v1932_v1  ;;  %405 = vmatprep.subr.mxu1 %v1941_v5 }
  0x4a   :  { %335 = vmatpush1.msra.mxu0 %v1934_v2  ;;  %406 = vmatpush1.msra.mxu1 %v1947_v7 }
  0x4b   :  { %336 = vmatprep.subr.mxu0 %v1936_v3  ;;  %407 = vmatprep.subr.mxu1 %v1953_v9 }
  0x4c   :  { %337 = vmatpush1.msra.mxu0 %v1939_v4  ;;  %408 = vmatpush1.msra.mxu1 %v1955_v10 }
  0x4d   :  { %338 = vmatprep.subr.mxu0 %v1944_v6  ;;  %409 = vmatprep.subr.mxu1 %v1961_v12 }
  0x4e   :  { %339 = vmatpush1.msra.mxu0 %v1950_v8  ;;  %410 = vmatpush1.msra.mxu1 %v1967_v14 }
  0x4f   :  { %340 = vmatprep.subr.mxu0 %v1958_v11  ;;  %411 = vmatprep.subr.mxu1 %v1969_v15 }
  0x50   :  { %341 = vmatpush1.msra.mxu0 %v1964_v13  ;;  %412 = vmatpush1.msra.mxu1 %v1975_v17 }
  0x51   :  { %342 = vmatprep.subr.mxu0 %v1972_v16  ;;  %413 = vmatprep.subr.mxu1 %v1981_v19 }
  0x52   :  { %343 = vmatpush1.msra.mxu0 %v1978_v18  ;;  %414 = vmatpush1.msra.mxu1 %v1987_v21 }
  0x53   :  { %344 = vmatprep.subr.mxu0 %v1984_v20  ;;  %415 = vmatprep.subr.mxu1 %v1993_v23 }
  0x54   :  { %345 = vmatpush1.msra.mxu0 %v1990_v22  ;;  %416 = vmatpush1.msra.mxu1 %v1999_v25 }
  0x55   :  { %346 = vmatprep.subr.mxu0 %v1996_v24  ;;  %417 = vmatprep.subr.mxu1 %v2005_v27 }
  0x56   :  { %347 = vmatpush1.msra.mxu0 %v2002_v26  ;;  %418 = vmatpush1.msra.mxu1 %v2011_v29 }
  0x57   :  { %348 = vmatprep.subr.mxu0 %v2008_v28  ;;  %419 = vmatprep.subr.mxu1 %v2017_v31 }
  0x58   :  { %349 = vmatpush1.msra.mxu0 %v2014_v30  ;;  %420 = vmatpush1.msra.mxu1 %v2023_v33 }
  0x59   :  { %350 = vmatprep.subr.mxu0 %v2020_v32  ;;  %421 = vmatprep.subr.mxu1 %v2029_v35 }
  0x5a   :  { %351 = vmatpush1.msra.mxu0 %v2026_v34  ;;  %422 = vmatpush1.msra.mxu1 %v2035_v37 }
  0x5b   :  { %352 = vmatprep.subr.mxu0 %v2032_v36  ;;  %423 = vmatprep.subr.mxu1 %v2041_v39 }
  0x5c   :  { %353 = vmatpush1.msra.mxu0 %v2038_v38  ;;  %424 = vmatpush1.msra.mxu1 %v2047_v41 }
  0x5d   :  { %354 = vmatprep.subr.mxu0 %v2044_v40  ;;  %425 = vmatprep.subr.mxu1 %v2053_v43 }
  0x5e   :  { %355 = vmatpush1.msra.mxu0 %v2050_v42  ;;  %426 = vmatpush1.msra.mxu1 %v2059_v45 }
  0x5f   :  { %356 = vmatprep.subr.mxu0 %v2056_v44  ;;  %427 = vmatprep.subr.mxu1 %v2065_v47  ;;  %v2924_v47 = vld [vmem:[#allocation30_spill] sm:$0xff] }
  0x60   :  { %357 = vmatpush1.msra.mxu0 %v2062_v46  ;;  %428 = vmatpush1.msra.mxu1 %v2071_v49 }
  0x61   :  { %358 = vmatprep.subr.mxu0 %v2068_v48  ;;  %429 = vmatprep.subr.mxu1 %v2077_v51 }
  0x62   :  { %359 = vmatpush1.msra.mxu0 %v2074_v50  ;;  %430 = vmatpush1.msra.mxu1 %v2083_v53 }
  0x63   :  { %360 = vmatprep.subr.mxu0 %v2080_v52  ;;  %431 = vmatprep.subr.mxu1 %v2089_v55  ;;  %v153_v55 = vld [vmem:[#allocation2 + $0x8] sm:$0xff] }
  0x64   :  { %361 = vmatpush1.msra.mxu0 %v2086_v54  ;;  %432 = vmatpush1.msra.mxu1 %v2095_v57  ;;  %v152_v54 = vld [vmem:[#allocation2] sm:$0xff] }
  0x65   :  { %362 = vmatprep.subr.mxu0 %v2924_v47  ;;  %433 = vmatprep.subr.mxu1 %v2101_v59  ;;  %v130_v59 = vlaneseq }
  0x66   :  { %363 = vmatpush1.msra.mxu0 %v2098_v58  ;;  %434 = vmatpush1.msra.mxu1 %v2107_v61  ;;  %v128_v61 = vld [vmem:[#allocation7] sm:$0xf] }
  0x67   :  { %364 = vmatprep.subr.mxu0 %v2104_v60  ;;  %435 = vmatprep.subr.mxu1 %v2113_v63  ;;  %v131_v58 = vshrl.u32 %v130_v59, 7 }
  0x68   :  { %365 = vmatpush1.msra.mxu0 %v2110_v62  ;;  %398 = vmatprep.mubr.f32.mxu0 %v2923_v56 }
  0x69   :  { %436 = vmatpush1.msra.mxu1 %v2117_v0  ;;  %469 = vmatprep.mubr.f32.mxu1 %v2923_v56  ;;  %v132_v47 = vsub.s32 0, %v131_v58  ;;  %v136_v57 = vsub.s32 1, %v131_v58  ;;  %v144_v63 = vsub.s32 3, %v131_v58  ;;  %v155_v56 = vld [vmem:[#allocation2 + $0x18] sm:$0xff]  ;;  %v140_v59 = vsub.s32 2, %v131_v58 }
  0x6a   :  { %509 = vmatprep.subr.mxu0 %v1932_v1  ;;  %580 = vmatprep.subr.mxu1 %v1941_v5 }
  0x6b   :  { %v2194_v60 = vrot.slane %v128_v61, %v132_v47  ;;  %v2196_v62 = vrot.slane %v128_v61, %v136_v57  ;;  %v2199_v52 = vrot.slane %v128_v61, %v144_v63  ;;  %v2203_v44 = vrot.slane %v128_v61, %v140_v59  ;;  %v154_v63 = vld [vmem:[#allocation2 + $0x10] sm:$0xff] }
  0x6d   :  { %2925 = vst [vmem:[#allocation39_spill] sm:$0xff] %v2194_v60  ;;  %2926 = vst [vmem:[#allocation40_spill] sm:$0xff] %v2196_v62  ;;  %v156_v0 = vadd.f32 %v152_v54, %v2194_v60  ;;  %v157_v1 = vadd.f32 %v153_v55, %v2196_v62  ;;  %v159_v51 = vadd.f32 %v155_v56, %v2199_v52 }
  0x6e   :  { %2927 = vst [vmem:[#allocation41_spill] sm:$0xff] %v2199_v52  ;;  %v158_v60 = vadd.f32 %v154_v63, %v2203_v44  ;;  %v2933_v63 = vld [vmem:[#allocation25_spill] sm:$0xff] }
 0x108   :  { %v226_v5 = vpop.f32.mrf.mxu0  ;;  %v297_v50 = vpop.f32.mrf.mxu1 }
 0x109   :  { %v302_v53 = vadd.f32 %v226_v5, %v156_v0  ;;  %v304_v55 = vadd.f32 %v297_v50, %v158_v60  ;;  %v2929_v60 = vld [vmem:[#allocation21_spill] sm:$0xff] }
 0x10a   :  { %v228_v47 = vpop.f32.mrf.mxu0  ;;  %v299_v46 = vpop.f32.mrf.mxu1 }
 0x10b   :  { %v306_v48 = vmul.f32 0.5, %v302_v53  ;;  %v303_v49 = vadd.f32 %v228_v47, %v157_v1  ;;  %v305_v54 = vadd.f32 %v299_v46, %v159_v51  ;;  %v308_v0 = vmul.f32 0.5, %v304_v55  ;;  %v2934_v55 = vld [vmem:[#allocation24_spill] sm:$0xff] }
 0x10d   :  { %1608 = vtanh.f32 %v306_v48  ;;  %v307_v57 = vmul.f32 0.5, %v303_v49 }
 0x10f   :  { %1610 = vtanh.f32 %v307_v57  ;;  %v2931_v57 = vld [vmem:[#allocation23_spill] sm:$0xff] }
 0x110   :  { %1612 = vtanh.f32 %v305_v54  ;;  %v2932_v54 = vld [vmem:[#allocation22_spill] sm:$0xff] }
 0x111   :  { %1614 = vtanh.f32 %v308_v0  ;;  %v2935_v0 = vld [vmem:[#allocation27_spill] sm:$0xff] }
 0x11a   :  { %v1609_v5 = vpop.eup %1608 }
 0x11b   :  { %v312_v58 = vmul.f32 0.5, %v1609_v5  ;;  %v2936_v5 = vld [vmem:[#allocation26_spill] sm:$0xff] }
 0x11c   :  { %v1611_v62 = vpop.eup %1610 }
 0x11d   :  { %v315_v56 = vadd.f32 0.5, %v312_v58  ;;  %v313_v52 = vmul.f32 0.5, %v1611_v62  ;;  %v1613_v1 = vpop.eup %1612  ;;  %v2930_v62 = vld [vmem:[#allocation20_spill] sm:$0xff]  ;;  %v2937_v58 = vld [vmem:[#allocation29_spill] sm:$0xff] }
 0x11e   :  { %v1615_v46 = vpop.eup %1614 }
 0x11f   :  { %v316_v53 = vadd.f32 0.5, %v313_v52  ;;  %v320_v49 = vmul.f32 %v1613_v1, %v315_v56  ;;  %v314_v51 = vmul.f32 0.5, %v1615_v46  ;;  %v2928_v52 = vld [vmem:[#allocation18_spill] sm:$0xff]  ;;  %v2938_v56 = vld [vmem:[#allocation28_spill] sm:$0xff]  ;;  %v2939_v1 = vld [vmem:[#allocation31_spill] sm:$0xff] }
 0x120   :  { %v2943_v46 = vld [vmem:[#allocation35_spill] sm:$0xff] }
 0x121   :  { %v319_v48 = vmul.f32 0.0, %v316_v53  ;;  %v317_v59 = vadd.f32 0.5, %v314_v51  ;;  %v2940_v53 = vld [vmem:[#allocation30_spill] sm:$0xff] }
 0x122   :  { %v2944_v51 = vld [vmem:[#allocation34_spill] sm:$0xff] }
 0x123   :  { %v2206_v61 = vadd.f32 %v320_v49, %v319_v48  ;;  %v2941_v48 = vld [vmem:[#allocation33_spill] sm:$0xff]  ;;  %v2942_v49 = vld [vmem:[#allocation32_spill] sm:$0xff] }
 0x125   :  { %1616 = vtanh.f32 %v2206_v61 }
 0x132   :  { %v1617_v47 = vpop.eup %1616 }
 0x133   :  { %v323_v50 = vmul.f32 %v1617_v47, %v317_v59  ;;  %v2945_v59 = vld [vmem:[#allocation37_spill] sm:$0xff]  ;;  %v2946_v47 = vld [vmem:[#allocation36_spill] sm:$0xff] }
 0x135   :  { %324 = vst [vmem:[#allocation8] sm:$0xff] %v323_v50  ;;  %399 = vmatmul.mubr.f32.vlgmr.msra.gmra.mxu0 %v323_v50  ;;  %470 = vmatmul.mubr.f32.vlgmr.msra.gmra.mxu1 %v323_v50  ;;  %v2947_v50 = vmov 0.0  }
 0x136   :  { %510 = vmatpush1.msra.mxu0 %v1934_v2  ;;  %581 = vmatpush1.msra.mxu1 %v1947_v7 }
 0x137   :  { %511 = vmatprep.subr.mxu0 %v1936_v3  ;;  %582 = vmatprep.subr.mxu1 %v1953_v9 }
 0x138   :  { %512 = vmatpush1.msra.mxu0 %v1939_v4  ;;  %583 = vmatpush1.msra.mxu1 %v1955_v10 }
 0x139   :  { %513 = vmatprep.subr.mxu0 %v1944_v6  ;;  %584 = vmatprep.subr.mxu1 %v1961_v12 }
 0x13a   :  { %514 = vmatpush1.msra.mxu0 %v1950_v8  ;;  %585 = vmatpush1.msra.mxu1 %v1967_v14 }
 0x13b   :  { %515 = vmatprep.subr.mxu0 %v1958_v11  ;;  %586 = vmatprep.subr.mxu1 %v1969_v15 }
 0x13c   :  { %516 = vmatpush1.msra.mxu0 %v1964_v13  ;;  %587 = vmatpush1.msra.mxu1 %v1975_v17 }
 0x13d   :  { %517 = vmatprep.subr.mxu0 %v1972_v16  ;;  %588 = vmatprep.subr.mxu1 %v1981_v19 }
 0x13e   :  { %518 = vmatpush1.msra.mxu0 %v1978_v18  ;;  %589 = vmatpush1.msra.mxu1 %v1987_v21 }
 0x13f   :  { %519 = vmatprep.subr.mxu0 %v1984_v20  ;;  %590 = vmatprep.subr.mxu1 %v1993_v23 }
 0x140   :  { %520 = vmatpush1.msra.mxu0 %v1990_v22  ;;  %591 = vmatpush1.msra.mxu1 %v1999_v25 }
 0x141   :  { %521 = vmatprep.subr.mxu0 %v1996_v24  ;;  %592 = vmatprep.subr.mxu1 %v2005_v27 }
 0x142   :  { %522 = vmatpush1.msra.mxu0 %v2002_v26  ;;  %593 = vmatpush1.msra.mxu1 %v2011_v29 }
 0x143   :  { %523 = vmatprep.subr.mxu0 %v2008_v28  ;;  %594 = vmatprep.subr.mxu1 %v2017_v31 }
 0x144   :  { %524 = vmatpush1.msra.mxu0 %v2014_v30  ;;  %595 = vmatpush1.msra.mxu1 %v2023_v33 }
 0x145   :  { %525 = vmatprep.subr.mxu0 %v2020_v32  ;;  %596 = vmatprep.subr.mxu1 %v2029_v35 }
 0x146   :  { %526 = vmatpush1.msra.mxu0 %v2026_v34  ;;  %597 = vmatpush1.msra.mxu1 %v2035_v37 }
 0x147   :  { %527 = vmatprep.subr.mxu0 %v2032_v36  ;;  %598 = vmatprep.subr.mxu1 %v2041_v39 }
 0x148   :  { %528 = vmatpush1.msra.mxu0 %v2038_v38  ;;  %599 = vmatpush1.msra.mxu1 %v2047_v41 }
 0x149   :  { %529 = vmatprep.subr.mxu0 %v2044_v40  ;;  %600 = vmatprep.subr.mxu1 %v2053_v43 }
 0x14a   :  { %530 = vmatpush1.msra.mxu0 %v2050_v42  ;;  %601 = vmatpush1.msra.mxu1 %v2059_v45 }
 0x14b   :  { %531 = vmatprep.subr.mxu0 %v2928_v52  ;;  %602 = vmatprep.subr.mxu1 %v2929_v60  ;;  %v328_v60 = vld [vmem:[#allocation2 + $0x30] sm:$0xff] }
 0x14c   :  { %532 = vmatpush1.msra.mxu0 %v2930_v62  ;;  %603 = vmatpush1.msra.mxu1 %v2931_v57  ;;  %v332_v52 = vadd.f32 %v328_v60, %v2203_v44 }
 0x14d   :  { %533 = vmatprep.subr.mxu0 %v2932_v54  ;;  %604 = vmatprep.subr.mxu1 %v2933_v63 }
 0x14e   :  { %534 = vmatpush1.msra.mxu0 %v2934_v55  ;;  %605 = vmatpush1.msra.mxu1 %v2935_v0  ;;  %v329_v55 = vld [vmem:[#allocation2 + $0x38] sm:$0xff] }
 0x14f   :  { %535 = vmatprep.subr.mxu0 %v2936_v5  ;;  %606 = vmatprep.subr.mxu1 %v2937_v58  ;;  %v2948_v58 = vld [vmem:[#allocation38_spill] sm:$0xff]  ;;  %v2952_v5 = vld [vmem:[#allocation40_spill] sm:$0xff] }
 0x150   :  { %536 = vmatpush1.msra.mxu0 %v2938_v56  ;;  %607 = vmatpush1.msra.mxu1 %v2939_v1  ;;  %v2949_v1 = vld [vmem:[#allocation16_spill] sm:$0xff]  ;;  %v2951_v56 = vld [vmem:[#allocation39_spill] sm:$0xff] }
 0x151   :  { %537 = vmatprep.subr.mxu0 %v2940_v53  ;;  %608 = vmatprep.subr.mxu1 %v2941_v48  ;;  %v2950_v53 = vld [vmem:[#allocation17_spill] sm:$0xff] }
 0x152   :  { %538 = vmatpush1.msra.mxu0 %v2942_v49  ;;  %609 = vmatpush1.msra.mxu1 %v2943_v46  ;;  %v326_v48 = vld [vmem:[#allocation2 + $0x20] sm:$0xff]  ;;  %v327_v49 = vld [vmem:[#allocation2 + $0x28] sm:$0xff] }
 0x153   :  { %539 = vmatprep.subr.mxu0 %v2944_v51  ;;  %610 = vmatprep.subr.mxu1 %v2945_v59  ;;  %v330_v46 = vadd.f32 %v326_v48, %v2951_v56  ;;  %v331_v51 = vadd.f32 %v327_v49, %v2952_v5 }
 0x154   :  { %540 = vmatpush1.msra.mxu0 %v2946_v47  ;;  %573 = vmatprep.mubr.f32.mxu0 %v2947_v50 }
 0x155   :  { %611 = vmatpush1.msra.mxu1 %v2948_v58  ;;  %644 = vmatprep.mubr.f32.mxu1 %v2947_v50  ;;  %v2953_v58 = vld [vmem:[#allocation41_spill] sm:$0xff] }
 0x156   :  { %684 = vmatprep.subr.mxu0 %v2949_v1  ;;  %755 = vmatprep.subr.mxu1 %v2950_v53  ;;  %v333_v62 = vadd.f32 %v329_v55, %v2953_v58 }
 0x1f5   :  { %v400_v0 = vpop.f32.mrf.mxu0  ;;  %v471_v59 = vpop.f32.mrf.mxu1 }
 0x1f6   :  { %v476_v47 = vadd.f32 %v400_v0, %v330_v46  ;;  %v478_v48 = vadd.f32 %v471_v59, %v332_v52  ;;  %v2958_v59 = vld [vmem:[#allocation23_spill] sm:$0xff] }
 0x1f7   :  { %v402_v63 = vpop.f32.mrf.mxu0  ;;  %v473_v50 = vpop.f32.mrf.mxu1 }
 0x1f8   :  { %v480_v54 = vmul.f32 0.5, %v476_v47  ;;  %v477_v57 = vadd.f32 %v402_v63, %v331_v51  ;;  %v479_v53 = vadd.f32 %v473_v50, %v333_v62  ;;  %v482_v49 = vmul.f32 0.5, %v478_v48  ;;  %v2959_v47 = vld [vmem:[#allocation22_spill] sm:$0xff]  ;;  %v2960_v50 = vld [vmem:[#allocation25_spill] sm:$0xff]  ;;  %v2961_v48 = vld [vmem:[#allocation24_spill] sm:$0xff] }
 0x1fa   :  { %1618 = vtanh.f32 %v480_v54  ;;  %v481_v1 = vmul.f32 0.5, %v477_v57 }
 0x1fc   :  { %1620 = vtanh.f32 %v481_v1 }
 0x1fd   :  { %1622 = vtanh.f32 %v479_v53 }
 0x1fe   :  { %1624 = vtanh.f32 %v482_v49  ;;  %v2962_v49 = vld [vmem:[#allocation27_spill] sm:$0xff] }
 0x207   :  { %v1619_v5 = vpop.eup %1618 }
 0x208   :  { %v486_v56 = vmul.f32 0.5, %v1619_v5  ;;  %v2956_v5 = vld [vmem:[#allocation21_spill] sm:$0xff] }
 0x209   :  { %v1621_v45 = vpop.eup %1620 }
 0x20a   :  { %v489_v0 = vadd.f32 0.5, %v486_v56  ;;  %v487_v46 = vmul.f32 0.5, %v1621_v45  ;;  %v1623_v51 = vpop.eup %1622  ;;  %v2954_v45 = vld [vmem:[#allocation19_spill] sm:$0xff]  ;;  %v2957_v56 = vld [vmem:[#allocation20_spill] sm:$0xff] }
 0x20b   :  { %v1625_v62 = vpop.eup %1624 }
 0x20c   :  { %v490_v63 = vadd.f32 0.5, %v487_v46  ;;  %v494_v54 = vmul.f32 %v1623_v51, %v489_v0  ;;  %v488_v60 = vmul.f32 0.5, %v1625_v62  ;;  %v2963_v0 = vld [vmem:[#allocation26_spill] sm:$0xff]  ;;  %v2964_v46 = vld [vmem:[#allocation29_spill] sm:$0xff]  ;;  %v2966_v51 = vld [vmem:[#allocation31_spill] sm:$0xff] }
 0x20d   :  { %v2969_v62 = vld [vmem:[#allocation32_spill] sm:$0xff] }
 0x20e   :  { %v493_v55 = vmul.f32 %v490_v63, %v2206_v61  ;;  %v491_v1 = vadd.f32 0.5, %v488_v60  ;;  %v2955_v61 = vld [vmem:[#allocation18_spill] sm:$0xff]  ;;  %v2965_v63 = vld [vmem:[#allocation28_spill] sm:$0xff]  ;;  %v2970_v60 = vld [vmem:[#allocation35_spill] sm:$0xff] }
 0x210   :  { %v2280_v57 = vadd.f32 %v494_v54, %v493_v55  ;;  %v2967_v55 = vld [vmem:[#allocation30_spill] sm:$0xff]  ;;  %v2968_v54 = vld [vmem:[#allocation33_spill] sm:$0xff] }
 0x212   :  { %1626 = vtanh.f32 %v2280_v57 }
 0x21f   :  { %v1627_v52 = vpop.eup %1626 }
 0x220   :  { %v497_v53 = vmul.f32 %v1627_v52, %v491_v1  ;;  %v2971_v1 = vld [vmem:[#allocation34_spill] sm:$0xff]  ;;  %v2972_v52 = vld [vmem:[#allocation37_spill] sm:$0xff] }
 0x222   :  { %499 = vst [vmem:[#allocation8 + $0x8] sm:$0xff] %v497_v53  ;;  %574 = vmatmul.mubr.f32.vlgmr.msra.gmra.mxu0 %v497_v53  ;;  %645 = vmatmul.mubr.f32.vlgmr.msra.gmra.mxu1 %v497_v53  ;;  %v2973_v53 = vld [vmem:[#allocation36_spill] sm:$0xff] }
 0x223   :  { %685 = vmatpush1.msra.mxu0 %v1934_v2  ;;  %756 = vmatpush1.msra.mxu1 %v1947_v7 }
 0x224   :  { %686 = vmatprep.subr.mxu0 %v1936_v3  ;;  %757 = vmatprep.subr.mxu1 %v1953_v9 }
 0x225   :  { %687 = vmatpush1.msra.mxu0 %v1939_v4  ;;  %758 = vmatpush1.msra.mxu1 %v1955_v10 }
 0x226   :  { %688 = vmatprep.subr.mxu0 %v1944_v6  ;;  %759 = vmatprep.subr.mxu1 %v1961_v12 }
 0x227   :  { %689 = vmatpush1.msra.mxu0 %v1950_v8  ;;  %760 = vmatpush1.msra.mxu1 %v1967_v14 }
 0x228   :  { %690 = vmatprep.subr.mxu0 %v1958_v11  ;;  %761 = vmatprep.subr.mxu1 %v1969_v15 }
 0x229   :  { %691 = vmatpush1.msra.mxu0 %v1964_v13  ;;  %762 = vmatpush1.msra.mxu1 %v1975_v17 }
 0x22a   :  { %692 = vmatprep.subr.mxu0 %v1972_v16  ;;  %763 = vmatprep.subr.mxu1 %v1981_v19 }
 0x22b   :  { %693 = vmatpush1.msra.mxu0 %v1978_v18  ;;  %764 = vmatpush1.msra.mxu1 %v1987_v21 }
 0x22c   :  { %694 = vmatprep.subr.mxu0 %v1984_v20  ;;  %765 = vmatprep.subr.mxu1 %v1993_v23 }
 0x22d   :  { %695 = vmatpush1.msra.mxu0 %v1990_v22  ;;  %766 = vmatpush1.msra.mxu1 %v1999_v25 }
 0x22e   :  { %696 = vmatprep.subr.mxu0 %v1996_v24  ;;  %767 = vmatprep.subr.mxu1 %v2005_v27 }
 0x22f   :  { %697 = vmatpush1.msra.mxu0 %v2002_v26  ;;  %768 = vmatpush1.msra.mxu1 %v2011_v29 }
 0x230   :  { %698 = vmatprep.subr.mxu0 %v2008_v28  ;;  %769 = vmatprep.subr.mxu1 %v2017_v31 }
 0x231   :  { %699 = vmatpush1.msra.mxu0 %v2014_v30  ;;  %770 = vmatpush1.msra.mxu1 %v2023_v33 }
 0x232   :  { %700 = vmatprep.subr.mxu0 %v2020_v32  ;;  %771 = vmatprep.subr.mxu1 %v2029_v35 }
 0x233   :  { %701 = vmatpush1.msra.mxu0 %v2026_v34  ;;  %772 = vmatpush1.msra.mxu1 %v2035_v37 }
 0x234   :  { %702 = vmatprep.subr.mxu0 %v2032_v36  ;;  %773 = vmatprep.subr.mxu1 %v2041_v39 }
 0x235   :  { %703 = vmatpush1.msra.mxu0 %v2038_v38  ;;  %774 = vmatpush1.msra.mxu1 %v2047_v41 }
 0x236   :  { %704 = vmatprep.subr.mxu0 %v2044_v40  ;;  %775 = vmatprep.subr.mxu1 %v2053_v43 }
 0x237   :  { %705 = vmatpush1.msra.mxu0 %v2050_v42  ;;  %776 = vmatpush1.msra.mxu1 %v2954_v45 }
 0x238   :  { %706 = vmatprep.subr.mxu0 %v2955_v61  ;;  %777 = vmatprep.subr.mxu1 %v2956_v5  ;;  %v503_v5 = vld [vmem:[#allocation2 + $0x50] sm:$0xff] }
 0x239   :  { %707 = vmatpush1.msra.mxu0 %v2957_v56  ;;  %778 = vmatpush1.msra.mxu1 %v2958_v59  ;;  %v507_v61 = vadd.f32 %v503_v5, %v2203_v44 }
 0x23a   :  { %708 = vmatprep.subr.mxu0 %v2959_v47  ;;  %779 = vmatprep.subr.mxu1 %v2960_v50  ;;  %v504_v50 = vld [vmem:[#allocation2 + $0x58] sm:$0xff] }
 0x23b   :  { %709 = vmatpush1.msra.mxu0 %v2961_v48  ;;  %780 = vmatpush1.msra.mxu1 %v2962_v49  ;;  %v2979_v49 = vld [vmem:[#allocation40_spill] sm:$0xff] }
 0x23c   :  { %710 = vmatprep.subr.mxu0 %v2963_v0  ;;  %781 = vmatprep.subr.mxu1 %v2964_v46  ;;  %v2974_v0 = vmov 0.0   ;;  %v2975_v46 = vld [vmem:[#allocation38_spill] sm:$0xff] }
 0x23d   :  { %711 = vmatpush1.msra.mxu0 %v2965_v63  ;;  %782 = vmatpush1.msra.mxu1 %v2966_v51  ;;  %v2976_v51 = vld [vmem:[#allocation16_spill] sm:$0xff]  ;;  %v2978_v63 = vld [vmem:[#allocation39_spill] sm:$0xff] }
 0x23e   :  { %712 = vmatprep.subr.mxu0 %v2967_v55  ;;  %783 = vmatprep.subr.mxu1 %v2968_v54  ;;  %v2977_v55 = vld [vmem:[#allocation17_spill] sm:$0xff] }
 0x23f   :  { %713 = vmatpush1.msra.mxu0 %v2969_v62  ;;  %784 = vmatpush1.msra.mxu1 %v2970_v60  ;;  %v501_v54 = vld [vmem:[#allocation2 + $0x40] sm:$0xff]  ;;  %v502_v62 = vld [vmem:[#allocation2 + $0x48] sm:$0xff] }
 0x240   :  { %714 = vmatprep.subr.mxu0 %v2971_v1  ;;  %785 = vmatprep.subr.mxu1 %v2972_v52  ;;  %v505_v60 = vadd.f32 %v501_v54, %v2978_v63  ;;  %v506_v1 = vadd.f32 %v502_v62, %v2979_v49 }
 0x241   :  { %715 = vmatpush1.msra.mxu0 %v2973_v53  ;;  %748 = vmatprep.mubr.f32.mxu0 %v2974_v0 }
 0x242   :  { %786 = vmatpush1.msra.mxu1 %v2975_v46  ;;  %819 = vmatprep.mubr.f32.mxu1 %v2974_v0  ;;  %v508_v46 = vadd.f32 %v504_v50, %v2953_v58 }
 0x243   :  { %859 = vmatprep.subr.mxu0 %v2976_v51  ;;  %930 = vmatprep.subr.mxu1 %v2977_v55 }
 0x2e2   :  { %v575_v48 = vpop.f32.mrf.mxu0  ;;  %v646_v52 = vpop.f32.mrf.mxu1 }
 0x2e3   :  { %v651_v53 = vadd.f32 %v575_v48, %v505_v60  ;;  %v653_v54 = vadd.f32 %v646_v52, %v507_v61 }
 0x2e4   :  { %v577_v47 = vpop.f32.mrf.mxu0  ;;  %v648_v0 = vpop.f32.mrf.mxu1 }
 0x2e5   :  { %v655_v59 = vmul.f32 0.5, %v651_v53  ;;  %v652_v56 = vadd.f32 %v577_v47, %v506_v1  ;;  %v654_v55 = vadd.f32 %v648_v0, %v508_v46  ;;  %v657_v62 = vmul.f32 0.5, %v653_v54 }
 0x2e7   :  { %1628 = vtanh.f32 %v655_v59  ;;  %v656_v51 = vmul.f32 0.5, %v652_v56 }
 0x2e9   :  { %1630 = vtanh.f32 %v656_v51 }
 0x2ea   :  { %1632 = vtanh.f32 %v654_v55 }
 0x2eb   :  { %1634 = vtanh.f32 %v657_v62 }
 0x2f4   :  { %v1629_v49 = vpop.eup %1628 }
 0x2f5   :  { %v661_v63 = vmul.f32 0.5, %v1629_v49 }
 0x2f6   :  { %v1631_v45 = vpop.eup %1630 }
 0x2f7   :  { %v664_v48 = vadd.f32 0.5, %v661_v63  ;;  %v662_v60 = vmul.f32 0.5, %v1631_v45  ;;  %v1633_v1 = vpop.eup %1632 }
 0x2f8   :  { %v1635_v0 = vpop.eup %1634 }
 0x2f9   :  { %v665_v47 = vadd.f32 0.5, %v662_v60  ;;  %v669_v59 = vmul.f32 %v1633_v1, %v664_v48  ;;  %v663_v5 = vmul.f32 0.5, %v1635_v0 }
 0x2fb   :  { %v668_v50 = vmul.f32 %v665_v47, %v2280_v57  ;;  %v666_v46 = vadd.f32 0.5, %v663_v5 }
 0x2fd   :  { %v2354_v56 = vadd.f32 %v669_v59, %v668_v50 }
 0x2ff   :  { %1636 = vtanh.f32 %v2354_v56 }
 0x30c   :  { %v1637_v61 = vpop.eup %1636 }
 0x30d   :  { %v672_v52 = vmul.f32 %v1637_v61, %v666_v46 }
 0x30f   :  { %674 = vst [vmem:[#allocation8 + $0x10] sm:$0xff] %v672_v52  ;;  %749 = vmatmul.mubr.f32.vlgmr.msra.gmra.mxu0 %v672_v52  ;;  %820 = vmatmul.mubr.f32.vlgmr.msra.gmra.mxu1 %v672_v52  ;;  %v2435_v52 = vld [vmem:[#allocation5 + $0x1e0] sm:$0xff] }
 0x310   :  { %860 = vmatpush1.msra.mxu0 %v1934_v2  ;;  %931 = vmatpush1.msra.mxu1 %v1947_v7  ;;  %v2980_v2 = vld [vmem:[#allocation19_spill] sm:$0xff] }
 0x311   :  { %861 = vmatprep.subr.mxu0 %v1936_v3  ;;  %932 = vmatprep.subr.mxu1 %v1953_v9  ;;  %v2981_v3 = vld [vmem:[#allocation18_spill] sm:$0xff]  ;;  %v2984_v7 = vld [vmem:[#allocation23_spill] sm:$0xff]  ;;  %v2986_v9 = vld [vmem:[#allocation25_spill] sm:$0xff] }
 0x312   :  { %862 = vmatpush1.msra.mxu0 %v1939_v4  ;;  %933 = vmatpush1.msra.mxu1 %v1955_v10  ;;  %v2982_v4 = vld [vmem:[#allocation21_spill] sm:$0xff]  ;;  %v2987_v10 = vld [vmem:[#allocation24_spill] sm:$0xff] }
 0x313   :  { %863 = vmatprep.subr.mxu0 %v1944_v6  ;;  %934 = vmatprep.subr.mxu1 %v1961_v12  ;;  %v2983_v6 = vld [vmem:[#allocation20_spill] sm:$0xff]  ;;  %v2989_v12 = vld [vmem:[#allocation26_spill] sm:$0xff] }
 0x314   :  { %864 = vmatpush1.msra.mxu0 %v1950_v8  ;;  %935 = vmatpush1.msra.mxu1 %v1967_v14  ;;  %v2985_v8 = vld [vmem:[#allocation22_spill] sm:$0xff]  ;;  %v2991_v14 = vld [vmem:[#allocation28_spill] sm:$0xff] }
 0x315   :  { %865 = vmatprep.subr.mxu0 %v1958_v11  ;;  %936 = vmatprep.subr.mxu1 %v1969_v15  ;;  %v2988_v11 = vld [vmem:[#allocation27_spill] sm:$0xff] }
 0x316   :  { %866 = vmatpush1.msra.mxu0 %v1964_v13  ;;  %937 = vmatpush1.msra.mxu1 %v1975_v17  ;;  %v2990_v13 = vld [vmem:[#allocation29_spill] sm:$0xff]  ;;  %v2992_v15 = vld [vmem:[#allocation31_spill] sm:$0xff] }
 0x317   :  { %867 = vmatprep.subr.mxu0 %v1972_v16  ;;  %938 = vmatprep.subr.mxu1 %v1981_v19  ;;  %v2993_v16 = vld [vmem:[#allocation30_spill] sm:$0xff]  ;;  %v2994_v17 = vld [vmem:[#allocation33_spill] sm:$0xff]  ;;  %v2996_v19 = vld [vmem:[#allocation35_spill] sm:$0xff] }
 0x318   :  { %868 = vmatpush1.msra.mxu0 %v1978_v18  ;;  %939 = vmatpush1.msra.mxu1 %v1987_v21  ;;  %v2995_v18 = vld [vmem:[#allocation32_spill] sm:$0xff]  ;;  %v2998_v21 = vld [vmem:[#allocation37_spill] sm:$0xff] }
 0x319   :  { %869 = vmatprep.subr.mxu0 %v1984_v20  ;;  %940 = vmatprep.subr.mxu1 %v1993_v23  ;;  %v2997_v20 = vld [vmem:[#allocation34_spill] sm:$0xff]  ;;  %v3000_v23 = vmov 0.0  }
 0x31a   :  { %870 = vmatpush1.msra.mxu0 %v1990_v22  ;;  %941 = vmatpush1.msra.mxu1 %v1999_v25  ;;  %v2999_v22 = vld [vmem:[#allocation36_spill] sm:$0xff]  ;;  %v2421_v25 = vld [vmem:[#allocation5 + $0x1e8] sm:$0xff] }
 0x31b   :  { %871 = vmatprep.subr.mxu0 %v1996_v24  ;;  %942 = vmatprep.subr.mxu1 %v2005_v27  ;;  %v3001_v24 = vld [vmem:[#allocation38_spill] sm:$0xff]  ;;  %3002 = vst [vmem:[#allocation41_spill] sm:$0xff] %v2421_v25 }
 0x31c   :  { %872 = vmatpush1.msra.mxu0 %v2002_v26  ;;  %943 = vmatpush1.msra.mxu1 %v2011_v29  ;;  %v2424_v26 = vld [vmem:[#allocation5 + $0x1f8] sm:$0xff]  ;;  %v676_v27 = vld [vmem:[#allocation2 + $0x60] sm:$0xff]  ;;  %v3004_v29 = vld [vmem:[#allocation39_spill] sm:$0xff] }
 0x31d   :  { %873 = vmatprep.subr.mxu0 %v2008_v28  ;;  %944 = vmatprep.subr.mxu1 %v2017_v31  ;;  %3003 = vst [vmem:[#allocation16_spill] sm:$0xff] %v2424_v26  ;;  %v677_v28 = vld [vmem:[#allocation2 + $0x68] sm:$0xff]  ;;  %v3005_v31 = vld [vmem:[#allocation40_spill] sm:$0xff] }
 0x31e   :  { %874 = vmatpush1.msra.mxu0 %v2014_v30  ;;  %945 = vmatpush1.msra.mxu1 %v2023_v33  ;;  %v680_v30 = vadd.f32 %v676_v27, %v3004_v29  ;;  %v2504_v27 = vld [vmem:[#allocation5 + $0x138] sm:$0xff] }
 0x31f   :  { %875 = vmatprep.subr.mxu0 %v2020_v32  ;;  %946 = vmatprep.subr.mxu1 %v2029_v35  ;;  %v681_v32 = vadd.f32 %v677_v28, %v3005_v31  ;;  %v679_v35 = vld [vmem:[#allocation2 + $0x78] sm:$0xff]  ;;  %v2507_v28 = vld [vmem:[#allocation5 + $0x120] sm:$0xff] }
 0x320   :  { %876 = vmatpush1.msra.mxu0 %v2026_v34  ;;  %947 = vmatpush1.msra.mxu1 %v2035_v37 }
 0x321   :  { %877 = vmatprep.subr.mxu0 %v2032_v36  ;;  %948 = vmatprep.subr.mxu1 %v2041_v39 }
 0x322   :  { %878 = vmatpush1.msra.mxu0 %v2038_v38  ;;  %949 = vmatpush1.msra.mxu1 %v2047_v41 }
 0x323   :  { %879 = vmatprep.subr.mxu0 %v2044_v40  ;;  %950 = vmatprep.subr.mxu1 %v2053_v43  ;;  %v683_v40 = vadd.f32 %v679_v35, %v2953_v58  ;;  %v678_v43 = vld [vmem:[#allocation2 + $0x70] sm:$0xff] }
 0x324   :  { %880 = vmatpush1.msra.mxu0 %v2050_v42  ;;  %951 = vmatpush1.msra.mxu1 %v2980_v2  ;;  %v682_v45 = vadd.f32 %v678_v43, %v2203_v44  ;;  %v2438_v2 = vld [vmem:[#allocation5 + $0x1f0] sm:$0xff] }
 0x325   :  { %881 = vmatprep.subr.mxu0 %v2981_v3  ;;  %952 = vmatprep.subr.mxu1 %v2982_v4  ;;  %v2444_v3 = vld [vmem:[#allocation5 + $0x1d8] sm:$0xff]  ;;  %v2447_v4 = vld [vmem:[#allocation5 + $0x1c0] sm:$0xff]  ;;  %v2522_v35 = vld [vmem:[#allocation5 + $0x110] sm:$0xff] }
 0x326   :  { %882 = vmatpush1.msra.mxu0 %v2983_v6  ;;  %953 = vmatpush1.msra.mxu1 %v2984_v7  ;;  %v2450_v6 = vld [vmem:[#allocation5 + $0x1d0] sm:$0xff]  ;;  %v2453_v7 = vld [vmem:[#allocation5 + $0x1a8] sm:$0xff] }
 0x327   :  { %883 = vmatprep.subr.mxu0 %v2985_v8  ;;  %954 = vmatprep.subr.mxu1 %v2986_v9  ;;  %v2456_v8 = vld [vmem:[#allocation5 + $0x1b8] sm:$0xff]  ;;  %v2459_v9 = vld [vmem:[#allocation5 + $0x1a0] sm:$0xff]  ;;  %v2546_v43 = vld [vmem:[#allocation5 + $0xd0] sm:$0xff] }
 0x328   :  { %884 = vmatpush1.msra.mxu0 %v2987_v10  ;;  %955 = vmatpush1.msra.mxu1 %v2988_v11  ;;  %v2462_v10 = vld [vmem:[#allocation5 + $0x1b0] sm:$0xff]  ;;  %v2465_v11 = vld [vmem:[#allocation5 + $0x188] sm:$0xff] }
 0x329   :  { %885 = vmatprep.subr.mxu0 %v2989_v12  ;;  %956 = vmatprep.subr.mxu1 %v2990_v13  ;;  %v2468_v12 = vld [vmem:[#allocation5 + $0x198] sm:$0xff]  ;;  %v2471_v13 = vld [vmem:[#allocation5 + $0x180] sm:$0xff] }
 0x32a   :  { %886 = vmatpush1.msra.mxu0 %v2991_v14  ;;  %957 = vmatpush1.msra.mxu1 %v2992_v15  ;;  %v2474_v14 = vld [vmem:[#allocation5 + $0x190] sm:$0xff]  ;;  %v2477_v15 = vld [vmem:[#allocation5 + $0x168] sm:$0xff] }
 0x32b   :  { %887 = vmatprep.subr.mxu0 %v2993_v16  ;;  %958 = vmatprep.subr.mxu1 %v2994_v17  ;;  %v2480_v16 = vld [vmem:[#allocation5 + $0x178] sm:$0xff]  ;;  %v2483_v17 = vld [vmem:[#allocation5 + $0x160] sm:$0xff] }
 0x32c   :  { %888 = vmatpush1.msra.mxu0 %v2995_v18  ;;  %959 = vmatpush1.msra.mxu1 %v2996_v19  ;;  %v2486_v18 = vld [vmem:[#allocation5 + $0x170] sm:$0xff]  ;;  %v2489_v19 = vld [vmem:[#allocation5 + $0x148] sm:$0xff] }
 0x32d   :  { %889 = vmatprep.subr.mxu0 %v2997_v20  ;;  %960 = vmatprep.subr.mxu1 %v2998_v21  ;;  %v2492_v20 = vld [vmem:[#allocation5 + $0x158] sm:$0xff]  ;;  %v2495_v21 = vld [vmem:[#allocation5 + $0x140] sm:$0xff] }
 0x32e   :  { %890 = vmatpush1.msra.mxu0 %v2999_v22  ;;  %923 = vmatprep.mubr.f32.mxu0 %v3000_v23  ;;  %v2498_v22 = vld [vmem:[#allocation5 + $0x150] sm:$0xff] }
 0x32f   :  { %961 = vmatpush1.msra.mxu1 %v3001_v24  ;;  %994 = vmatprep.mubr.f32.mxu1 %v3000_v23  ;;  %v2501_v24 = vld [vmem:[#allocation5 + $0x128] sm:$0xff] }
 0x330   :  { %1034 = vmatprep.subr.mxu0 %v2421_v25  ;;  %1105 = vmatprep.subr.mxu1 %v2424_v26 }
 0x3cf   :  { %v750_v33 = vpop.f32.mrf.mxu0  ;;  %v821_v34 = vpop.f32.mrf.mxu1 }
 0x3d0   :  { %v826_v36 = vadd.f32 %v750_v33, %v680_v30  ;;  %v828_v49 = vadd.f32 %v821_v34, %v682_v45  ;;  %v2510_v30 = vld [vmem:[#allocation5 + $0x130] sm:$0xff]  ;;  %v2516_v33 = vld [vmem:[#allocation5 + $0x118] sm:$0xff]  ;;  %v2519_v34 = vld [vmem:[#allocation5 + $0x100] sm:$0xff] }
 0x3d1   :  { %v752_v37 = vpop.f32.mrf.mxu0  ;;  %v823_v41 = vpop.f32.mrf.mxu1  ;;  %v2552_v45 = vld [vmem:[#allocation5 + $0xb8] sm:$0xff] }
 0x3d2   :  { %v830_v38 = vmul.f32 0.5, %v826_v36  ;;  %v827_v39 = vadd.f32 %v752_v37, %v681_v32  ;;  %v829_v57 = vadd.f32 %v823_v41, %v683_v40  ;;  %v832_v63 = vmul.f32 0.5, %v828_v49  ;;  %v2513_v32 = vld [vmem:[#allocation5 + $0x108] sm:$0xff]  ;;  %v2528_v37 = vld [vmem:[#allocation5 + $0xf8] sm:$0xff]  ;;  %v2555_v49 = vld [vmem:[#allocation5 + $0xa0] sm:$0xff] }
 0x3d3   :  { %v2525_v36 = vld [vmem:[#allocation5 + $0xe8] sm:$0xff]  ;;  %v2540_v41 = vld [vmem:[#allocation5 + $0xd8] sm:$0xff] }
 0x3d4   :  { %1638 = vtanh.f32 %v830_v38  ;;  %v831_v42 = vmul.f32 0.5, %v827_v39  ;;  %v2531_v38 = vld [vmem:[#allocation5 + $0xe0] sm:$0xff]  ;;  %v2534_v39 = vld [vmem:[#allocation5 + $0xf0] sm:$0xff]  ;;  %v2537_v40 = vld [vmem:[#allocation5 + $0xc8] sm:$0xff] }
 0x3d6   :  { %1640 = vtanh.f32 %v831_v42  ;;  %v2543_v42 = vld [vmem:[#allocation5 + $0xc0] sm:$0xff] }
 0x3d7   :  { %1642 = vtanh.f32 %v829_v57  ;;  %v2549_v57 = vld [vmem:[#allocation5 + $0xa8] sm:$0xff] }
 0x3d8   :  { %1644 = vtanh.f32 %v832_v63  ;;  %v2558_v63 = vld [vmem:[#allocation5 + $0xb0] sm:$0xff] }
 0x3d9   :  { %3006 = vst [vmem:[#allocation17_spill] sm:$0xff] %v2558_v63 }
 0x3e1   :  { %v1639_v53 = vpop.eup %1638 }
 0x3e2   :  { %v836_v51 = vmul.f32 0.5, %v1639_v53  ;;  %v2561_v53 = vld [vmem:[#allocation5 + $0x88] sm:$0xff] }
 0x3e3   :  { %v1641_v55 = vpop.eup %1640  ;;  %3007 = vst [vmem:[#allocation19_spill] sm:$0xff] %v2561_v53 }
 0x3e4   :  { %v839_v54 = vadd.f32 0.5, %v836_v51  ;;  %v837_v62 = vmul.f32 0.5, %v1641_v55  ;;  %v1643_v60 = vpop.eup %1642  ;;  %v2564_v51 = vld [vmem:[#allocation5 + $0x98] sm:$0xff]  ;;  %v2567_v55 = vld [vmem:[#allocation5 + $0x80] sm:$0xff] }
 0x3e5   :  { %v1645_v59 = vpop.eup %1644  ;;  %3008 = vst [vmem:[#allocation18_spill] sm:$0xff] %v2564_v51  ;;  %3009 = vst [vmem:[#allocation21_spill] sm:$0xff] %v2567_v55 }
 0x3e6   :  { %v840_v48 = vadd.f32 0.5, %v837_v62  ;;  %v844_v1 = vmul.f32 %v1643_v60, %v839_v54  ;;  %v838_v0 = vmul.f32 0.5, %v1645_v59  ;;  %v2570_v54 = vld [vmem:[#allocation5 + $0x90] sm:$0xff]  ;;  %v2573_v62 = vld [vmem:[#allocation5 + $0x68] sm:$0xff]  ;;  %v2579_v60 = vld [vmem:[#allocation5 + $0x60] sm:$0xff] }
 0x3e7   :  { %3010 = vst [vmem:[#allocation20_spill] sm:$0xff] %v2570_v54  ;;  %3011 = vst [vmem:[#allocation23_spill] sm:$0xff] %v2573_v62  ;;  %v2588_v59 = vld [vmem:[#allocation5 + $0x58] sm:$0xff] }
 0x3e8   :  { %v843_v47 = vmul.f32 %v840_v48, %v2354_v56  ;;  %v841_v5 = vadd.f32 0.5, %v838_v0  ;;  %v2441_v56 = vld [vmem:[#allocation5 + $0x1c8] sm:$0xff]  ;;  %v2576_v48 = vld [vmem:[#allocation5 + $0x78] sm:$0xff]  ;;  %3013 = vst [vmem:[#allocation25_spill] sm:$0xff] %v2579_v60  ;;  %3016 = vst [vmem:[#allocation26_spill] sm:$0xff] %v2588_v59 }
 0x3e9   :  { %3012 = vst [vmem:[#allocation22_spill] sm:$0xff] %v2576_v48  ;;  %v2591_v0 = vld [vmem:[#allocation5 + $0x40] sm:$0xff] }
 0x3ea   :  { %v2432_v50 = vadd.f32 %v844_v1, %v843_v47  ;;  %v2582_v47 = vld [vmem:[#allocation5 + $0x70] sm:$0xff]  ;;  %v2585_v1 = vld [vmem:[#allocation5 + $0x48] sm:$0xff]  ;;  %3017 = vst [vmem:[#allocation29_spill] sm:$0xff] %v2591_v0 }
 0x3eb   :  { %3014 = vst [vmem:[#allocation24_spill] sm:$0xff] %v2582_v47  ;;  %3015 = vst [vmem:[#allocation27_spill] sm:$0xff] %v2585_v1 }
 0x3ec   :  { %1646 = vtanh.f32 %v2432_v50 }
 0x3f9   :  { %v1647_v46 = vpop.eup %1646 }
 0x3fa   :  { %v847_v61 = vmul.f32 %v1647_v46, %v841_v5  ;;  %v2594_v5 = vld [vmem:[#allocation5 + $0x50] sm:$0xff]  ;;  %v2597_v46 = vld [vmem:[#allocation5 + $0x28] sm:$0xff] }
 0x3fb   :  { %3018 = vst [vmem:[#allocation28_spill] sm:$0xff] %v2594_v5  ;;  %3019 = vst [vmem:[#allocation31_spill] sm:$0xff] %v2597_v46 }
 0x3fc   :  { %849 = vst [vmem:[#allocation8 + $0x18] sm:$0xff] %v847_v61  ;;  %924 = vmatmul.mubr.f32.vlgmr.msra.gmra.mxu0 %v847_v61  ;;  %995 = vmatmul.mubr.f32.vlgmr.msra.gmra.mxu1 %v847_v61  ;;  %v2600_v61 = vld [vmem:[#allocation5 + $0x38] sm:$0xff] }
 0x3fd   :  { %1035 = vmatpush1.msra.mxu0 %v2435_v52  ;;  %1106 = vmatpush1.msra.mxu1 %v2438_v2  ;;  %3020 = vst [vmem:[#allocation30_spill] sm:$0xff] %v2600_v61 }
 0x3fe   :  { %1036 = vmatprep.subr.mxu0 %v2441_v56  ;;  %1107 = vmatprep.subr.mxu1 %v2444_v3 }
 0x3ff   :  { %1037 = vmatpush1.msra.mxu0 %v2447_v4  ;;  %1108 = vmatpush1.msra.mxu1 %v2450_v6 }
 0x400   :  { %1038 = vmatprep.subr.mxu0 %v2453_v7  ;;  %1109 = vmatprep.subr.mxu1 %v2456_v8 }
 0x401   :  { %1039 = vmatpush1.msra.mxu0 %v2459_v9  ;;  %1110 = vmatpush1.msra.mxu1 %v2462_v10 }
 0x402   :  { %1040 = vmatprep.subr.mxu0 %v2465_v11  ;;  %1111 = vmatprep.subr.mxu1 %v2468_v12 }
 0x403   :  { %1041 = vmatpush1.msra.mxu0 %v2471_v13  ;;  %1112 = vmatpush1.msra.mxu1 %v2474_v14 }
 0x404   :  { %1042 = vmatprep.subr.mxu0 %v2477_v15  ;;  %1113 = vmatprep.subr.mxu1 %v2480_v16 }
 0x405   :  { %1043 = vmatpush1.msra.mxu0 %v2483_v17  ;;  %1114 = vmatpush1.msra.mxu1 %v2486_v18 }
 0x406   :  { %1044 = vmatprep.subr.mxu0 %v2489_v19  ;;  %1115 = vmatprep.subr.mxu1 %v2492_v20 }
 0x407   :  { %1045 = vmatpush1.msra.mxu0 %v2495_v21  ;;  %1116 = vmatpush1.msra.mxu1 %v2498_v22 }
 0x408   :  { %1046 = vmatprep.subr.mxu0 %v2501_v24  ;;  %1117 = vmatprep.subr.mxu1 %v2504_v27 }
 0x409   :  { %1047 = vmatpush1.msra.mxu0 %v2507_v28  ;;  %1118 = vmatpush1.msra.mxu1 %v2510_v30 }
 0x40a   :  { %1048 = vmatprep.subr.mxu0 %v2513_v32  ;;  %1119 = vmatprep.subr.mxu1 %v2516_v33 }
 0x40b   :  { %1049 = vmatpush1.msra.mxu0 %v2519_v34  ;;  %1120 = vmatpush1.msra.mxu1 %v2522_v35 }
 0x40c   :  { %1050 = vmatprep.subr.mxu0 %v2525_v36  ;;  %1121 = vmatprep.subr.mxu1 %v2528_v37 }
 0x40d   :  { %1051 = vmatpush1.msra.mxu0 %v2531_v38  ;;  %1122 = vmatpush1.msra.mxu1 %v2534_v39 }
 0x40e   :  { %1052 = vmatprep.subr.mxu0 %v2537_v40  ;;  %1123 = vmatprep.subr.mxu1 %v2540_v41 }
 0x40f   :  { %1053 = vmatpush1.msra.mxu0 %v2543_v42  ;;  %1124 = vmatpush1.msra.mxu1 %v2546_v43 }
 0x410   :  { %1054 = vmatprep.subr.mxu0 %v2549_v57  ;;  %1125 = vmatprep.subr.mxu1 %v2552_v45 }
 0x411   :  { %1055 = vmatpush1.msra.mxu0 %v2555_v49  ;;  %1126 = vmatpush1.msra.mxu1 %v2558_v63 }
 0x412   :  { %1056 = vmatprep.subr.mxu0 %v2561_v53  ;;  %1127 = vmatprep.subr.mxu1 %v2564_v51  ;;  %v853_v51 = vld [vmem:[#allocation2 + $0x90] sm:$0xff] }
 0x413   :  { %1057 = vmatpush1.msra.mxu0 %v2567_v55  ;;  %1128 = vmatpush1.msra.mxu1 %v2570_v54  ;;  %v857_v53 = vadd.f32 %v853_v51, %v2203_v44 }
 0x414   :  { %1058 = vmatprep.subr.mxu0 %v2573_v62  ;;  %1129 = vmatprep.subr.mxu1 %v2576_v48 }
 0x415   :  { %1059 = vmatpush1.msra.mxu0 %v2579_v60  ;;  %1130 = vmatpush1.msra.mxu1 %v2582_v47  ;;  %v854_v60 = vld [vmem:[#allocation2 + $0x98] sm:$0xff] }
 0x416   :  { %1060 = vmatprep.subr.mxu0 %v2585_v1  ;;  %1131 = vmatprep.subr.mxu1 %v2588_v59  ;;  %v2603_v1 = vld [vmem:[#allocation5 + $0x20] sm:$0xff]  ;;  %v2606_v59 = vld [vmem:[#allocation5 + $0x30] sm:$0xff] }
 0x417   :  { %1061 = vmatpush1.msra.mxu0 %v2591_v0  ;;  %1132 = vmatpush1.msra.mxu1 %v2594_v5  ;;  %3021 = vst [vmem:[#allocation33_spill] sm:$0xff] %v2603_v1  ;;  %3022 = vst [vmem:[#allocation32_spill] sm:$0xff] %v2606_v59  ;;  %v2609_v0 = vld [vmem:[#allocation5 + $0x8] sm:$0xff]  ;;  %v2612_v5 = vld [vmem:[#allocation5 + $0x18] sm:$0xff] }
 0x418   :  { %1062 = vmatprep.subr.mxu0 %v2597_v46  ;;  %1133 = vmatprep.subr.mxu1 %v2600_v61  ;;  %3023 = vst [vmem:[#allocation35_spill] sm:$0xff] %v2609_v0  ;;  %3024 = vst [vmem:[#allocation34_spill] sm:$0xff] %v2612_v5  ;;  %v2615_v46 = vld [vmem:[#allocation5] sm:$0xff]  ;;  %v2619_v61 = vld [vmem:[#allocation5 + $0x10] sm:$0xff] }
 0x419   :  { %1063 = vmatpush1.msra.mxu0 %v2603_v1  ;;  %1134 = vmatpush1.msra.mxu1 %v2606_v59  ;;  %3025 = vst [vmem:[#allocation37_spill] sm:$0xff] %v2615_v46  ;;  %3026 = vst [vmem:[#allocation36_spill] sm:$0xff] %v2619_v61  ;;  %v852_v59 = vld [vmem:[#allocation2 + $0x88] sm:$0xff] }
 0x41a   :  { %1064 = vmatprep.subr.mxu0 %v2609_v0  ;;  %1135 = vmatprep.subr.mxu1 %v2612_v5  ;;  %v851_v0 = vld [vmem:[#allocation2 + $0x80] sm:$0xff]  ;;  %v856_v1 = vadd.f32 %v852_v59, %v3005_v31 }
 0x41b   :  { %1065 = vmatpush1.msra.mxu0 %v2615_v46  ;;  %1098 = vmatprep.mubr.f32.mxu0 %v3000_v23  ;;  %v855_v5 = vadd.f32 %v851_v0, %v3004_v29 }
 0x41c   :  { %1136 = vmatpush1.msra.mxu1 %v2619_v61  ;;  %1169 = vmatprep.mubr.f32.mxu1 %v3000_v23  ;;  %v858_v61 = vadd.f32 %v854_v60, %v2953_v58 }
 0x41d   :  { %1209 = vmatprep.subr.mxu0 %v2421_v25  ;;  %1280 = vmatprep.subr.mxu1 %v2424_v26 }
 0x4bc   :  { %v925_v47 = vpop.f32.mrf.mxu0  ;;  %v996_v46 = vpop.f32.mrf.mxu1 }
 0x4bd   :  { %v1001_v48 = vadd.f32 %v925_v47, %v855_v5  ;;  %v1003_v0 = vadd.f32 %v996_v46, %v857_v53  ;;  %v3031_v5 = vld [vmem:[#allocation20_spill] sm:$0xff]  ;;  %v3032_v46 = vld [vmem:[#allocation23_spill] sm:$0xff] }
 0x4be   :  { %v927_v62 = vpop.f32.mrf.mxu0  ;;  %v998_v23 = vpop.f32.mrf.mxu1 }
 0x4bf   :  { %v1005_v54 = vmul.f32 0.5, %v1001_v48  ;;  %v1002_v55 = vadd.f32 %v927_v62, %v856_v1  ;;  %v1004_v26 = vadd.f32 %v998_v23, %v858_v61  ;;  %v1007_v59 = vmul.f32 0.5, %v1003_v0  ;;  %v3033_v61 = vld [vmem:[#allocation22_spill] sm:$0xff]  ;;  %v3034_v0 = vld [vmem:[#allocation25_spill] sm:$0xff] }
 0x4c1   :  { %1648 = vtanh.f32 %v1005_v54  ;;  %v1006_v25 = vmul.f32 0.5, %v1002_v55 }
 0x4c3   :  { %1650 = vtanh.f32 %v1006_v25 }
 0x4c4   :  { %1652 = vtanh.f32 %v1004_v26 }
 0x4c5   :  { %1654 = vtanh.f32 %v1007_v59  ;;  %v3035_v59 = vld [vmem:[#allocation24_spill] sm:$0xff] }
 0x4ce   :  { %v1649_v31 = vpop.eup %1648 }
 0x4cf   :  { %v1011_v29 = vmul.f32 0.5, %v1649_v31  ;;  %v3028_v31 = vld [vmem:[#allocation19_spill] sm:$0xff] }
 0x4d0   :  { %v1651_v63 = vpop.eup %1650 }
 0x4d1   :  { %v1014_v47 = vadd.f32 0.5, %v1011_v29  ;;  %v1012_v48 = vmul.f32 0.5, %v1651_v63  ;;  %v1653_v1 = vpop.eup %1652  ;;  %v3027_v29 = vld [vmem:[#allocation17_spill] sm:$0xff] }
 0x4d2   :  { %v1655_v23 = vpop.eup %1654  ;;  %v3030_v63 = vld [vmem:[#allocation21_spill] sm:$0xff] }
 0x4d3   :  { %v1015_v62 = vadd.f32 0.5, %v1012_v48  ;;  %v1019_v54 = vmul.f32 %v1653_v1, %v1014_v47  ;;  %v1013_v25 = vmul.f32 0.5, %v1655_v23  ;;  %v3036_v47 = vld [vmem:[#allocation27_spill] sm:$0xff]  ;;  %v3037_v48 = vld [vmem:[#allocation26_spill] sm:$0xff]  ;;  %v3039_v1 = vld [vmem:[#allocation28_spill] sm:$0xff] }
 0x4d4   :  { %v3042_v23 = vld [vmem:[#allocation33_spill] sm:$0xff] }
 0x4d5   :  { %v1018_v60 = vmul.f32 %v1015_v62, %v2432_v50  ;;  %v1016_v26 = vadd.f32 0.5, %v1013_v25  ;;  %v3029_v50 = vld [vmem:[#allocation18_spill] sm:$0xff]  ;;  %v3038_v62 = vld [vmem:[#allocation29_spill] sm:$0xff]  ;;  %v3043_v25 = vld [vmem:[#allocation32_spill] sm:$0xff] }
 0x4d7   :  { %v2630_v55 = vadd.f32 %v1019_v54, %v1018_v60  ;;  %v3040_v60 = vld [vmem:[#allocation31_spill] sm:$0xff]  ;;  %v3041_v54 = vld [vmem:[#allocation30_spill] sm:$0xff] }
 0x4d9   :  { %1656 = vtanh.f32 %v2630_v55 }
 0x4e6   :  { %v1657_v53 = vpop.eup %1656 }
 0x4e7   :  { %v1022_v51 = vmul.f32 %v1657_v53, %v1016_v26  ;;  %v3044_v26 = vld [vmem:[#allocation35_spill] sm:$0xff]  ;;  %v3045_v53 = vld [vmem:[#allocation34_spill] sm:$0xff] }
 0x4e9   :  { %1024 = vst [vmem:[#allocation8 + $0x20] sm:$0xff] %v1022_v51  ;;  %1099 = vmatmul.mubr.f32.vlgmr.msra.gmra.mxu0 %v1022_v51  ;;  %1170 = vmatmul.mubr.f32.vlgmr.msra.gmra.mxu1 %v1022_v51  ;;  %v3046_v51 = vld [vmem:[#allocation37_spill] sm:$0xff] }
 0x4ea   :  { %1210 = vmatpush1.msra.mxu0 %v2435_v52  ;;  %1281 = vmatpush1.msra.mxu1 %v2438_v2 }
 0x4eb   :  { %1211 = vmatprep.subr.mxu0 %v2441_v56  ;;  %1282 = vmatprep.subr.mxu1 %v2444_v3 }
 0x4ec   :  { %1212 = vmatpush1.msra.mxu0 %v2447_v4  ;;  %1283 = vmatpush1.msra.mxu1 %v2450_v6 }
 0x4ed   :  { %1213 = vmatprep.subr.mxu0 %v2453_v7  ;;  %1284 = vmatprep.subr.mxu1 %v2456_v8 }
 0x4ee   :  { %1214 = vmatpush1.msra.mxu0 %v2459_v9  ;;  %1285 = vmatpush1.msra.mxu1 %v2462_v10 }
 0x4ef   :  { %1215 = vmatprep.subr.mxu0 %v2465_v11  ;;  %1286 = vmatprep.subr.mxu1 %v2468_v12 }
 0x4f0   :  { %1216 = vmatpush1.msra.mxu0 %v2471_v13  ;;  %1287 = vmatpush1.msra.mxu1 %v2474_v14 }
 0x4f1   :  { %1217 = vmatprep.subr.mxu0 %v2477_v15  ;;  %1288 = vmatprep.subr.mxu1 %v2480_v16 }
 0x4f2   :  { %1218 = vmatpush1.msra.mxu0 %v2483_v17  ;;  %1289 = vmatpush1.msra.mxu1 %v2486_v18 }
 0x4f3   :  { %1219 = vmatprep.subr.mxu0 %v2489_v19  ;;  %1290 = vmatprep.subr.mxu1 %v2492_v20 }
 0x4f4   :  { %1220 = vmatpush1.msra.mxu0 %v2495_v21  ;;  %1291 = vmatpush1.msra.mxu1 %v2498_v22 }
 0x4f5   :  { %1221 = vmatprep.subr.mxu0 %v2501_v24  ;;  %1292 = vmatprep.subr.mxu1 %v2504_v27 }
 0x4f6   :  { %1222 = vmatpush1.msra.mxu0 %v2507_v28  ;;  %1293 = vmatpush1.msra.mxu1 %v2510_v30 }
 0x4f7   :  { %1223 = vmatprep.subr.mxu0 %v2513_v32  ;;  %1294 = vmatprep.subr.mxu1 %v2516_v33 }
 0x4f8   :  { %1224 = vmatpush1.msra.mxu0 %v2519_v34  ;;  %1295 = vmatpush1.msra.mxu1 %v2522_v35 }
 0x4f9   :  { %1225 = vmatprep.subr.mxu0 %v2525_v36  ;;  %1296 = vmatprep.subr.mxu1 %v2528_v37 }
 0x4fa   :  { %1226 = vmatpush1.msra.mxu0 %v2531_v38  ;;  %1297 = vmatpush1.msra.mxu1 %v2534_v39 }
 0x4fb   :  { %1227 = vmatprep.subr.mxu0 %v2537_v40  ;;  %1298 = vmatprep.subr.mxu1 %v2540_v41 }
 0x4fc   :  { %1228 = vmatpush1.msra.mxu0 %v2543_v42  ;;  %1299 = vmatpush1.msra.mxu1 %v2546_v43 }
 0x4fd   :  { %1229 = vmatprep.subr.mxu0 %v2549_v57  ;;  %1300 = vmatprep.subr.mxu1 %v2552_v45 }
 0x4fe   :  { %1230 = vmatpush1.msra.mxu0 %v2555_v49  ;;  %1301 = vmatpush1.msra.mxu1 %v3027_v29 }
 0x4ff   :  { %1231 = vmatprep.subr.mxu0 %v3028_v31  ;;  %1302 = vmatprep.subr.mxu1 %v3029_v50  ;;  %v1028_v50 = vld [vmem:[#allocation2 + $0xb0] sm:$0xff] }
 0x500   :  { %1232 = vmatpush1.msra.mxu0 %v3030_v63  ;;  %1303 = vmatpush1.msra.mxu1 %v3031_v5  ;;  %v1032_v31 = vadd.f32 %v1028_v50, %v2203_v44 }
 0x501   :  { %1233 = vmatprep.subr.mxu0 %v3032_v46  ;;  %1304 = vmatprep.subr.mxu1 %v3033_v61  ;;  %v1029_v61 = vld [vmem:[#allocation2 + $0xb8] sm:$0xff] }
 0x502   :  { %1234 = vmatpush1.msra.mxu0 %v3034_v0  ;;  %1305 = vmatpush1.msra.mxu1 %v3035_v59  ;;  %v3052_v59 = vld [vmem:[#allocation40_spill] sm:$0xff] }
 0x503   :  { %1235 = vmatprep.subr.mxu0 %v3036_v47  ;;  %1306 = vmatprep.subr.mxu1 %v3037_v48  ;;  %v3047_v47 = vmov 0.0   ;;  %v3048_v48 = vld [vmem:[#allocation36_spill] sm:$0xff] }
 0x504   :  { %1236 = vmatpush1.msra.mxu0 %v3038_v62  ;;  %1307 = vmatpush1.msra.mxu1 %v3039_v1  ;;  %v3049_v1 = vld [vmem:[#allocation41_spill] sm:$0xff]  ;;  %v3051_v62 = vld [vmem:[#allocation39_spill] sm:$0xff] }
 0x505   :  { %1237 = vmatprep.subr.mxu0 %v3040_v60  ;;  %1308 = vmatprep.subr.mxu1 %v3041_v54  ;;  %v3050_v60 = vld [vmem:[#allocation16_spill] sm:$0xff]  ;;  %v1026_v54 = vld [vmem:[#allocation2 + $0xa0] sm:$0xff] }
 0x506   :  { %1238 = vmatpush1.msra.mxu0 %v3042_v23  ;;  %1309 = vmatpush1.msra.mxu1 %v3043_v25  ;;  %v1027_v23 = vld [vmem:[#allocation2 + $0xa8] sm:$0xff]  ;;  %v1030_v25 = vadd.f32 %v1026_v54, %v3051_v62 }
 0x507   :  { %1239 = vmatprep.subr.mxu0 %v3044_v26  ;;  %1310 = vmatprep.subr.mxu1 %v3045_v53  ;;  %v1031_v26 = vadd.f32 %v1027_v23, %v3052_v59 }
 0x508   :  { %1240 = vmatpush1.msra.mxu0 %v3046_v51  ;;  %1273 = vmatprep.mubr.f32.mxu0 %v3047_v47 }
 0x509   :  { %1311 = vmatpush1.msra.mxu1 %v3048_v48  ;;  %1344 = vmatprep.mubr.f32.mxu1 %v3047_v47  ;;  %v1033_v48 = vadd.f32 %v1029_v61, %v2953_v58 }
 0x50a   :  { %1384 = vmatprep.subr.mxu0 %v3049_v1  ;;  %1455 = vmatprep.subr.mxu1 %v3050_v60 }
 0x5a9   :  { %v1100_v0 = vpop.f32.mrf.mxu0  ;;  %v1171_v53 = vpop.f32.mrf.mxu1 }
 0x5aa   :  { %v1176_v51 = vadd.f32 %v1100_v0, %v1030_v25  ;;  %v1178_v54 = vadd.f32 %v1171_v53, %v1032_v31 }
 0x5ab   :  { %v1102_v46 = vpop.f32.mrf.mxu0  ;;  %v1173_v47 = vpop.f32.mrf.mxu1 }
 0x5ac   :  { %v1180_v5 = vmul.f32 0.5, %v1176_v51  ;;  %v1177_v63 = vadd.f32 %v1102_v46, %v1031_v26  ;;  %v1179_v60 = vadd.f32 %v1173_v47, %v1033_v48  ;;  %v1182_v23 = vmul.f32 0.5, %v1178_v54 }
 0x5ae   :  { %1658 = vtanh.f32 %v1180_v5  ;;  %v1181_v1 = vmul.f32 0.5, %v1177_v63 }
 0x5b0   :  { %1660 = vtanh.f32 %v1181_v1 }
 0x5b1   :  { %1662 = vtanh.f32 %v1179_v60 }
 0x5b2   :  { %1664 = vtanh.f32 %v1182_v23 }
 0x5bb   :  { %v1659_v59 = vpop.eup %1658 }
 0x5bc   :  { %v1186_v62 = vmul.f32 0.5, %v1659_v59 }
 0x5bd   :  { %v1661_v29 = vpop.eup %1660 }
 0x5be   :  { %v1189_v0 = vadd.f32 0.5, %v1186_v62  ;;  %v1187_v25 = vmul.f32 0.5, %v1661_v29  ;;  %v1663_v26 = vpop.eup %1662 }
 0x5bf   :  { %v1665_v47 = vpop.eup %1664 }
 0x5c0   :  { %v1190_v46 = vadd.f32 0.5, %v1187_v25  ;;  %v1194_v5 = vmul.f32 %v1663_v26, %v1189_v0  ;;  %v1188_v50 = vmul.f32 0.5, %v1665_v47 }
 0x5c2   :  { %v1193_v61 = vmul.f32 %v1190_v46, %v2630_v55  ;;  %v1191_v48 = vadd.f32 0.5, %v1188_v50 }
 0x5c4   :  { %v2704_v63 = vadd.f32 %v1194_v5, %v1193_v61 }
 0x5c6   :  { %1666 = vtanh.f32 %v2704_v63 }
 0x5d3   :  { %v1667_v31 = vpop.eup %1666 }
 0x5d4   :  { %v1197_v53 = vmul.f32 %v1667_v31, %v1191_v48  ;;  %v1376_v48 = vld [vmem:[#allocation2 + $0xe0] sm:$0xff]  ;;  %v1377_v31 = vld [vmem:[#allocation2 + $0xe8] sm:$0xff] }
 0x5d6   :  { %1199 = vst [vmem:[#allocation8 + $0x28] sm:$0xff] %v1197_v53  ;;  %1274 = vmatmul.mubr.f32.vlgmr.msra.gmra.mxu0 %v1197_v53  ;;  %1345 = vmatmul.mubr.f32.vlgmr.msra.gmra.mxu1 %v1197_v53 }
 0x5d7   :  { %1385 = vmatpush1.msra.mxu0 %v2435_v52  ;;  %1456 = vmatpush1.msra.mxu1 %v2438_v2  ;;  %v3053_v52 = vld [vmem:[#allocation17_spill] sm:$0xff]  ;;  %v3054_v2 = vld [vmem:[#allocation19_spill] sm:$0xff] }
 0x5d8   :  { %1386 = vmatprep.subr.mxu0 %v2441_v56  ;;  %1457 = vmatprep.subr.mxu1 %v2444_v3  ;;  %v3055_v56 = vld [vmem:[#allocation18_spill] sm:$0xff]  ;;  %v3056_v3 = vld [vmem:[#allocation21_spill] sm:$0xff] }
 0x5d9   :  { %1387 = vmatpush1.msra.mxu0 %v2447_v4  ;;  %1458 = vmatpush1.msra.mxu1 %v2450_v6  ;;  %v3057_v4 = vld [vmem:[#allocation20_spill] sm:$0xff]  ;;  %v3058_v6 = vld [vmem:[#allocation23_spill] sm:$0xff] }
 0x5da   :  { %1388 = vmatprep.subr.mxu0 %v2453_v7  ;;  %1459 = vmatprep.subr.mxu1 %v2456_v8  ;;  %v3059_v7 = vld [vmem:[#allocation22_spill] sm:$0xff]  ;;  %v3060_v8 = vld [vmem:[#allocation25_spill] sm:$0xff] }
 0x5db   :  { %1389 = vmatpush1.msra.mxu0 %v2459_v9  ;;  %1460 = vmatpush1.msra.mxu1 %v2462_v10  ;;  %v3061_v9 = vld [vmem:[#allocation24_spill] sm:$0xff]  ;;  %v3062_v10 = vld [vmem:[#allocation27_spill] sm:$0xff] }
 0x5dc   :  { %1390 = vmatprep.subr.mxu0 %v2465_v11  ;;  %1461 = vmatprep.subr.mxu1 %v2468_v12  ;;  %v3063_v11 = vld [vmem:[#allocation26_spill] sm:$0xff]  ;;  %v3064_v12 = vld [vmem:[#allocation29_spill] sm:$0xff] }
 0x5dd   :  { %1391 = vmatpush1.msra.mxu0 %v2471_v13  ;;  %1462 = vmatpush1.msra.mxu1 %v2474_v14  ;;  %v3065_v13 = vld [vmem:[#allocation28_spill] sm:$0xff]  ;;  %v3066_v14 = vld [vmem:[#allocation31_spill] sm:$0xff] }
 0x5de   :  { %1392 = vmatprep.subr.mxu0 %v2477_v15  ;;  %1463 = vmatprep.subr.mxu1 %v2480_v16  ;;  %v3067_v15 = vld [vmem:[#allocation30_spill] sm:$0xff]  ;;  %v3068_v16 = vld [vmem:[#allocation33_spill] sm:$0xff] }
 0x5df   :  { %1393 = vmatpush1.msra.mxu0 %v2483_v17  ;;  %1464 = vmatpush1.msra.mxu1 %v2486_v18  ;;  %v3069_v17 = vld [vmem:[#allocation32_spill] sm:$0xff]  ;;  %v3070_v18 = vld [vmem:[#allocation35_spill] sm:$0xff] }
 0x5e0   :  { %1394 = vmatprep.subr.mxu0 %v2489_v19  ;;  %1465 = vmatprep.subr.mxu1 %v2492_v20  ;;  %v3071_v19 = vld [vmem:[#allocation34_spill] sm:$0xff]  ;;  %v3072_v20 = vld [vmem:[#allocation37_spill] sm:$0xff] }
 0x5e1   :  { %1395 = vmatpush1.msra.mxu0 %v2495_v21  ;;  %1466 = vmatpush1.msra.mxu1 %v2498_v22  ;;  %v3073_v21 = vmov 0.0   ;;  %v3074_v22 = vld [vmem:[#allocation36_spill] sm:$0xff] }
 0x5e2   :  { %1396 = vmatprep.subr.mxu0 %v2501_v24  ;;  %1467 = vmatprep.subr.mxu1 %v2504_v27  ;;  %v1201_v24 = vld [vmem:[#allocation2 + $0xc0] sm:$0xff]  ;;  %v1202_v27 = vld [vmem:[#allocation2 + $0xc8] sm:$0xff] }
 0x5e3   :  { %1397 = vmatpush1.msra.mxu0 %v2507_v28  ;;  %1468 = vmatpush1.msra.mxu1 %v2510_v30  ;;  %v3075_v28 = vld [vmem:[#allocation39_spill] sm:$0xff] }
 0x5e4   :  { %1398 = vmatprep.subr.mxu0 %v2513_v32  ;;  %1469 = vmatprep.subr.mxu1 %v2516_v33  ;;  %v1205_v30 = vadd.f32 %v1201_v24, %v3075_v28  ;;  %v3076_v32 = vld [vmem:[#allocation40_spill] sm:$0xff]  ;;  %v1380_v53 = vadd.f32 %v1376_v48, %v3075_v28 }
 0x5e5   :  { %1399 = vmatpush1.msra.mxu0 %v2519_v34  ;;  %1470 = vmatpush1.msra.mxu1 %v2522_v35  ;;  %v1206_v33 = vadd.f32 %v1202_v27, %v3076_v32 }
 0x5e6   :  { %1400 = vmatprep.subr.mxu0 %v2525_v36  ;;  %1471 = vmatprep.subr.mxu1 %v2528_v37  ;;  %v1204_v36 = vld [vmem:[#allocation2 + $0xd8] sm:$0xff] }
 0x5e7   :  { %1401 = vmatpush1.msra.mxu0 %v2531_v38  ;;  %1472 = vmatpush1.msra.mxu1 %v2534_v39 }
 0x5e8   :  { %1402 = vmatprep.subr.mxu0 %v2537_v40  ;;  %1473 = vmatprep.subr.mxu1 %v2540_v41  ;;  %v1208_v41 = vadd.f32 %v1204_v36, %v2953_v58 }
 0x5e9   :  { %1403 = vmatpush1.msra.mxu0 %v2543_v42  ;;  %1474 = vmatpush1.msra.mxu1 %v2546_v43 }
 0x5ea   :  { %1404 = vmatprep.subr.mxu0 %v2549_v57  ;;  %1475 = vmatprep.subr.mxu1 %v2552_v45  ;;  %v1203_v57 = vld [vmem:[#allocation2 + $0xd0] sm:$0xff] }
 0x5eb   :  { %1405 = vmatpush1.msra.mxu0 %v2555_v49  ;;  %1476 = vmatpush1.msra.mxu1 %v3053_v52  ;;  %v1207_v49 = vadd.f32 %v1203_v57, %v2203_v44  ;;  %v1381_v52 = vadd.f32 %v1377_v31, %v3076_v32 }
 0x5ec   :  { %1406 = vmatprep.subr.mxu0 %v3054_v2  ;;  %1477 = vmatprep.subr.mxu1 %v3055_v56 }
 0x5ed   :  { %1407 = vmatpush1.msra.mxu0 %v3056_v3  ;;  %1478 = vmatpush1.msra.mxu1 %v3057_v4 }
 0x5ee   :  { %1408 = vmatprep.subr.mxu0 %v3058_v6  ;;  %1479 = vmatprep.subr.mxu1 %v3059_v7 }
 0x5ef   :  { %1409 = vmatpush1.msra.mxu0 %v3060_v8  ;;  %1480 = vmatpush1.msra.mxu1 %v3061_v9 }
 0x5f0   :  { %1410 = vmatprep.subr.mxu0 %v3062_v10  ;;  %1481 = vmatprep.subr.mxu1 %v3063_v11  ;;  %v1378_v11 = vld [vmem:[#allocation2 + $0xf0] sm:$0xff] }
 0x5f1   :  { %1411 = vmatpush1.msra.mxu0 %v3064_v12  ;;  %1482 = vmatpush1.msra.mxu1 %v3065_v13  ;;  %v1382_v13 = vadd.f32 %v1378_v11, %v2203_v44 }
 0x5f2   :  { %1412 = vmatprep.subr.mxu0 %v3066_v14  ;;  %1483 = vmatprep.subr.mxu1 %v3067_v15 }
 0x5f3   :  { %1413 = vmatpush1.msra.mxu0 %v3068_v16  ;;  %1484 = vmatpush1.msra.mxu1 %v3069_v17 }
 0x5f4   :  { %1414 = vmatprep.subr.mxu0 %v3070_v18  ;;  %1485 = vmatprep.subr.mxu1 %v3071_v19 }
 0x5f5   :  { %1415 = vmatpush1.msra.mxu0 %v3072_v20  ;;  %1448 = vmatprep.mubr.f32.mxu0 %v3073_v21 }
 0x5f6   :  { %1486 = vmatpush1.msra.mxu1 %v3074_v22  ;;  %1519 = vmatprep.mubr.f32.mxu1 %v3073_v21 }
 0x696   :  { %v1275_v34 = vpop.f32.mrf.mxu0  ;;  %v1346_v35 = vpop.f32.mrf.mxu1 }
 0x697   :  { %v1351_v37 = vadd.f32 %v1275_v34, %v1205_v30  ;;  %v1353_v55 = vadd.f32 %v1346_v35, %v1207_v49 }
 0x698   :  { %v1277_v38 = vpop.f32.mrf.mxu0  ;;  %v1348_v42 = vpop.f32.mrf.mxu1 }
 0x699   :  { %v1355_v39 = vmul.f32 0.5, %v1351_v37  ;;  %v1352_v40 = vadd.f32 %v1277_v38, %v1206_v33  ;;  %v1354_v45 = vadd.f32 %v1348_v42, %v1208_v41  ;;  %v1357_v29 = vmul.f32 0.5, %v1353_v55 }
 0x69b   :  { %1668 = vtanh.f32 %v1355_v39  ;;  %v1356_v43 = vmul.f32 0.5, %v1352_v40 }
 0x69d   :  { %1670 = vtanh.f32 %v1356_v43 }
 0x69e   :  { %1672 = vtanh.f32 %v1354_v45 }
 0x69f   :  { %1674 = vtanh.f32 %v1357_v29 }
 0x6a8   :  { %v1669_v59 = vpop.eup %1668 }
 0x6a9   :  { %v1361_v62 = vmul.f32 0.5, %v1669_v59 }
 0x6aa   :  { %v1671_v51 = vpop.eup %1670 }
 0x6ab   :  { %v1364_v1 = vadd.f32 0.5, %v1361_v62  ;;  %v1362_v60 = vmul.f32 0.5, %v1671_v51  ;;  %v1673_v23 = vpop.eup %1672 }
 0x6ac   :  { %v1675_v26 = vpop.eup %1674 }
 0x6ad   :  { %v1365_v54 = vadd.f32 0.5, %v1362_v60  ;;  %v1369_v25 = vmul.f32 %v1673_v23, %v1364_v1  ;;  %v1363_v61 = vmul.f32 0.5, %v1675_v26 }
 0x6af   :  { %v1368_v0 = vmul.f32 %v1365_v54, %v2704_v63  ;;  %v1366_v5 = vadd.f32 0.5, %v1363_v61  ;;  %v1379_v63 = vld [vmem:[#allocation2 + $0xf8] sm:$0xff] }
 0x6b0   :  { %v1383_v8 = vadd.f32 %v1379_v63, %v2953_v58 }
 0x6b1   :  { %v1370_v46 = vadd.f32 %v1369_v25, %v1368_v0 }
 0x6b3   :  { %1676 = vtanh.f32 %v1370_v46 }
 0x6c0   :  { %v1677_v47 = vpop.eup %1676 }
 0x6c1   :  { %v1372_v50 = vmul.f32 %v1677_v47, %v1366_v5 }
 0x6c3   :  { %1374 = vst [vmem:[#allocation8 + $0x30] sm:$0xff] %v1372_v50  ;;  %1449 = vmatmul.mubr.f32.vlgmr.msra.gmra.mxu0 %v1372_v50  ;;  %1520 = vmatmul.mubr.f32.vlgmr.msra.gmra.mxu1 %v1372_v50 }
 0x783   :  { %v1450_v2 = vpop.f32.mrf.mxu0  ;;  %v1521_v56 = vpop.f32.mrf.mxu1 }
 0x784   :  { %v1526_v3 = vadd.f32 %v1450_v2, %v1380_v53  ;;  %v1528_v14 = vadd.f32 %v1521_v56, %v1382_v13 }
 0x785   :  { %v1452_v4 = vpop.f32.mrf.mxu0  ;;  %v1523_v9 = vpop.f32.mrf.mxu1 }
 0x786   :  { %v1530_v6 = vmul.f32 0.5, %v1526_v3  ;;  %v1527_v7 = vadd.f32 %v1452_v4, %v1381_v52  ;;  %v1529_v12 = vadd.f32 %v1523_v9, %v1383_v8  ;;  %v1532_v15 = vmul.f32 0.5, %v1528_v14 }
 0x788   :  { %1678 = vtanh.f32 %v1530_v6  ;;  %v1531_v10 = vmul.f32 0.5, %v1527_v7 }
 0x78a   :  { %1680 = vtanh.f32 %v1531_v10 }
 0x78b   :  { %1682 = vtanh.f32 %v1529_v12 }
 0x78c   :  { %1684 = vtanh.f32 %v1532_v15 }
 0x795   :  { %v1679_v16 = vpop.eup %1678 }
 0x796   :  { %v1536_v17 = vmul.f32 0.5, %v1679_v16 }
 0x797   :  { %v1681_v18 = vpop.eup %1680 }
 0x798   :  { %v1539_v19 = vadd.f32 0.5, %v1536_v17  ;;  %v1537_v20 = vmul.f32 0.5, %v1681_v18  ;;  %v1683_v22 = vpop.eup %1682 }
 0x799   :  { %v1685_v28 = vpop.eup %1684 }
 0x79a   :  { %v1540_v21 = vadd.f32 0.5, %v1537_v20  ;;  %v1544_v24 = vmul.f32 %v1683_v22, %v1539_v19  ;;  %v1538_v30 = vmul.f32 0.5, %v1685_v28 }
 0x79c   :  { %v1543_v58 = vmul.f32 %v1540_v21, %v1370_v46  ;;  %v1541_v44 = vadd.f32 0.5, %v1538_v30 }
 0x79e   :  { %v1545_v27 = vadd.f32 %v1544_v24, %v1543_v58 }
 0x7a0   :  { %1686 = vtanh.f32 %v1545_v27  ;;  %1551 = vst [vmem:[#allocation11] sm:$0xff] %v1545_v27 }
 0x7ad   :  { %v1687_v32 = vpop.eup %1686 }
 0x7ae   :  { %v1547_v33 = vmul.f32 %v1687_v32, %v1541_v44 }
 0x7b0   :  { %1549 = vst [vmem:[#allocation8 + $0x38] sm:$0xff] %v1547_v33  ;;  %1550 = vst [vmem:[#allocation9] sm:$0xff] %v1547_v33 }
 0x7b1   :  { %1823 = shalt.err (!%p1820_p5)
}
 0x7b2   :  { %1573 = dma.vmem_to_hbm [thread:$0]  %s1571_s2, 128, %s2793_s4, [#allocation10]  }
 0x7b3   :  { %s1832_s16 = scalar_lea.vmem %s1558_s10, 1024  ;;  %p1837_p7 = scmp.lt.s32.totalorder %s1558_s10, %s1558_s10 }
 0x7b4   :  { %p1833_p6 = scmp.ne.s32.totalorder %s1558_s10, %s1832_s16  ;;  %p1838_p8 = scmp.lt.s32.totalorder %s1832_s16, %s1832_s16 }
 0x7b6   :  { %p1839_p9 = por %p1838_p8, %p1837_p7 }
 0x7b8   :  { %p1840_p10 = pnand %p1839_p9, %p1833_p6 }
 0x7ba   :  { %1843 = shalt.err (!%p1840_p10)
}
 0x7bb   :  { %s1889_s17 = smov 128   ;;  %s1890_s18 = smov 8  }
 0x7bc   :  { %1563 = dma.vmem_to_hbm [thread:$0]  %s1558_s10, 1024, %s2792_s3, [#allocation4], %s1889_s17, %s1889_s17, %s1890_s18  }
 0x7bd   :  { %s1852_s21 = scalar_lea.vmem %s1581_s12, 128  ;;  %p1857_p12 = scmp.lt.s32.totalorder %s1581_s12, %s1581_s12 }
 0x7be   :  { %p1853_p11 = scmp.ne.s32.totalorder %s1581_s12, %s1852_s21  ;;  %p1858_p13 = scmp.lt.s32.totalorder %s1852_s21, %s1852_s21 }
 0x7c0   :  { %p1859_p0 = por %p1858_p13, %p1857_p12 }
 0x7c2   :  { %p1860_p1 = pnand %p1859_p0, %p1853_p11 }
 0x7c4   :  { %1863 = shalt.err (!%p1860_p1)
}
 0x7c5   :  { %1583 = dma.vmem_to_hbm [thread:$0]  %s1581_s12, 128, %s2794_s5, [#allocation10]  }
 0x7c6   :  { %1876 = dma.done.wait [#allocation4], 1024  }
 0x7c7   :  { %1877 = vsyncadd [#allocation4], 4294966272 }
 0x7c8   :  { %1878 = dma.done.wait [#allocation10], 256  }
 0x7c9   :  { %1879 = vsyncadd [#allocation10], 4294967040 }
 0x7ca   :  { %1593 = vsyncpa [#allocation3], 1 }
 0x7cb   :  { %1594 = vsyncpa [#allocation6], 1 }
 0x7cc   :  { %1595 = vsyncpa [#allocation4], 1 }
 0x7cd   :  { %1596 = vsyncpa [#allocation10], 1 }

</bundles_post_ra>
